<compile_context>
chip_gen: v6e
topology: v6e:2x2x1
jax: 0.10.0
libtpu: 0.0.40
codegen_flags: <defaults>
</compile_context>

<pallas_src>
import functools

import numpy as np

import jax
import jax.numpy as jnp
from jax.experimental import pallas as pl
from jax.experimental.pallas import tpu as pltpu

_EPS = 1e-5
_VMEM_LIMIT = 32 * 1024 * 1024
# Set to jnp.bfloat16 on v6e/v7x for more MXU throughput (then loosen the test tolerance to
# ~1e-2).  GroupNorm statistics always stay in f32 (_dot_f32).
_MM_DTYPE = jnp.float32


def _dot(a, b):
    return jnp.dot(a.astype(_MM_DTYPE), b.astype(_MM_DTYPE),
                   preferred_element_type=jnp.float32)


def _dot_f32(a, b):
    return jnp.dot(a, b, preferred_element_type=jnp.float32)


def _silu(x):
    return x * jax.nn.sigmoid(x)


# ---------------- in-kernel helpers (traced inline into the fused kernel) ----------------

def _conv3x3_rows(pad_ref, wtap, hh):
    # 3x3 'same' conv on a row-padded, lane-dense (rows, W*Cin) buffer.  The kw taps and the
    # w-direction zero padding are folded into banded (W*Cin, W*Cout) weights, so the conv is
    # just 3 row-shifted MXU matmuls.
    return (_dot(pad_ref[0:hh, :], wtap(0))
            + _dot(pad_ref[1:hh + 1, :], wtap(1))
            + _dot(pad_ref[2:hh + 2, :], wtap(2)))


def _group_norm(h2d, gamma, beta, mcg, mgc, n, eps):
    # GroupNorm on a lane-dense (rows, W*C) slab.  Spatial sums: sublane (XLU) reductions;
    # lane<->group folding: tiny one-hot matmuls in f32; two-pass variance; fused a*x+b.
    s1 = jnp.sum(h2d, axis=0, keepdims=True)               # (1, W*C)
    mean_l = _dot_f32(_dot_f32(s1, mcg) / n, mgc)           # group mean broadcast to lanes
    d = h2d - mean_l
    s2 = jnp.sum(d * d, axis=0, keepdims=True)
    inv_g = jax.lax.rsqrt(_dot_f32(s2, mcg) / n + eps)      # (1, G)
    inv_l = _dot_f32(inv_g, mgc)
    return d * (inv_l * gamma) + beta


# ---------------- the fused kernel (one batch element per grid step) ----------------

def _time_up_block_kernel(x_ref, skip_ref, t_ref,
                          bwE_ref, bwO0_ref, bwO1_ref, upb_ref,
                          bw1a_ref, bw1b_ref, b1_ref, g1_ref, be1_ref,
                          tw0_ref, tb0_ref,
                          bw2_ref, b2_ref, g2_ref, be2_ref,
                          ska_ref, skb_ref, skbias_ref,
                          mcg_ref, mgc_ref,
                          rb_bw1_ref, rb_b1_ref, rb_g1_ref, rb_be1_ref,
                          rb_tw_ref, rb_tb_ref,
                          rb_bw2_ref, rb_b2_ref, rb_g2_ref, rb_be2_ref,
                          o_ref,
                          xbuf_ref, upad_ref, spad_ref,
                          *, eps, n_extra):
    _, h, wci = x_ref.shape
    _, hh, wwci = skip_ref.shape
    wwc = o_ref.shape[2]
    g = mcg_ref.shape[-1]
    n = float(hh * wwc // g)                               # elements per group per sample

    # ---- halo-only zeroing (interiors are always fully overwritten below) ----
    zc = jnp.zeros((1, wwc), jnp.float32)
    zi = jnp.zeros((1, wwci), jnp.float32)
    upad_ref[0:1, :] = zc
    upad_ref[hh + 1:hh + 2, :] = zc
    spad_ref[0:1, :] = zi
    spad_ref[hh + 1:hh + 2, :] = zi
    xbuf_ref[h:h + 1, :] = jnp.zeros((1, wci), jnp.float32)

    # ---- ConvTranspose2d(k3,s2,p1,op1): even/odd output-row phases; the kw structure and the
    #      w-direction zero padding live in the banded weights (3 matmuls, no dilated tensor).
    xbuf_ref[0:h, :] = x_ref[0]
    x_cur = xbuf_ref[0:h, :]                               # input rows i
    x_dn = xbuf_ref[1:h + 1, :]                            # input rows i+1 (zero at bottom)
    ev = _dot(x_cur, bwE_ref[...])                         # even output rows   (h, wwc)
    od = _dot(x_cur, bwO0_ref[...]) + _dot(x_dn, bwO1_ref[...])   # odd output rows
    ev2 = jnp.broadcast_to(ev[:, None, :], (h, 2, wwc)).reshape(hh, wwc)
    od2 = jnp.broadcast_to(od[:, None, :], (h, 2, wwc)).reshape(hh, wwc)
    row_par = jax.lax.broadcasted_iota(jnp.int32, (hh, wwc), 0) & 1
    up = jnp.where(row_par == 0, ev2, od2) + upb_ref[...]

    skip2 = skip_ref[0]                                    # (hh, wwci) lane-dense skip
    tact = _silu(t_ref[0])                                 # (1, T)

    # ---- residual = Conv1x1(cat(up, skip)) as two block-diagonal matmuls (no concat) ----
    residual = _dot(up, ska_ref[...]) + _dot(skip2, skb_ref[...]) + skbias_ref[...]

    # ---- res block 0: conv1 (split over up / skip) -> GN -> SiLU -> +time -> conv2 -> GN ----
    tvec = _dot(tact, tw0_ref[...]) + tb0_ref[...]
    upad_ref[1:hh + 1, :] = up
    spad_ref[1:hh + 1, :] = skip2
    hcur = (_conv3x3_rows(upad_ref, lambda k: bw1a_ref[k], hh)
            + _conv3x3_rows(spad_ref, lambda k: bw1b_ref[k], hh)
            + b1_ref[...])
    hcur = _group_norm(hcur, g1_ref[...], be1_ref[...], mcg_ref[...], mgc_ref[...], n, eps)
    hcur = _silu(hcur) + tvec
    upad_ref[1:hh + 1, :] = hcur                           # halo rows are still zero
    hcur = _conv3x3_rows(upad_ref, lambda k: bw2_ref[k], hh) + b2_ref[...]
    hcur = _group_norm(hcur, g2_ref[...], be2_ref[...], mcg_ref[...], mgc_ref[...], n, eps)
    hcur = hcur + residual

    # ---- remaining res blocks (cin == cout, identity skip), fully fused in VMEM ----
    for l in range(n_extra):
        resid = hcur
        tvec = _dot(tact, rb_tw_ref[l]) + rb_tb_ref[l]
        upad_ref[1:hh + 1, :] = hcur
        hcur = _conv3x3_rows(upad_ref, lambda k, l=l: rb_bw1_ref[l, k], hh) + rb_b1_ref[l]
        hcur = _group_norm(hcur, rb_g1_ref[l], rb_be1_ref[l],
                           mcg_ref[...], mgc_ref[...], n, eps)
        hcur = _silu(hcur) + tvec
        upad_ref[1:hh + 1, :] = hcur
        hcur = _conv3x3_rows(upad_ref, lambda k, l=l: rb_bw2_ref[l, k], hh) + rb_b2_ref[l]
        hcur = _group_norm(hcur, rb_g2_ref[l], rb_be2_ref[l],
                           mcg_ref[...], mgc_ref[...], n, eps)
        hcur = hcur + resid

    o_ref[0] = hcur                                        # (hh, wwc): lane-dense unmasked store


# ---------------- host-side weight preparation (torch layouts -> lane-dense/banded) ---------

def conv_w_to_k(w):   # torch Conv2d weight (O, I, 3, 3) -> (9, I, O), cross-correlation taps
    return jnp.transpose(w, (2, 3, 1, 0)).reshape(9, w.shape[1], w.shape[0])


def convT_w_to_k(w):  # torch ConvTranspose2d (I, O, 3, 3) -> equivalent-conv taps (9, I, O)
    wf = jnp.flip(w, axis=(2, 3))
    return jnp.transpose(wf, (2, 3, 0, 1)).reshape(9, w.shape[0], w.shape[1])


def _banded_conv_weights(w9, W):
    # (9, Cin, Cout) per-tap conv weights -> (3, W*Cin, W*Cout) banded row-matmul weights.
    # Band structure encodes the kw taps and 'same' zero padding along w.
    w9 = np.asarray(w9)
    cin, cout = w9.shape[1], w9.shape[2]
    out = np.zeros((3, W * cin, W * cout), np.float32)
    for kh in range(3):
        for kw in range(3):
            tap = w9[kh * 3 + kw]
            for w in range(W):
                src = w + kw - 1
                if 0 <= src < W:
                    out[kh, src * cin:(src + 1) * cin, w * cout:(w + 1) * cout] += tap
    return jnp.asarray(out)


def _banded_convT_weights(w9, Win):
    # Equivalent-conv taps (9, Cin, Cout) of ConvT(k3,s2,p1,op1) -> (bwE, bwO0, bwO1), each
    # (Win*Cin, 2*Win*Cout).  Even output rows come from input row i (bwE); odd output rows
    # from input rows i (bwO0) and i+1 (bwO1).
    w9 = np.asarray(w9)
    cin, cout = w9.shape[1], w9.shape[2]
    bwE = np.zeros((Win * cin, 2 * Win * cout), np.float32)
    bwO0 = np.zeros_like(bwE)
    bwO1 = np.zeros_like(bwE)

    def tap(kh, kw):
        return w9[kh * 3 + kw]

    for j in range(Win):
        r0 = slice(j * cin, (j + 1) * cin)
        r1 = slice((j + 1) * cin, (j + 2) * cin)
        ce = slice((2 * j) * cout, (2 * j + 1) * cout)       # even output column 2j
        co = slice((2 * j + 1) * cout, (2 * j + 2) * cout)   # odd output column 2j+1
        bwE[r0, ce] += tap(1, 1)
        bwE[r0, co] += tap(1, 0)
        bwO0[r0, ce] += tap(0, 1)
        bwO0[r0, co] += tap(0, 0)
        bwO1[r0, ce] += tap(2, 1)
        bwO1[r0, co] += tap(2, 0)
        if j + 1 < Win:
            bwE[r1, co] += tap(1, 2)
            bwO0[r1, co] += tap(0, 2)
            bwO1[r1, co] += tap(2, 2)
    return jnp.asarray(bwE), jnp.asarray(bwO0), jnp.asarray(bwO1)


def _blockdiag(w, W):   # (Cin, Cout) 1x1-conv weight -> (W*Cin, W*Cout) block-diagonal
    return jnp.asarray(np.kron(np.eye(W, dtype=np.float32), np.asarray(w)))


def _group_maps_flat(C, G, W):
    cs = C // G
    lane_c = np.arange(W * C) % C
    mcg = (lane_c[:, None] // cs == np.arange(G)[None, :]).astype(np.float32)  # (W*C, G)
    return jnp.asarray(mcg), jnp.asarray(mcg.T)


def prepare_params(params, H, W):
    """Convert logical (per-tap / per-channel) params into the lane-dense banded kernel layout."""
    WW = 2 * W
    rbs = params['res_blocks']
    rb0 = rbs[0]
    cin = params['up_w'].shape[1]
    cout = params['up_w'].shape[-1]
    T = rb0['time_w'].shape[0]
    G = rb0['num_groups']
    WWC = WW * cout
    del cin  # (only cout matters below)

    def lane(v):     # (1, C) -> (1, WW*C)
        return jnp.asarray(np.tile(np.asarray(v), (1, WW)))

    def lane_w(w):   # (T, C) -> (T, WW*C)
        return jnp.asarray(np.tile(np.asarray(w), (1, WW)))

    mcg, mgc = _group_maps_flat(cout, G, WW)
    bwE, bwO0, bwO1 = _banded_convT_weights(params['up_w'], W)

    w1a = rb0['conv1_w'][:, :cout, :]      # channels [0:cout]  = upsampled tensor (concat order)
    w1b = rb0['conv1_w'][:, cout:, :]      # channels [cout: ]  = skip tensor
    kp = dict(
        up_bwE=bwE, up_bwO0=bwO0, up_bwO1=bwO1, up_b=lane(params['up_b']),
        bw1a=_banded_conv_weights(w1a, WW), bw1b=_banded_conv_weights(w1b, WW),
        b1=lane(rb0['conv1_b']), g1=lane(rb0['gn1_g']), be1=lane(rb0['gn1_b']),
        tw0=lane_w(rb0['time_w']), tb0=lane(rb0['time_b']),
        bw2=_banded_conv_weights(rb0['conv2_w'], WW),
        b2=lane(rb0['conv2_b']), g2=lane(rb0['gn2_g']), be2=lane(rb0['gn2_b']),
        ska=_blockdiag(rb0['skip_w'][:cout, :], WW),
        skb=_blockdiag(rb0['skip_w'][cout:, :], WW),
        skbias=lane(rb0['skip_b']),
        mcg=mcg, mgc=mgc,
    )
    extra = rbs[1:]
    n_extra = len(extra)
    if n_extra == 0:
        z = lambda *s: jnp.zeros(s, jnp.float32)
        kp.update(rb_bw1=z(1, 3, WWC, WWC), rb_b1=z(1, 1, WWC), rb_g1=z(1, 1, WWC),
                  rb_be1=z(1, 1, WWC), rb_tw=z(1, T, WWC), rb_tb=z(1, 1, WWC),
                  rb_bw2=z(1, 3, WWC, WWC), rb_b2=z(1, 1, WWC), rb_g2=z(1, 1, WWC),
                  rb_be2=z(1, 1, WWC))
    else:
        kp.update(
            rb_bw1=jnp.stack([_banded_conv_weights(p['conv1_w'], WW) for p in extra]),
            rb_b1=jnp.stack([lane(p['conv1_b']) for p in extra]),
            rb_g1=jnp.stack([lane(p['gn1_g']) for p in extra]),
            rb_be1=jnp.stack([lane(p['gn1_b']) for p in extra]),
            rb_tw=jnp.stack([lane_w(p['time_w']) for p in extra]),
            rb_tb=jnp.stack([lane(p['time_b']) for p in extra]),
            rb_bw2=jnp.stack([_banded_conv_weights(p['conv2_w'], WW) for p in extra]),
            rb_b2=jnp.stack([lane(p['conv2_b']) for p in extra]),
            rb_g2=jnp.stack([lane(p['gn2_g']) for p in extra]),
            rb_be2=jnp.stack([lane(p['gn2_b']) for p in extra]),
        )
    kp['n_extra'] = n_extra
    return kp


# ---------------- Pallas wrapper (one fused launch for the whole TimeUpBlock) ----------------

def time_up_block(x, t_emb, skip, params, kparams=None):
    B, H, W, Cin = x.shape
    Cout = params['up_w'].shape[-1]
    HH, WW = 2 * H, 2 * W
    T = t_emb.shape[-1]
    if kparams is None:
        kparams = prepare_params(params, H, W)
    kp = kparams
    G = kp['mcg'].shape[-1]
    n_extra = kp['n_extra']
    WWC, WWCi, WCi = WW * Cout, WW * Cin, W * Cin

    # lane-dense views (free: NHWC is contiguous)
    x_l = x.reshape(B, H, WCi)
    skip_l = skip.reshape(B, HH, WWCi)
    t3 = t_emb.reshape(B, 1, T)

    args = (x_l, skip_l, t3,
            kp['up_bwE'], kp['up_bwO0'], kp['up_bwO1'], kp['up_b'],
            kp['bw1a'], kp['bw1b'], kp['b1'], kp['g1'], kp['be1'],
            kp['tw0'], kp['tb0'],
            kp['bw2'], kp['b2'], kp['g2'], kp['be2'],
            kp['ska'], kp['skb'], kp['skbias'],
            kp['mcg'], kp['mgc'],
            kp['rb_bw1'], kp['rb_b1'], kp['rb_g1'], kp['rb_be1'],
            kp['rb_tw'], kp['rb_tb'],
            kp['rb_bw2'], kp['rb_b2'], kp['rb_g2'], kp['rb_be2'])

    def full(shape):
        nd = len(shape)
        return pl.BlockSpec(shape, lambda b, nd=nd: (0,) * nd)

    in_specs = ([pl.BlockSpec((1, H, WCi), lambda b: (b, 0, 0)),
                 pl.BlockSpec((1, HH, WWCi), lambda b: (b, 0, 0)),
                 pl.BlockSpec((1, 1, T), lambda b: (b, 0, 0))]
                + [full(tuple(a.shape)) for a in args[3:]])

    # advisory cost estimate for the XLA scheduler
    mm = lambda m, k, nn: 2 * m * k * nn
    per_sample = (3 * mm(H, WCi, WWC)
                  + 3 * (mm(HH, WWC, WWC) + mm(HH, WWCi, WWC))     # rb0 conv1 (split)
                  + mm(HH, WWC, WWC) + mm(HH, WWCi, WWC)           # 1x1 skip (split)
                  + 3 * mm(HH, WWC, WWC)                           # rb0 conv2
                  + n_extra * 6 * mm(HH, WWC, WWC)                 # extra res blocks
                  + (1 + n_extra) * mm(1, T, WWC))                 # time MLPs
    flops = B * per_sample
    transcendentals = B * ((1 + n_extra) * (HH * WWC + 2 * G) + T)
    bytes_accessed = (sum(int(a.size) * a.dtype.itemsize for a in args)
                      + B * HH * WWC * 4)

    out = pl.pallas_call(
        functools.partial(_time_up_block_kernel, eps=_EPS, n_extra=n_extra),
        out_shape=jax.ShapeDtypeStruct((B, HH, WWC), jnp.float32),
        grid=(B,),
        in_specs=in_specs,
        out_specs=pl.BlockSpec((1, HH, WWC), lambda b: (b, 0, 0)),
        scratch_shapes=[
            pltpu.VMEM((H + 1, WCi), jnp.float32),      # input rows + bottom zero row
            pltpu.VMEM((HH + 2, WWC), jnp.float32),     # row-padded Cout-wide conv buffer (reused)
            pltpu.VMEM((HH + 2, WWCi), jnp.float32),    # row-padded skip buffer
        ],
        compiler_params=pltpu.CompilerParams(
            dimension_semantics=("parallel",),
            vmem_limit_bytes=_VMEM_LIMIT),
        cost_estimate=pl.CostEstimate(flops=int(flops),
                                      transcendentals=int(transcendentals),
                                      bytes_accessed=int(bytes_accessed)),
    )(*args)
    return out.reshape(B, HH, WW, Cout)


# ---------------- deterministic parameter init (torch shapes -> logical kernel layouts) -------

def init_res_block(key, cin, cout, tdim):
    ks = jax.random.split(key, 12)
    G = min(32, cout // 4)
    p = dict(
        conv1_w=conv_w_to_k(0.2 * jax.random.normal(ks[0], (cout, cin, 3, 3), jnp.float32)),
        conv1_b=0.1 * jax.random.normal(ks[1], (1, cout), jnp.float32),
        gn1_g=1.0 + 0.1 * jax.random.normal(ks[2], (1, cout), jnp.float32),
        gn1_b=0.1 * jax.random.normal(ks[3], (1, cout), jnp.float32),
        conv2_w=conv_w_to_k(0.2 * jax.random.normal(ks[4], (cout, cout, 3, 3), jnp.float32)),
        conv2_b=0.1 * jax.random.normal(ks[5], (1, cout), jnp.float32),
        gn2_g=1.0 + 0.1 * jax.random.normal(ks[6], (1, cout), jnp.float32),
        gn2_b=0.1 * jax.random.normal(ks[7], (1, cout), jnp.float32),
        time_w=jnp.transpose(0.2 * jax.random.normal(ks[8], (cout, tdim), jnp.float32)),
        time_b=0.1 * jax.random.normal(ks[9], (1, cout), jnp.float32),
        num_groups=G,
    )
    if cin != cout:
        p['skip_w'] = jnp.transpose(
            (0.2 * jax.random.normal(ks[10], (cout, cin, 1, 1), jnp.float32))[:, :, 0, 0])
        p['skip_b'] = 0.1 * jax.random.normal(ks[11], (1, cout), jnp.float32)
    else:
        p['skip_w'] = None
        p['skip_b'] = None
    return p


def init_time_up_block(key, cin, cout, tdim, num_layers=2):
    ks = jax.random.split(key, num_layers + 2)
    return dict(
        up_w=convT_w_to_k(0.2 * jax.random.normal(ks[0], (cin, cout, 3, 3), jnp.float32)),
        up_b=0.1 * jax.random.normal(ks[1], (1, cout), jnp.float32),
        res_blocks=[init_res_block(ks[2], cin + cout, cout, tdim)]
        + [init_res_block(ks[2 + i], cout, cout, tdim) for i in range(1, num_layers)],
    )


# ---------------- pure-JAX reference (NHWC) for correctness check ----------------

def _ref_conv3x3(x, w9, bias, padding):
    k = w9.reshape(3, 3, w9.shape[1], w9.shape[2])
    y = jax.lax.conv_general_dilated(x, k, (1, 1), padding,
                                     dimension_numbers=('NHWC', 'HWIO', 'NHWC'))
    return y + bias.reshape(1, 1, 1, -1)


def _ref_upsample(x, w9, bias):
    k = w9.reshape(3, 3, w9.shape[1], w9.shape[2])
    y = jax.lax.conv_general_dilated(x, k, (1, 1), [(1, 2), (1, 2)],
                                     lhs_dilation=(2, 2),
                                     dimension_numbers=('NHWC', 'HWIO', 'NHWC'))
    return y + bias.reshape(1, 1, 1, -1)


def _ref_gn(x, gamma, beta, G, eps=1e-5):
    B, H, W, C = x.shape
    xg = x.reshape(B, H, W, G, C // G)
    mean = xg.mean(axis=(1, 2, 4), keepdims=True)
    var = ((xg - mean) ** 2).mean(axis=(1, 2, 4), keepdims=True)
    xn = ((xg - mean) / jnp.sqrt(var + eps)).reshape(B, H, W, C)
    return xn * gamma.reshape(1, 1, 1, C) + beta.reshape(1, 1, 1, C)


def _ref_res_block(x, t_emb, p):
    residual = x if p['skip_w'] is None else (
        jnp.einsum('bhwc,cd->bhwd', x, p['skip_w']) + p['skip_b'].reshape(1, 1, 1, -1))
    th = t_emb * jax.nn.sigmoid(t_emb)
    tvec = th @ p['time_w'] + p['time_b']
    h = _ref_conv3x3(x, p['conv1_w'], p['conv1_b'], [(1, 1), (1, 1)])
    h = _ref_gn(h, p['gn1_g'], p['gn1_b'], p['num_groups'])
    h = h * jax.nn.sigmoid(h)
    h = h + tvec[:, None, None, :]
    h = _ref_conv3x3(h, p['conv2_w'], p['conv2_b'], [(1, 1), (1, 1)])
    h = _ref_gn(h, p['gn2_g'], p['gn2_b'], p['num_groups'])
    return h + residual


def _ref_time_up_block(x, t_emb, skip, params):
    h = _ref_upsample(x, params['up_w'], params['up_b'])
    h = jnp.concatenate([h, skip], axis=-1)
    for p in params['res_blocks']:
        h = _ref_res_block(h, t_emb, p)
    return h


# ---------------- main ----------------

if __name__ == "__main__":
    key = jax.random.PRNGKey(0)
    k_x, k_s, k_t, k_p = jax.random.split(key, 4)

    B, Cin, Cout, T = 2, 4, 8, 32
    H = W = 8                                 # upsampled to 16 x 16 by ConvTranspose2d

    # NHWC inputs (torch NCHW equivalents: x (2,4,8,8), skip (2,4,16,16))
    x = jax.random.normal(k_x, (B, H, W, Cin), jnp.float32)
    skip = jax.random.normal(k_s, (B, 2 * H, 2 * W, Cin), jnp.float32)
    t_emb = jax.random.normal(k_t, (B, T), jnp.float32)

    params = init_time_up_block(k_p, Cin, Cout, T, num_layers=2)
    kparams = prepare_params(params, H, W)    # one-time host-side weight repack

    out = jax.block_until_ready(time_up_block(x, t_emb, skip, params, kparams))
    assert out.shape == (B, 2 * H, 2 * W, Cout), out.shape

    ref = _ref_time_up_block(x, t_emb, skip, params)
    assert jnp.allclose(out, ref, atol=2e-3, rtol=2e-3), \
        float(jnp.max(jnp.abs(out - ref)))

    print("KERNEL_OK")
</pallas_src>

<mosaic_0001>
module attributes {stable_mosaic.version = 11 : i64} {
  func.func @_time_up_block_kernel(%arg0: i32, %arg1: memref<1x8x32xf32, #tpu.memory_space<vmem>>, %arg2: memref<1x16x64xf32, #tpu.memory_space<vmem>>, %arg3: memref<1x1x32xf32, #tpu.memory_space<vmem>>, %arg4: memref<32x128xf32, #tpu.memory_space<vmem>>, %arg5: memref<32x128xf32, #tpu.memory_space<vmem>>, %arg6: memref<32x128xf32, #tpu.memory_space<vmem>>, %arg7: memref<1x128xf32, #tpu.memory_space<vmem>>, %arg8: memref<3x128x128xf32, #tpu.memory_space<vmem>>, %arg9: memref<3x64x128xf32, #tpu.memory_space<vmem>>, %arg10: memref<1x128xf32, #tpu.memory_space<vmem>>, %arg11: memref<1x128xf32, #tpu.memory_space<vmem>>, %arg12: memref<1x128xf32, #tpu.memory_space<vmem>>, %arg13: memref<32x128xf32, #tpu.memory_space<vmem>>, %arg14: memref<1x128xf32, #tpu.memory_space<vmem>>, %arg15: memref<3x128x128xf32, #tpu.memory_space<vmem>>, %arg16: memref<1x128xf32, #tpu.memory_space<vmem>>, %arg17: memref<1x128xf32, #tpu.memory_space<vmem>>, %arg18: memref<1x128xf32, #tpu.memory_space<vmem>>, %arg19: memref<128x128xf32, #tpu.memory_space<vmem>>, %arg20: memref<64x128xf32, #tpu.memory_space<vmem>>, %arg21: memref<1x128xf32, #tpu.memory_space<vmem>>, %arg22: memref<128x2xf32, #tpu.memory_space<vmem>>, %arg23: memref<2x128xf32, #tpu.memory_space<vmem>>, %arg24: memref<1x3x128x128xf32, #tpu.memory_space<vmem>>, %arg25: memref<1x1x128xf32, #tpu.memory_space<vmem>>, %arg26: memref<1x1x128xf32, #tpu.memory_space<vmem>>, %arg27: memref<1x1x128xf32, #tpu.memory_space<vmem>>, %arg28: memref<1x32x128xf32, #tpu.memory_space<vmem>>, %arg29: memref<1x1x128xf32, #tpu.memory_space<vmem>>, %arg30: memref<1x3x128x128xf32, #tpu.memory_space<vmem>>, %arg31: memref<1x1x128xf32, #tpu.memory_space<vmem>>, %arg32: memref<1x1x128xf32, #tpu.memory_space<vmem>>, %arg33: memref<1x1x128xf32, #tpu.memory_space<vmem>>, %arg34: memref<1x16x128xf32, #tpu.memory_space<vmem>>, %arg35: memref<9x32xf32, #tpu.memory_space<vmem>>, %arg36: memref<18x128xf32, #tpu.memory_space<vmem>>, %arg37: memref<18x64xf32, #tpu.memory_space<vmem>>) attributes {dimension_semantics = [#tpu.dimension_semantics<parallel>], iteration_bounds = array<i64: 2>, scalar_prefetch = 0 : i64, scratch_operands = 3 : i64, tpu.core_type = #tpu.core_type<tc>, window_params = [{transform_indices = @transform_0, window_bounds = array<i64: 1, 8, 32>}, {transform_indices = @transform_1, window_bounds = array<i64: 1, 16, 64>}, {transform_indices = @transform_2, window_bounds = array<i64: 1, 1, 32>}, {pipeline_mode = #tpu.pipeline_mode<synchronous>, transform_indices = @transform_3, window_bounds = array<i64: 32, 128>}, {pipeline_mode = #tpu.pipeline_mode<synchronous>, transform_indices = @transform_4, window_bounds = array<i64: 32, 128>}, {pipeline_mode = #tpu.pipeline_mode<synchronous>, transform_indices = @transform_5, window_bounds = array<i64: 32, 128>}, {pipeline_mode = #tpu.pipeline_mode<synchronous>, transform_indices = @transform_6, window_bounds = array<i64: 1, 128>}, {pipeline_mode = #tpu.pipeline_mode<synchronous>, transform_indices = @transform_7, window_bounds = array<i64: 3, 128, 128>}, {pipeline_mode = #tpu.pipeline_mode<synchronous>, transform_indices = @transform_8, window_bounds = array<i64: 3, 64, 128>}, {pipeline_mode = #tpu.pipeline_mode<synchronous>, transform_indices = @transform_9, window_bounds = array<i64: 1, 128>}, {pipeline_mode = #tpu.pipeline_mode<synchronous>, transform_indices = @transform_10, window_bounds = array<i64: 1, 128>}, {pipeline_mode = #tpu.pipeline_mode<synchronous>, transform_indices = @transform_11, window_bounds = array<i64: 1, 128>}, {pipeline_mode = #tpu.pipeline_mode<synchronous>, transform_indices = @transform_12, window_bounds = array<i64: 32, 128>}, {pipeline_mode = #tpu.pipeline_mode<synchronous>, transform_indices = @transform_13, window_bounds = array<i64: 1, 128>}, {pipeline_mode = #tpu.pipeline_mode<synchronous>, transform_indices = @transform_14, window_bounds = array<i64: 3, 128, 128>}, {pipeline_mode = #tpu.pipeline_mode<synchronous>, transform_indices = @transform_15, window_bounds = array<i64: 1, 128>}, {pipeline_mode = #tpu.pipeline_mode<synchronous>, transform_indices = @transform_16, window_bounds = array<i64: 1, 128>}, {pipeline_mode = #tpu.pipeline_mode<synchronous>, transform_indices = @transform_17, window_bounds = array<i64: 1, 128>}, {pipeline_mode = #tpu.pipeline_mode<synchronous>, transform_indices = @transform_18, window_bounds = array<i64: 128, 128>}, {pipeline_mode = #tpu.pipeline_mode<synchronous>, transform_indices = @transform_19, window_bounds = array<i64: 64, 128>}, {pipeline_mode = #tpu.pipeline_mode<synchronous>, transform_indices = @transform_20, window_bounds = array<i64: 1, 128>}, {pipeline_mode = #tpu.pipeline_mode<synchronous>, transform_indices = @transform_21, window_bounds = array<i64: 128, 2>}, {pipeline_mode = #tpu.pipeline_mode<synchronous>, transform_indices = @transform_22, window_bounds = array<i64: 2, 128>}, {pipeline_mode = #tpu.pipeline_mode<synchronous>, transform_indices = @transform_23, window_bounds = array<i64: 1, 3, 128, 128>}, {pipeline_mode = #tpu.pipeline_mode<synchronous>, transform_indices = @transform_24, window_bounds = array<i64: 1, 1, 128>}, {pipeline_mode = #tpu.pipeline_mode<synchronous>, transform_indices = @transform_25, window_bounds = array<i64: 1, 1, 128>}, {pipeline_mode = #tpu.pipeline_mode<synchronous>, transform_indices = @transform_26, window_bounds = array<i64: 1, 1, 128>}, {pipeline_mode = #tpu.pipeline_mode<synchronous>, transform_indices = @transform_27, window_bounds = array<i64: 1, 32, 128>}, {pipeline_mode = #tpu.pipeline_mode<synchronous>, transform_indices = @transform_28, window_bounds = array<i64: 1, 1, 128>}, {pipeline_mode = #tpu.pipeline_mode<synchronous>, transform_indices = @transform_29, window_bounds = array<i64: 1, 3, 128, 128>}, {pipeline_mode = #tpu.pipeline_mode<synchronous>, transform_indices = @transform_30, window_bounds = array<i64: 1, 1, 128>}, {pipeline_mode = #tpu.pipeline_mode<synchronous>, transform_indices = @transform_31, window_bounds = array<i64: 1, 1, 128>}, {pipeline_mode = #tpu.pipeline_mode<synchronous>, transform_indices = @transform_32, window_bounds = array<i64: 1, 1, 128>}, {transform_indices = @transform_33, window_bounds = array<i64: 1, 16, 128>}]} {
    %cst = arith.constant 0.000000e+00 : f32
    %0 = vector.broadcast %cst : f32 to vector<1x128xf32>
    %cst_0 = arith.constant 0.000000e+00 : f32
    %1 = vector.broadcast %cst_0 : f32 to vector<1x64xf32>
    %c0 = arith.constant 0 : index
    %c0_1 = arith.constant 0 : index
    %2 = vector.load %arg36[%c0, %c0_1] : memref<18x128xf32, #tpu.memory_space<vmem>>, vector<1x128xf32>
    tpu.vector_store %arg36[%c0, %c0_1], %0 {strides = array<i32>} : memref<18x128xf32, #tpu.memory_space<vmem>>, vector<1x128xf32>,
    %c17 = arith.constant 17 : index
    %c0_2 = arith.constant 0 : index
    %3 = vector.load %arg36[%c17, %c0_2] : memref<18x128xf32, #tpu.memory_space<vmem>>, vector<1x128xf32>
    tpu.vector_store %arg36[%c17, %c0_2], %0 {strides = array<i32>} : memref<18x128xf32, #tpu.memory_space<vmem>>, vector<1x128xf32>,
    %c0_3 = arith.constant 0 : index
    %c0_4 = arith.constant 0 : index
    %4 = vector.load %arg37[%c0_3, %c0_4] : memref<18x64xf32, #tpu.memory_space<vmem>>, vector<1x64xf32>
    tpu.vector_store %arg37[%c0_3, %c0_4], %1 {strides = array<i32>} : memref<18x64xf32, #tpu.memory_space<vmem>>, vector<1x64xf32>,
    %c17_5 = arith.constant 17 : index
    %c0_6 = arith.constant 0 : index
    %5 = vector.load %arg37[%c17_5, %c0_6] : memref<18x64xf32, #tpu.memory_space<vmem>>, vector<1x64xf32>
    tpu.vector_store %arg37[%c17_5, %c0_6], %1 {strides = array<i32>} : memref<18x64xf32, #tpu.memory_space<vmem>>, vector<1x64xf32>,
    %cst_7 = arith.constant 0.000000e+00 : f32
    %6 = vector.broadcast %cst_7 : f32 to vector<1x32xf32>
    %c8 = arith.constant 8 : index
    %c0_8 = arith.constant 0 : index
    %7 = vector.load %arg35[%c8, %c0_8] : memref<9x32xf32, #tpu.memory_space<vmem>>, vector<1x32xf32>
    tpu.vector_store %arg35[%c8, %c0_8], %6 {strides = array<i32>} : memref<9x32xf32, #tpu.memory_space<vmem>>, vector<1x32xf32>,
    %c0_9 = arith.constant 0 : index
    %c0_10 = arith.constant 0 : index
    %c0_11 = arith.constant 0 : index
    %8 = vector.load %arg1[%c0_9, %c0_10, %c0_11] : memref<1x8x32xf32, #tpu.memory_space<vmem>>, vector<1x8x32xf32>
    %9 = vector.shape_cast %8 : vector<1x8x32xf32> to vector<8x32xf32>
    %c0_12 = arith.constant 0 : index
    %c0_13 = arith.constant 0 : index
    %10 = vector.load %arg35[%c0_12, %c0_13] : memref<9x32xf32, #tpu.memory_space<vmem>>, vector<8x32xf32>
    tpu.vector_store %arg35[%c0_12, %c0_13], %9 {strides = array<i32>} : memref<9x32xf32, #tpu.memory_space<vmem>>, vector<8x32xf32>,
    %c0_14 = arith.constant 0 : index
    %c0_15 = arith.constant 0 : index
    %11 = vector.load %arg35[%c0_14, %c0_15] : memref<9x32xf32, #tpu.memory_space<vmem>>, vector<8x32xf32>
    %c1 = arith.constant 1 : index
    %c0_16 = arith.constant 0 : index
    %12 = vector.load %arg35[%c1, %c0_16] : memref<9x32xf32, #tpu.memory_space<vmem>>, vector<8x32xf32>
    %c0_17 = arith.constant 0 : index
    %c0_18 = arith.constant 0 : index
    %13 = vector.load %arg4[%c0_17, %c0_18] : memref<32x128xf32, #tpu.memory_space<vmem>>, vector<32x128xf32>
    %cst_19 = arith.constant dense<0.000000e+00> : vector<8x128xf32>
    %14 = tpu.matmul %11, %13, %cst_19 {dimension_numbers = #tpu.dot_dimension_numbers<[1], [0], [0], [1], [0, 0, 1, 1], [], []>} : vector<8x32xf32>, vector<32x128xf32>, vector<8x128xf32> -> vector<8x128xf32>
    %c0_20 = arith.constant 0 : index
    %c0_21 = arith.constant 0 : index
    %15 = vector.load %arg5[%c0_20, %c0_21] : memref<32x128xf32, #tpu.memory_space<vmem>>, vector<32x128xf32>
    %cst_22 = arith.constant dense<0.000000e+00> : vector<8x128xf32>
    %16 = tpu.matmul %11, %15, %cst_22 {dimension_numbers = #tpu.dot_dimension_numbers<[1], [0], [0], [1], [0, 0, 1, 1], [], []>} : vector<8x32xf32>, vector<32x128xf32>, vector<8x128xf32> -> vector<8x128xf32>
    %c0_23 = arith.constant 0 : index
    %c0_24 = arith.constant 0 : index
    %17 = vector.load %arg6[%c0_23, %c0_24] : memref<32x128xf32, #tpu.memory_space<vmem>>, vector<32x128xf32>
    %cst_25 = arith.constant dense<0.000000e+00> : vector<8x128xf32>
    %18 = tpu.matmul %12, %17, %cst_25 {dimension_numbers = #tpu.dot_dimension_numbers<[1], [0], [0], [1], [0, 0, 1, 1], [], []>} : vector<8x32xf32>, vector<32x128xf32>, vector<8x128xf32> -> vector<8x128xf32>
    %19 = arith.addf %16, %18 : vector<8x128xf32>
    %20 = vector.shape_cast %14 : vector<8x128xf32> to vector<8x1x128xf32>
    %21 = vector.shape_cast %20 : vector<8x1x128xf32> to vector<8x1x128xf32>
    %22 = vector.broadcast %21 : vector<8x1x128xf32> to vector<8x2x128xf32>
    %23 = vector.shape_cast %22 : vector<8x2x128xf32> to vector<16x128xf32>
    %24 = vector.shape_cast %19 : vector<8x128xf32> to vector<8x1x128xf32>
    %25 = vector.shape_cast %24 : vector<8x1x128xf32> to vector<8x1x128xf32>
    %26 = vector.broadcast %25 : vector<8x1x128xf32> to vector<8x2x128xf32>
    %27 = vector.shape_cast %26 : vector<8x2x128xf32> to vector<16x128xf32>
    %28 = tpu.iota {dimensions = array<i32: 0>} : vector<16x128xi32>
    %c1_i32 = arith.constant 1 : i32
    %29 = vector.broadcast %c1_i32 : i32 to vector<16x128xi32>
    %30 = arith.andi %28, %29 : vector<16x128xi32>
    %c0_i32 = arith.constant 0 : i32
    %31 = vector.broadcast %c0_i32 : i32 to vector<16x128xi32>
    %32 = arith.cmpi eq, %30, %31 : vector<16x128xi32>
    %33 = arith.select %32, %23, %27 : vector<16x128xi1>, vector<16x128xf32>
    %c0_26 = arith.constant 0 : index
    %c0_27 = arith.constant 0 : index
    %34 = vector.load %arg7[%c0_26, %c0_27] : memref<1x128xf32, #tpu.memory_space<vmem>>, vector<1x128xf32>
    %35 = vector.broadcast %34 : vector<1x128xf32> to vector<16x128xf32>
    %36 = arith.addf %33, %35 : vector<16x128xf32>
    %c0_28 = arith.constant 0 : index
    %c0_29 = arith.constant 0 : index
    %c0_30 = arith.constant 0 : index
    %37 = vector.load %arg2[%c0_28, %c0_29, %c0_30] : memref<1x16x64xf32, #tpu.memory_space<vmem>>, vector<1x16x64xf32>
    %38 = vector.shape_cast %37 : vector<1x16x64xf32> to vector<16x64xf32>
    %c0_31 = arith.constant 0 : index
    %c0_32 = arith.constant 0 : index
    %c0_33 = arith.constant 0 : index
    %39 = vector.load %arg3[%c0_31, %c0_32, %c0_33] : memref<1x1x32xf32, #tpu.memory_space<vmem>>, vector<1x1x32xf32>
    %40 = vector.shape_cast %39 : vector<1x1x32xf32> to vector<1x32xf32>
    %41 = arith.negf %40 : vector<1x32xf32>
    %42 = math.exp %41 : vector<1x32xf32>
    %cst_34 = arith.constant 1.000000e+00 : f32
    %43 = vector.broadcast %cst_34 : f32 to vector<1x32xf32>
    %44 = arith.addf %43, %42 : vector<1x32xf32>
    %45 = arith.divf %43, %44 : vector<1x32xf32>
    %46 = arith.mulf %40, %45 : vector<1x32xf32>
    %c0_35 = arith.constant 0 : index
    %c0_36 = arith.constant 0 : index
    %47 = vector.load %arg19[%c0_35, %c0_36] : memref<128x128xf32, #tpu.memory_space<vmem>>, vector<128x128xf32>
    %cst_37 = arith.constant dense<0.000000e+00> : vector<16x128xf32>
    %48 = tpu.matmul %36, %47, %cst_37 {dimension_numbers = #tpu.dot_dimension_numbers<[1], [0], [0], [1], [0, 0, 1, 1], [], []>} : vector<16x128xf32>, vector<128x128xf32>, vector<16x128xf32> -> vector<16x128xf32>
    %c0_38 = arith.constant 0 : index
    %c0_39 = arith.constant 0 : index
    %49 = vector.load %arg20[%c0_38, %c0_39] : memref<64x128xf32, #tpu.memory_space<vmem>>, vector<64x128xf32>
    %cst_40 = arith.constant dense<0.000000e+00> : vector<16x128xf32>
    %50 = tpu.matmul %38, %49, %cst_40 {dimension_numbers = #tpu.dot_dimension_numbers<[1], [0], [0], [1], [0, 0, 1, 1], [], []>} : vector<16x64xf32>, vector<64x128xf32>, vector<16x128xf32> -> vector<16x128xf32>
    %51 = arith.addf %48, %50 : vector<16x128xf32>
    %c0_41 = arith.constant 0 : index
    %c0_42 = arith.constant 0 : index
    %52 = vector.load %arg21[%c0_41, %c0_42] : memref<1x128xf32, #tpu.memory_space<vmem>>, vector<1x128xf32>
    %53 = vector.broadcast %52 : vector<1x128xf32> to vector<16x128xf32>
    %54 = arith.addf %51, %53 : vector<16x128xf32>
    %c0_43 = arith.constant 0 : index
    %c0_44 = arith.constant 0 : index
    %55 = vector.load %arg13[%c0_43, %c0_44] : memref<32x128xf32, #tpu.memory_space<vmem>>, vector<32x128xf32>
    %cst_45 = arith.constant dense<0.000000e+00> : vector<1x128xf32>
    %56 = tpu.matmul %46, %55, %cst_45 {dimension_numbers = #tpu.dot_dimension_numbers<[1], [0], [0], [1], [0, 0, 1, 1], [], []>} : vector<1x32xf32>, vector<32x128xf32>, vector<1x128xf32> -> vector<1x128xf32>
    %c0_46 = arith.constant 0 : index
    %c0_47 = arith.constant 0 : index
    %57 = vector.load %arg14[%c0_46, %c0_47] : memref<1x128xf32, #tpu.memory_space<vmem>>, vector<1x128xf32>
    %58 = arith.addf %56, %57 : vector<1x128xf32>
    %c1_48 = arith.constant 1 : index
    %c0_49 = arith.constant 0 : index
    %59 = vector.load %arg36[%c1_48, %c0_49] : memref<18x128xf32, #tpu.memory_space<vmem>>, vector<16x128xf32>
    tpu.vector_store %arg36[%c1_48, %c0_49], %36 {strides = array<i32>} : memref<18x128xf32, #tpu.memory_space<vmem>>, vector<16x128xf32>,
    %c1_50 = arith.constant 1 : index
    %c0_51 = arith.constant 0 : index
    %60 = vector.load %arg37[%c1_50, %c0_51] : memref<18x64xf32, #tpu.memory_space<vmem>>, vector<16x64xf32>
    tpu.vector_store %arg37[%c1_50, %c0_51], %38 {strides = array<i32>} : memref<18x64xf32, #tpu.memory_space<vmem>>, vector<16x64xf32>,
    %c0_52 = arith.constant 0 : index
    %c0_53 = arith.constant 0 : index
    %61 = vector.load %arg36[%c0_52, %c0_53] : memref<18x128xf32, #tpu.memory_space<vmem>>, vector<16x128xf32>
    %c0_54 = arith.constant 0 : index
    %c0_55 = arith.constant 0 : index
    %c0_56 = arith.constant 0 : index
    %62 = vector.load %arg8[%c0_54, %c0_55, %c0_56] : memref<3x128x128xf32, #tpu.memory_space<vmem>>, vector<1x128x128xf32>
    %63 = vector.shape_cast %62 : vector<1x128x128xf32> to vector<128x128xf32>
    %cst_57 = arith.constant dense<0.000000e+00> : vector<16x128xf32>
    %64 = tpu.matmul %61, %63, %cst_57 {dimension_numbers = #tpu.dot_dimension_numbers<[1], [0], [0], [1], [0, 0, 1, 1], [], []>} : vector<16x128xf32>, vector<128x128xf32>, vector<16x128xf32> -> vector<16x128xf32>
    %c1_58 = arith.constant 1 : index
    %c0_59 = arith.constant 0 : index
    %65 = vector.load %arg36[%c1_58, %c0_59] : memref<18x128xf32, #tpu.memory_space<vmem>>, vector<16x128xf32>
    %c1_60 = arith.constant 1 : index
    %c0_61 = arith.constant 0 : index
    %c0_62 = arith.constant 0 : index
    %66 = vector.load %arg8[%c1_60, %c0_61, %c0_62] : memref<3x128x128xf32, #tpu.memory_space<vmem>>, vector<1x128x128xf32>
    %67 = vector.shape_cast %66 : vector<1x128x128xf32> to vector<128x128xf32>
    %cst_63 = arith.constant dense<0.000000e+00> : vector<16x128xf32>
    %68 = tpu.matmul %65, %67, %cst_63 {dimension_numbers = #tpu.dot_dimension_numbers<[1], [0], [0], [1], [0, 0, 1, 1], [], []>} : vector<16x128xf32>, vector<128x128xf32>, vector<16x128xf32> -> vector<16x128xf32>
    %69 = arith.addf %64, %68 : vector<16x128xf32>
    %c2 = arith.constant 2 : index
    %c0_64 = arith.constant 0 : index
    %70 = vector.load %arg36[%c2, %c0_64] : memref<18x128xf32, #tpu.memory_space<vmem>>, vector<16x128xf32>
    %c2_65 = arith.constant 2 : index
    %c0_66 = arith.constant 0 : index
    %c0_67 = arith.constant 0 : index
    %71 = vector.load %arg8[%c2_65, %c0_66, %c0_67] : memref<3x128x128xf32, #tpu.memory_space<vmem>>, vector<1x128x128xf32>
    %72 = vector.shape_cast %71 : vector<1x128x128xf32> to vector<128x128xf32>
    %cst_68 = arith.constant dense<0.000000e+00> : vector<16x128xf32>
    %73 = tpu.matmul %70, %72, %cst_68 {dimension_numbers = #tpu.dot_dimension_numbers<[1], [0], [0], [1], [0, 0, 1, 1], [], []>} : vector<16x128xf32>, vector<128x128xf32>, vector<16x128xf32> -> vector<16x128xf32>
    %74 = arith.addf %69, %73 : vector<16x128xf32>
    %c0_69 = arith.constant 0 : index
    %c0_70 = arith.constant 0 : index
    %75 = vector.load %arg37[%c0_69, %c0_70] : memref<18x64xf32, #tpu.memory_space<vmem>>, vector<16x64xf32>
    %c0_71 = arith.constant 0 : index
    %c0_72 = arith.constant 0 : index
    %c0_73 = arith.constant 0 : index
    %76 = vector.load %arg9[%c0_71, %c0_72, %c0_73] : memref<3x64x128xf32, #tpu.memory_space<vmem>>, vector<1x64x128xf32>
    %77 = vector.shape_cast %76 : vector<1x64x128xf32> to vector<64x128xf32>
    %cst_74 = arith.constant dense<0.000000e+00> : vector<16x128xf32>
    %78 = tpu.matmul %75, %77, %cst_74 {dimension_numbers = #tpu.dot_dimension_numbers<[1], [0], [0], [1], [0, 0, 1, 1], [], []>} : vector<16x64xf32>, vector<64x128xf32>, vector<16x128xf32> -> vector<16x128xf32>
    %c1_75 = arith.constant 1 : index
    %c0_76 = arith.constant 0 : index
    %79 = vector.load %arg37[%c1_75, %c0_76] : memref<18x64xf32, #tpu.memory_space<vmem>>, vector<16x64xf32>
    %c1_77 = arith.constant 1 : index
    %c0_78 = arith.constant 0 : index
    %c0_79 = arith.constant 0 : index
    %80 = vector.load %arg9[%c1_77, %c0_78, %c0_79] : memref<3x64x128xf32, #tpu.memory_space<vmem>>, vector<1x64x128xf32>
    %81 = vector.shape_cast %80 : vector<1x64x128xf32> to vector<64x128xf32>
    %cst_80 = arith.constant dense<0.000000e+00> : vector<16x128xf32>
    %82 = tpu.matmul %79, %81, %cst_80 {dimension_numbers = #tpu.dot_dimension_numbers<[1], [0], [0], [1], [0, 0, 1, 1], [], []>} : vector<16x64xf32>, vector<64x128xf32>, vector<16x128xf32> -> vector<16x128xf32>
    %83 = arith.addf %78, %82 : vector<16x128xf32>
    %c2_81 = arith.constant 2 : index
    %c0_82 = arith.constant 0 : index
    %84 = vector.load %arg37[%c2_81, %c0_82] : memref<18x64xf32, #tpu.memory_space<vmem>>, vector<16x64xf32>
    %c2_83 = arith.constant 2 : index
    %c0_84 = arith.constant 0 : index
    %c0_85 = arith.constant 0 : index
    %85 = vector.load %arg9[%c2_83, %c0_84, %c0_85] : memref<3x64x128xf32, #tpu.memory_space<vmem>>, vector<1x64x128xf32>
    %86 = vector.shape_cast %85 : vector<1x64x128xf32> to vector<64x128xf32>
    %cst_86 = arith.constant dense<0.000000e+00> : vector<16x128xf32>
    %87 = tpu.matmul %84, %86, %cst_86 {dimension_numbers = #tpu.dot_dimension_numbers<[1], [0], [0], [1], [0, 0, 1, 1], [], []>} : vector<16x64xf32>, vector<64x128xf32>, vector<16x128xf32> -> vector<16x128xf32>
    %88 = arith.addf %83, %87 : vector<16x128xf32>
    %89 = arith.addf %74, %88 : vector<16x128xf32>
    %c0_87 = arith.constant 0 : index
    %c0_88 = arith.constant 0 : index
    %90 = vector.load %arg10[%c0_87, %c0_88] : memref<1x128xf32, #tpu.memory_space<vmem>>, vector<1x128xf32>
    %91 = vector.broadcast %90 : vector<1x128xf32> to vector<16x128xf32>
    %92 = arith.addf %89, %91 : vector<16x128xf32>
    %c0_89 = arith.constant 0 : index
    %c0_90 = arith.constant 0 : index
    %93 = vector.load %arg11[%c0_89, %c0_90] : memref<1x128xf32, #tpu.memory_space<vmem>>, vector<1x128xf32>
    %c0_91 = arith.constant 0 : index
    %c0_92 = arith.constant 0 : index
    %94 = vector.load %arg12[%c0_91, %c0_92] : memref<1x128xf32, #tpu.memory_space<vmem>>, vector<1x128xf32>
    %c0_93 = arith.constant 0 : index
    %c0_94 = arith.constant 0 : index
    %95 = vector.load %arg22[%c0_93, %c0_94] : memref<128x2xf32, #tpu.memory_space<vmem>>, vector<128x2xf32>
    %c0_95 = arith.constant 0 : index
    %c0_96 = arith.constant 0 : index
    %96 = vector.load %arg23[%c0_95, %c0_96] : memref<2x128xf32, #tpu.memory_space<vmem>>, vector<2x128xf32>
    %cst_97 = arith.constant dense<0.000000e+00> : vector<128xf32>
    %97 = vector.multi_reduction <add>, %92, %cst_97 [0] : vector<16x128xf32> to vector<128xf32>
    %98 = vector.shape_cast %97 : vector<128xf32> to vector<1x128xf32>
    %cst_98 = arith.constant dense<0.000000e+00> : vector<1x2xf32>
    %99 = tpu.matmul %98, %95, %cst_98 {dimension_numbers = #tpu.dot_dimension_numbers<[1], [0], [0], [1], [0, 0, 1, 1], [], []>} : vector<1x128xf32>, vector<128x2xf32>, vector<1x2xf32> -> vector<1x2xf32>
    %cst_99 = arith.constant 1.024000e+03 : f32
    %100 = vector.broadcast %cst_99 : f32 to vector<1x2xf32>
    %101 = arith.divf %99, %100 : vector<1x2xf32>
    %cst_100 = arith.constant dense<0.000000e+00> : vector<1x128xf32>
    %102 = tpu.matmul %101, %96, %cst_100 {dimension_numbers = #tpu.dot_dimension_numbers<[1], [0], [0], [1], [0, 0, 1, 1], [], []>} : vector<1x2xf32>, vector<2x128xf32>, vector<1x128xf32> -> vector<1x128xf32>
    %103 = vector.broadcast %102 : vector<1x128xf32> to vector<16x128xf32>
    %104 = arith.subf %92, %103 : vector<16x128xf32>
    %105 = arith.mulf %104, %104 : vector<16x128xf32>
    %cst_101 = arith.constant dense<0.000000e+00> : vector<128xf32>
    %106 = vector.multi_reduction <add>, %105, %cst_101 [0] : vector<16x128xf32> to vector<128xf32>
    %107 = vector.shape_cast %106 : vector<128xf32> to vector<1x128xf32>
    %cst_102 = arith.constant dense<0.000000e+00> : vector<1x2xf32>
    %108 = tpu.matmul %107, %95, %cst_102 {dimension_numbers = #tpu.dot_dimension_numbers<[1], [0], [0], [1], [0, 0, 1, 1], [], []>} : vector<1x128xf32>, vector<128x2xf32>, vector<1x2xf32> -> vector<1x2xf32>
    %cst_103 = arith.constant 1.024000e+03 : f32
    %109 = vector.broadcast %cst_103 : f32 to vector<1x2xf32>
    %110 = arith.divf %108, %109 : vector<1x2xf32>
    %cst_104 = arith.constant 9.99999974E-6 : f32
    %111 = vector.broadcast %cst_104 : f32 to vector<1x2xf32>
    %112 = arith.addf %110, %111 : vector<1x2xf32>
    %113 = math.rsqrt %112 : vector<1x2xf32>
    %cst_105 = arith.constant dense<0.000000e+00> : vector<1x128xf32>
    %114 = tpu.matmul %113, %96, %cst_105 {dimension_numbers = #tpu.dot_dimension_numbers<[1], [0], [0], [1], [0, 0, 1, 1], [], []>} : vector<1x2xf32>, vector<2x128xf32>, vector<1x128xf32> -> vector<1x128xf32>
    %115 = arith.mulf %114, %93 : vector<1x128xf32>
    %116 = vector.broadcast %115 : vector<1x128xf32> to vector<16x128xf32>
    %117 = arith.mulf %104, %116 : vector<16x128xf32>
    %118 = vector.broadcast %94 : vector<1x128xf32> to vector<16x128xf32>
    %119 = arith.addf %117, %118 : vector<16x128xf32>
    %120 = arith.negf %119 : vector<16x128xf32>
    %121 = math.exp %120 : vector<16x128xf32>
    %cst_106 = arith.constant 1.000000e+00 : f32
    %122 = vector.broadcast %cst_106 : f32 to vector<16x128xf32>
    %123 = arith.addf %122, %121 : vector<16x128xf32>
    %124 = arith.divf %122, %123 : vector<16x128xf32>
    %125 = arith.mulf %119, %124 : vector<16x128xf32>
    %126 = vector.broadcast %58 : vector<1x128xf32> to vector<16x128xf32>
    %127 = arith.addf %125, %126 : vector<16x128xf32>
    %c1_107 = arith.constant 1 : index
    %c0_108 = arith.constant 0 : index
    %128 = vector.load %arg36[%c1_107, %c0_108] : memref<18x128xf32, #tpu.memory_space<vmem>>, vector<16x128xf32>
    tpu.vector_store %arg36[%c1_107, %c0_108], %127 {strides = array<i32>} : memref<18x128xf32, #tpu.memory_space<vmem>>, vector<16x128xf32>,
    %c0_109 = arith.constant 0 : index
    %c0_110 = arith.constant 0 : index
    %129 = vector.load %arg36[%c0_109, %c0_110] : memref<18x128xf32, #tpu.memory_space<vmem>>, vector<16x128xf32>
    %c0_111 = arith.constant 0 : index
    %c0_112 = arith.constant 0 : index
    %c0_113 = arith.constant 0 : index
    %130 = vector.load %arg15[%c0_111, %c0_112, %c0_113] : memref<3x128x128xf32, #tpu.memory_space<vmem>>, vector<1x128x128xf32>
    %131 = vector.shape_cast %130 : vector<1x128x128xf32> to vector<128x128xf32>
    %cst_114 = arith.constant dense<0.000000e+00> : vector<16x128xf32>
    %132 = tpu.matmul %129, %131, %cst_114 {dimension_numbers = #tpu.dot_dimension_numbers<[1], [0], [0], [1], [0, 0, 1, 1], [], []>} : vector<16x128xf32>, vector<128x128xf32>, vector<16x128xf32> -> vector<16x128xf32>
    %c1_115 = arith.constant 1 : index
    %c0_116 = arith.constant 0 : index
    %133 = vector.load %arg36[%c1_115, %c0_116] : memref<18x128xf32, #tpu.memory_space<vmem>>, vector<16x128xf32>
    %c1_117 = arith.constant 1 : index
    %c0_118 = arith.constant 0 : index
    %c0_119 = arith.constant 0 : index
    %134 = vector.load %arg15[%c1_117, %c0_118, %c0_119] : memref<3x128x128xf32, #tpu.memory_space<vmem>>, vector<1x128x128xf32>
    %135 = vector.shape_cast %134 : vector<1x128x128xf32> to vector<128x128xf32>
    %cst_120 = arith.constant dense<0.000000e+00> : vector<16x128xf32>
    %136 = tpu.matmul %133, %135, %cst_120 {dimension_numbers = #tpu.dot_dimension_numbers<[1], [0], [0], [1], [0, 0, 1, 1], [], []>} : vector<16x128xf32>, vector<128x128xf32>, vector<16x128xf32> -> vector<16x128xf32>
    %137 = arith.addf %132, %136 : vector<16x128xf32>
    %c2_121 = arith.constant 2 : index
    %c0_122 = arith.constant 0 : index
    %138 = vector.load %arg36[%c2_121, %c0_122] : memref<18x128xf32, #tpu.memory_space<vmem>>, vector<16x128xf32>
    %c2_123 = arith.constant 2 : index
    %c0_124 = arith.constant 0 : index
    %c0_125 = arith.constant 0 : index
    %139 = vector.load %arg15[%c2_123, %c0_124, %c0_125] : memref<3x128x128xf32, #tpu.memory_space<vmem>>, vector<1x128x128xf32>
    %140 = vector.shape_cast %139 : vector<1x128x128xf32> to vector<128x128xf32>
    %cst_126 = arith.constant dense<0.000000e+00> : vector<16x128xf32>
    %141 = tpu.matmul %138, %140, %cst_126 {dimension_numbers = #tpu.dot_dimension_numbers<[1], [0], [0], [1], [0, 0, 1, 1], [], []>} : vector<16x128xf32>, vector<128x128xf32>, vector<16x128xf32> -> vector<16x128xf32>
    %142 = arith.addf %137, %141 : vector<16x128xf32>
    %c0_127 = arith.constant 0 : index
    %c0_128 = arith.constant 0 : index
    %143 = vector.load %arg16[%c0_127, %c0_128] : memref<1x128xf32, #tpu.memory_space<vmem>>, vector<1x128xf32>
    %144 = vector.broadcast %143 : vector<1x128xf32> to vector<16x128xf32>
    %145 = arith.addf %142, %144 : vector<16x128xf32>
    %c0_129 = arith.constant 0 : index
    %c0_130 = arith.constant 0 : index
    %146 = vector.load %arg17[%c0_129, %c0_130] : memref<1x128xf32, #tpu.memory_space<vmem>>, vector<1x128xf32>
    %c0_131 = arith.constant 0 : index
    %c0_132 = arith.constant 0 : index
    %147 = vector.load %arg18[%c0_131, %c0_132] : memref<1x128xf32, #tpu.memory_space<vmem>>, vector<1x128xf32>
    %c0_133 = arith.constant 0 : index
    %c0_134 = arith.constant 0 : index
    %148 = vector.load %arg22[%c0_133, %c0_134] : memref<128x2xf32, #tpu.memory_space<vmem>>, vector<128x2xf32>
    %c0_135 = arith.constant 0 : index
    %c0_136 = arith.constant 0 : index
    %149 = vector.load %arg23[%c0_135, %c0_136] : memref<2x128xf32, #tpu.memory_space<vmem>>, vector<2x128xf32>
    %cst_137 = arith.constant dense<0.000000e+00> : vector<128xf32>
    %150 = vector.multi_reduction <add>, %145, %cst_137 [0] : vector<16x128xf32> to vector<128xf32>
    %151 = vector.shape_cast %150 : vector<128xf32> to vector<1x128xf32>
    %cst_138 = arith.constant dense<0.000000e+00> : vector<1x2xf32>
    %152 = tpu.matmul %151, %148, %cst_138 {dimension_numbers = #tpu.dot_dimension_numbers<[1], [0], [0], [1], [0, 0, 1, 1], [], []>} : vector<1x128xf32>, vector<128x2xf32>, vector<1x2xf32> -> vector<1x2xf32>
    %cst_139 = arith.constant 1.024000e+03 : f32
    %153 = vector.broadcast %cst_139 : f32 to vector<1x2xf32>
    %154 = arith.divf %152, %153 : vector<1x2xf32>
    %cst_140 = arith.constant dense<0.000000e+00> : vector<1x128xf32>
    %155 = tpu.matmul %154, %149, %cst_140 {dimension_numbers = #tpu.dot_dimension_numbers<[1], [0], [0], [1], [0, 0, 1, 1], [], []>} : vector<1x2xf32>, vector<2x128xf32>, vector<1x128xf32> -> vector<1x128xf32>
    %156 = vector.broadcast %155 : vector<1x128xf32> to vector<16x128xf32>
    %157 = arith.subf %145, %156 : vector<16x128xf32>
    %158 = arith.mulf %157, %157 : vector<16x128xf32>
    %cst_141 = arith.constant dense<0.000000e+00> : vector<128xf32>
    %159 = vector.multi_reduction <add>, %158, %cst_141 [0] : vector<16x128xf32> to vector<128xf32>
    %160 = vector.shape_cast %159 : vector<128xf32> to vector<1x128xf32>
    %cst_142 = arith.constant dense<0.000000e+00> : vector<1x2xf32>
    %161 = tpu.matmul %160, %148, %cst_142 {dimension_numbers = #tpu.dot_dimension_numbers<[1], [0], [0], [1], [0, 0, 1, 1], [], []>} : vector<1x128xf32>, vector<128x2xf32>, vector<1x2xf32> -> vector<1x2xf32>
    %cst_143 = arith.constant 1.024000e+03 : f32
    %162 = vector.broadcast %cst_143 : f32 to vector<1x2xf32>
    %163 = arith.divf %161, %162 : vector<1x2xf32>
    %cst_144 = arith.constant 9.99999974E-6 : f32
    %164 = vector.broadcast %cst_144 : f32 to vector<1x2xf32>
    %165 = arith.addf %163, %164 : vector<1x2xf32>
    %166 = math.rsqrt %165 : vector<1x2xf32>
    %cst_145 = arith.constant dense<0.000000e+00> : vector<1x128xf32>
    %167 = tpu.matmul %166, %149, %cst_145 {dimension_numbers = #tpu.dot_dimension_numbers<[1], [0], [0], [1], [0, 0, 1, 1], [], []>} : vector<1x2xf32>, vector<2x128xf32>, vector<1x128xf32> -> vector<1x128xf32>
    %168 = arith.mulf %167, %146 : vector<1x128xf32>
    %169 = vector.broadcast %168 : vector<1x128xf32> to vector<16x128xf32>
    %170 = arith.mulf %157, %169 : vector<16x128xf32>
    %171 = vector.broadcast %147 : vector<1x128xf32> to vector<16x128xf32>
    %172 = arith.addf %170, %171 : vector<16x128xf32>
    %173 = arith.addf %172, %54 : vector<16x128xf32>
    %c0_146 = arith.constant 0 : index
    %c0_147 = arith.constant 0 : index
    %c0_148 = arith.constant 0 : index
    %174 = vector.load %arg28[%c0_146, %c0_147, %c0_148] : memref<1x32x128xf32, #tpu.memory_space<vmem>>, vector<1x32x128xf32>
    %175 = vector.shape_cast %174 : vector<1x32x128xf32> to vector<32x128xf32>
    %cst_149 = arith.constant dense<0.000000e+00> : vector<1x128xf32>
    %176 = tpu.matmul %46, %175, %cst_149 {dimension_numbers = #tpu.dot_dimension_numbers<[1], [0], [0], [1], [0, 0, 1, 1], [], []>} : vector<1x32xf32>, vector<32x128xf32>, vector<1x128xf32> -> vector<1x128xf32>
    %c0_150 = arith.constant 0 : index
    %c0_151 = arith.constant 0 : index
    %c0_152 = arith.constant 0 : index
    %177 = vector.load %arg29[%c0_150, %c0_151, %c0_152] : memref<1x1x128xf32, #tpu.memory_space<vmem>>, vector<1x1x128xf32>
    %178 = vector.shape_cast %177 : vector<1x1x128xf32> to vector<1x128xf32>
    %179 = arith.addf %176, %178 : vector<1x128xf32>
    %c1_153 = arith.constant 1 : index
    %c0_154 = arith.constant 0 : index
    %180 = vector.load %arg36[%c1_153, %c0_154] : memref<18x128xf32, #tpu.memory_space<vmem>>, vector<16x128xf32>
    tpu.vector_store %arg36[%c1_153, %c0_154], %173 {strides = array<i32>} : memref<18x128xf32, #tpu.memory_space<vmem>>, vector<16x128xf32>,
    %c0_155 = arith.constant 0 : index
    %c0_156 = arith.constant 0 : index
    %181 = vector.load %arg36[%c0_155, %c0_156] : memref<18x128xf32, #tpu.memory_space<vmem>>, vector<16x128xf32>
    %c0_157 = arith.constant 0 : index
    %c0_158 = arith.constant 0 : index
    %c0_159 = arith.constant 0 : index
    %c0_160 = arith.constant 0 : index
    %182 = vector.load %arg24[%c0_157, %c0_158, %c0_159, %c0_160] : memref<1x3x128x128xf32, #tpu.memory_space<vmem>>, vector<1x1x128x128xf32>
    %183 = vector.shape_cast %182 : vector<1x1x128x128xf32> to vector<128x128xf32>
    %cst_161 = arith.constant dense<0.000000e+00> : vector<16x128xf32>
    %184 = tpu.matmul %181, %183, %cst_161 {dimension_numbers = #tpu.dot_dimension_numbers<[1], [0], [0], [1], [0, 0, 1, 1], [], []>} : vector<16x128xf32>, vector<128x128xf32>, vector<16x128xf32> -> vector<16x128xf32>
    %c1_162 = arith.constant 1 : index
    %c0_163 = arith.constant 0 : index
    %185 = vector.load %arg36[%c1_162, %c0_163] : memref<18x128xf32, #tpu.memory_space<vmem>>, vector<16x128xf32>
    %c0_164 = arith.constant 0 : index
    %c1_165 = arith.constant 1 : index
    %c0_166 = arith.constant 0 : index
    %c0_167 = arith.constant 0 : index
    %186 = vector.load %arg24[%c0_164, %c1_165, %c0_166, %c0_167] : memref<1x3x128x128xf32, #tpu.memory_space<vmem>>, vector<1x1x128x128xf32>
    %187 = vector.shape_cast %186 : vector<1x1x128x128xf32> to vector<128x128xf32>
    %cst_168 = arith.constant dense<0.000000e+00> : vector<16x128xf32>
    %188 = tpu.matmul %185, %187, %cst_168 {dimension_numbers = #tpu.dot_dimension_numbers<[1], [0], [0], [1], [0, 0, 1, 1], [], []>} : vector<16x128xf32>, vector<128x128xf32>, vector<16x128xf32> -> vector<16x128xf32>
    %189 = arith.addf %184, %188 : vector<16x128xf32>
    %c2_169 = arith.constant 2 : index
    %c0_170 = arith.constant 0 : index
    %190 = vector.load %arg36[%c2_169, %c0_170] : memref<18x128xf32, #tpu.memory_space<vmem>>, vector<16x128xf32>
    %c0_171 = arith.constant 0 : index
    %c2_172 = arith.constant 2 : index
    %c0_173 = arith.constant 0 : index
    %c0_174 = arith.constant 0 : index
    %191 = vector.load %arg24[%c0_171, %c2_172, %c0_173, %c0_174] : memref<1x3x128x128xf32, #tpu.memory_space<vmem>>, vector<1x1x128x128xf32>
    %192 = vector.shape_cast %191 : vector<1x1x128x128xf32> to vector<128x128xf32>
    %cst_175 = arith.constant dense<0.000000e+00> : vector<16x128xf32>
    %193 = tpu.matmul %190, %192, %cst_175 {dimension_numbers = #tpu.dot_dimension_numbers<[1], [0], [0], [1], [0, 0, 1, 1], [], []>} : vector<16x128xf32>, vector<128x128xf32>, vector<16x128xf32> -> vector<16x128xf32>
    %194 = arith.addf %189, %193 : vector<16x128xf32>
    %c0_176 = arith.constant 0 : index
    %c0_177 = arith.constant 0 : index
    %c0_178 = arith.constant 0 : index
    %195 = vector.load %arg25[%c0_176, %c0_177, %c0_178] : memref<1x1x128xf32, #tpu.memory_space<vmem>>, vector<1x1x128xf32>
    %196 = vector.shape_cast %195 : vector<1x1x128xf32> to vector<1x128xf32>
    %197 = vector.broadcast %196 : vector<1x128xf32> to vector<16x128xf32>
    %198 = arith.addf %194, %197 : vector<16x128xf32>
    %c0_179 = arith.constant 0 : index
    %c0_180 = arith.constant 0 : index
    %c0_181 = arith.constant 0 : index
    %199 = vector.load %arg26[%c0_179, %c0_180, %c0_181] : memref<1x1x128xf32, #tpu.memory_space<vmem>>, vector<1x1x128xf32>
    %200 = vector.shape_cast %199 : vector<1x1x128xf32> to vector<1x128xf32>
    %c0_182 = arith.constant 0 : index
    %c0_183 = arith.constant 0 : index
    %c0_184 = arith.constant 0 : index
    %201 = vector.load %arg27[%c0_182, %c0_183, %c0_184] : memref<1x1x128xf32, #tpu.memory_space<vmem>>, vector<1x1x128xf32>
    %202 = vector.shape_cast %201 : vector<1x1x128xf32> to vector<1x128xf32>
    %c0_185 = arith.constant 0 : index
    %c0_186 = arith.constant 0 : index
    %203 = vector.load %arg22[%c0_185, %c0_186] : memref<128x2xf32, #tpu.memory_space<vmem>>, vector<128x2xf32>
    %c0_187 = arith.constant 0 : index
    %c0_188 = arith.constant 0 : index
    %204 = vector.load %arg23[%c0_187, %c0_188] : memref<2x128xf32, #tpu.memory_space<vmem>>, vector<2x128xf32>
    %cst_189 = arith.constant dense<0.000000e+00> : vector<128xf32>
    %205 = vector.multi_reduction <add>, %198, %cst_189 [0] : vector<16x128xf32> to vector<128xf32>
    %206 = vector.shape_cast %205 : vector<128xf32> to vector<1x128xf32>
    %cst_190 = arith.constant dense<0.000000e+00> : vector<1x2xf32>
    %207 = tpu.matmul %206, %203, %cst_190 {dimension_numbers = #tpu.dot_dimension_numbers<[1], [0], [0], [1], [0, 0, 1, 1], [], []>} : vector<1x128xf32>, vector<128x2xf32>, vector<1x2xf32> -> vector<1x2xf32>
    %cst_191 = arith.constant 1.024000e+03 : f32
    %208 = vector.broadcast %cst_191 : f32 to vector<1x2xf32>
    %209 = arith.divf %207, %208 : vector<1x2xf32>
    %cst_192 = arith.constant dense<0.000000e+00> : vector<1x128xf32>
    %210 = tpu.matmul %209, %204, %cst_192 {dimension_numbers = #tpu.dot_dimension_numbers<[1], [0], [0], [1], [0, 0, 1, 1], [], []>} : vector<1x2xf32>, vector<2x128xf32>, vector<1x128xf32> -> vector<1x128xf32>
    %211 = vector.broadcast %210 : vector<1x128xf32> to vector<16x128xf32>
    %212 = arith.subf %198, %211 : vector<16x128xf32>
    %213 = arith.mulf %212, %212 : vector<16x128xf32>
    %cst_193 = arith.constant dense<0.000000e+00> : vector<128xf32>
    %214 = vector.multi_reduction <add>, %213, %cst_193 [0] : vector<16x128xf32> to vector<128xf32>
    %215 = vector.shape_cast %214 : vector<128xf32> to vector<1x128xf32>
    %cst_194 = arith.constant dense<0.000000e+00> : vector<1x2xf32>
    %216 = tpu.matmul %215, %203, %cst_194 {dimension_numbers = #tpu.dot_dimension_numbers<[1], [0], [0], [1], [0, 0, 1, 1], [], []>} : vector<1x128xf32>, vector<128x2xf32>, vector<1x2xf32> -> vector<1x2xf32>
    %cst_195 = arith.constant 1.024000e+03 : f32
    %217 = vector.broadcast %cst_195 : f32 to vector<1x2xf32>
    %218 = arith.divf %216, %217 : vector<1x2xf32>
    %cst_196 = arith.constant 9.99999974E-6 : f32
    %219 = vector.broadcast %cst_196 : f32 to vector<1x2xf32>
    %220 = arith.addf %218, %219 : vector<1x2xf32>
    %221 = math.rsqrt %220 : vector<1x2xf32>
    %cst_197 = arith.constant dense<0.000000e+00> : vector<1x128xf32>
    %222 = tpu.matmul %221, %204, %cst_197 {dimension_numbers = #tpu.dot_dimension_numbers<[1], [0], [0], [1], [0, 0, 1, 1], [], []>} : vector<1x2xf32>, vector<2x128xf32>, vector<1x128xf32> -> vector<1x128xf32>
    %223 = arith.mulf %222, %200 : vector<1x128xf32>
    %224 = vector.broadcast %223 : vector<1x128xf32> to vector<16x128xf32>
    %225 = arith.mulf %212, %224 : vector<16x128xf32>
    %226 = vector.broadcast %202 : vector<1x128xf32> to vector<16x128xf32>
    %227 = arith.addf %225, %226 : vector<16x128xf32>
    %228 = arith.negf %227 : vector<16x128xf32>
    %229 = math.exp %228 : vector<16x128xf32>
    %cst_198 = arith.constant 1.000000e+00 : f32
    %230 = vector.broadcast %cst_198 : f32 to vector<16x128xf32>
    %231 = arith.addf %230, %229 : vector<16x128xf32>
    %232 = arith.divf %230, %231 : vector<16x128xf32>
    %233 = arith.mulf %227, %232 : vector<16x128xf32>
    %234 = vector.broadcast %179 : vector<1x128xf32> to vector<16x128xf32>
    %235 = arith.addf %233, %234 : vector<16x128xf32>
    %c1_199 = arith.constant 1 : index
    %c0_200 = arith.constant 0 : index
    %236 = vector.load %arg36[%c1_199, %c0_200] : memref<18x128xf32, #tpu.memory_space<vmem>>, vector<16x128xf32>
    tpu.vector_store %arg36[%c1_199, %c0_200], %235 {strides = array<i32>} : memref<18x128xf32, #tpu.memory_space<vmem>>, vector<16x128xf32>,
    %c0_201 = arith.constant 0 : index
    %c0_202 = arith.constant 0 : index
    %237 = vector.load %arg36[%c0_201, %c0_202] : memref<18x128xf32, #tpu.memory_space<vmem>>, vector<16x128xf32>
    %c0_203 = arith.constant 0 : index
    %c0_204 = arith.constant 0 : index
    %c0_205 = arith.constant 0 : index
    %c0_206 = arith.constant 0 : index
    %238 = vector.load %arg30[%c0_203, %c0_204, %c0_205, %c0_206] : memref<1x3x128x128xf32, #tpu.memory_space<vmem>>, vector<1x1x128x128xf32>
    %239 = vector.shape_cast %238 : vector<1x1x128x128xf32> to vector<128x128xf32>
    %cst_207 = arith.constant dense<0.000000e+00> : vector<16x128xf32>
    %240 = tpu.matmul %237, %239, %cst_207 {dimension_numbers = #tpu.dot_dimension_numbers<[1], [0], [0], [1], [0, 0, 1, 1], [], []>} : vector<16x128xf32>, vector<128x128xf32>, vector<16x128xf32> -> vector<16x128xf32>
    %c1_208 = arith.constant 1 : index
    %c0_209 = arith.constant 0 : index
    %241 = vector.load %arg36[%c1_208, %c0_209] : memref<18x128xf32, #tpu.memory_space<vmem>>, vector<16x128xf32>
    %c0_210 = arith.constant 0 : index
    %c1_211 = arith.constant 1 : index
    %c0_212 = arith.constant 0 : index
    %c0_213 = arith.constant 0 : index
    %242 = vector.load %arg30[%c0_210, %c1_211, %c0_212, %c0_213] : memref<1x3x128x128xf32, #tpu.memory_space<vmem>>, vector<1x1x128x128xf32>
    %243 = vector.shape_cast %242 : vector<1x1x128x128xf32> to vector<128x128xf32>
    %cst_214 = arith.constant dense<0.000000e+00> : vector<16x128xf32>
    %244 = tpu.matmul %241, %243, %cst_214 {dimension_numbers = #tpu.dot_dimension_numbers<[1], [0], [0], [1], [0, 0, 1, 1], [], []>} : vector<16x128xf32>, vector<128x128xf32>, vector<16x128xf32> -> vector<16x128xf32>
    %245 = arith.addf %240, %244 : vector<16x128xf32>
    %c2_215 = arith.constant 2 : index
    %c0_216 = arith.constant 0 : index
    %246 = vector.load %arg36[%c2_215, %c0_216] : memref<18x128xf32, #tpu.memory_space<vmem>>, vector<16x128xf32>
    %c0_217 = arith.constant 0 : index
    %c2_218 = arith.constant 2 : index
    %c0_219 = arith.constant 0 : index
    %c0_220 = arith.constant 0 : index
    %247 = vector.load %arg30[%c0_217, %c2_218, %c0_219, %c0_220] : memref<1x3x128x128xf32, #tpu.memory_space<vmem>>, vector<1x1x128x128xf32>
    %248 = vector.shape_cast %247 : vector<1x1x128x128xf32> to vector<128x128xf32>
    %cst_221 = arith.constant dense<0.000000e+00> : vector<16x128xf32>
    %249 = tpu.matmul %246, %248, %cst_221 {dimension_numbers = #tpu.dot_dimension_numbers<[1], [0], [0], [1], [0, 0, 1, 1], [], []>} : vector<16x128xf32>, vector<128x128xf32>, vector<16x128xf32> -> vector<16x128xf32>
    %250 = arith.addf %245, %249 : vector<16x128xf32>
    %c0_222 = arith.constant 0 : index
    %c0_223 = arith.constant 0 : index
    %c0_224 = arith.constant 0 : index
    %251 = vector.load %arg31[%c0_222, %c0_223, %c0_224] : memref<1x1x128xf32, #tpu.memory_space<vmem>>, vector<1x1x128xf32>
    %252 = vector.shape_cast %251 : vector<1x1x128xf32> to vector<1x128xf32>
    %253 = vector.broadcast %252 : vector<1x128xf32> to vector<16x128xf32>
    %254 = arith.addf %250, %253 : vector<16x128xf32>
    %c0_225 = arith.constant 0 : index
    %c0_226 = arith.constant 0 : index
    %c0_227 = arith.constant 0 : index
    %255 = vector.load %arg32[%c0_225, %c0_226, %c0_227] : memref<1x1x128xf32, #tpu.memory_space<vmem>>, vector<1x1x128xf32>
    %256 = vector.shape_cast %255 : vector<1x1x128xf32> to vector<1x128xf32>
    %c0_228 = arith.constant 0 : index
    %c0_229 = arith.constant 0 : index
    %c0_230 = arith.constant 0 : index
    %257 = vector.load %arg33[%c0_228, %c0_229, %c0_230] : memref<1x1x128xf32, #tpu.memory_space<vmem>>, vector<1x1x128xf32>
    %258 = vector.shape_cast %257 : vector<1x1x128xf32> to vector<1x128xf32>
    %c0_231 = arith.constant 0 : index
    %c0_232 = arith.constant 0 : index
    %259 = vector.load %arg22[%c0_231, %c0_232] : memref<128x2xf32, #tpu.memory_space<vmem>>, vector<128x2xf32>
    %c0_233 = arith.constant 0 : index
    %c0_234 = arith.constant 0 : index
    %260 = vector.load %arg23[%c0_233, %c0_234] : memref<2x128xf32, #tpu.memory_space<vmem>>, vector<2x128xf32>
    %cst_235 = arith.constant dense<0.000000e+00> : vector<128xf32>
    %261 = vector.multi_reduction <add>, %254, %cst_235 [0] : vector<16x128xf32> to vector<128xf32>
    %262 = vector.shape_cast %261 : vector<128xf32> to vector<1x128xf32>
    %cst_236 = arith.constant dense<0.000000e+00> : vector<1x2xf32>
    %263 = tpu.matmul %262, %259, %cst_236 {dimension_numbers = #tpu.dot_dimension_numbers<[1], [0], [0], [1], [0, 0, 1, 1], [], []>} : vector<1x128xf32>, vector<128x2xf32>, vector<1x2xf32> -> vector<1x2xf32>
    %cst_237 = arith.constant 1.024000e+03 : f32
    %264 = vector.broadcast %cst_237 : f32 to vector<1x2xf32>
    %265 = arith.divf %263, %264 : vector<1x2xf32>
    %cst_238 = arith.constant dense<0.000000e+00> : vector<1x128xf32>
    %266 = tpu.matmul %265, %260, %cst_238 {dimension_numbers = #tpu.dot_dimension_numbers<[1], [0], [0], [1], [0, 0, 1, 1], [], []>} : vector<1x2xf32>, vector<2x128xf32>, vector<1x128xf32> -> vector<1x128xf32>
    %267 = vector.broadcast %266 : vector<1x128xf32> to vector<16x128xf32>
    %268 = arith.subf %254, %267 : vector<16x128xf32>
    %269 = arith.mulf %268, %268 : vector<16x128xf32>
    %cst_239 = arith.constant dense<0.000000e+00> : vector<128xf32>
    %270 = vector.multi_reduction <add>, %269, %cst_239 [0] : vector<16x128xf32> to vector<128xf32>
    %271 = vector.shape_cast %270 : vector<128xf32> to vector<1x128xf32>
    %cst_240 = arith.constant dense<0.000000e+00> : vector<1x2xf32>
    %272 = tpu.matmul %271, %259, %cst_240 {dimension_numbers = #tpu.dot_dimension_numbers<[1], [0], [0], [1], [0, 0, 1, 1], [], []>} : vector<1x128xf32>, vector<128x2xf32>, vector<1x2xf32> -> vector<1x2xf32>
    %cst_241 = arith.constant 1.024000e+03 : f32
    %273 = vector.broadcast %cst_241 : f32 to vector<1x2xf32>
    %274 = arith.divf %272, %273 : vector<1x2xf32>
    %cst_242 = arith.constant 9.99999974E-6 : f32
    %275 = vector.broadcast %cst_242 : f32 to vector<1x2xf32>
    %276 = arith.addf %274, %275 : vector<1x2xf32>
    %277 = math.rsqrt %276 : vector<1x2xf32>
    %cst_243 = arith.constant dense<0.000000e+00> : vector<1x128xf32>
    %278 = tpu.matmul %277, %260, %cst_243 {dimension_numbers = #tpu.dot_dimension_numbers<[1], [0], [0], [1], [0, 0, 1, 1], [], []>} : vector<1x2xf32>, vector<2x128xf32>, vector<1x128xf32> -> vector<1x128xf32>
    %279 = arith.mulf %278, %256 : vector<1x128xf32>
    %280 = vector.broadcast %279 : vector<1x128xf32> to vector<16x128xf32>
    %281 = arith.mulf %268, %280 : vector<16x128xf32>
    %282 = vector.broadcast %258 : vector<1x128xf32> to vector<16x128xf32>
    %283 = arith.addf %281, %282 : vector<16x128xf32>
    %284 = arith.addf %283, %173 : vector<16x128xf32>
    %c0_244 = arith.constant 0 : index
    %c0_245 = arith.constant 0 : index
    %c0_246 = arith.constant 0 : index
    %285 = vector.load %arg34[%c0_244, %c0_245, %c0_246] : memref<1x16x128xf32, #tpu.memory_space<vmem>>, vector<1x16x128xf32>
    %286 = vector.shape_cast %285 : vector<1x16x128xf32> to vector<16x128xf32>
    %287 = vector.shape_cast %284 : vector<16x128xf32> to vector<1x16x128xf32>
    tpu.vector_store %arg34[%c0_244, %c0_245, %c0_246], %287 {strides = array<i32>} : memref<1x16x128xf32, #tpu.memory_space<vmem>>, vector<1x16x128xf32>,
    return
  }
  func.func @transform_0(%arg0: i32) -> (i32, i32, i32) {
    %c0_i32 = arith.constant 0 : i32
    %c0_i32_0 = arith.constant 0 : i32
    %c0_i32_1 = arith.constant 0 : i32
    return %arg0, %c0_i32, %c0_i32_0 : i32, i32, i32
  }
  func.func @transform_1(%arg0: i32) -> (i32, i32, i32) {
    %c0_i32 = arith.constant 0 : i32
    %c0_i32_0 = arith.constant 0 : i32
    %c0_i32_1 = arith.constant 0 : i32
    return %arg0, %c0_i32, %c0_i32_0 : i32, i32, i32
  }
  func.func @transform_2(%arg0: i32) -> (i32, i32, i32) {
    %c0_i32 = arith.constant 0 : i32
    %c0_i32_0 = arith.constant 0 : i32
    %c0_i32_1 = arith.constant 0 : i32
    return %arg0, %c0_i32, %c0_i32_0 : i32, i32, i32
  }
  func.func @transform_3(%arg0: i32) -> (i32, i32) {
    %c0_i32 = arith.constant 0 : i32
    %c0_i32_0 = arith.constant 0 : i32
    %c0_i32_1 = arith.constant 0 : i32
    return %c0_i32, %c0_i32_0 : i32, i32
  }
  func.func @transform_4(%arg0: i32) -> (i32, i32) {
    %c0_i32 = arith.constant 0 : i32
    %c0_i32_0 = arith.constant 0 : i32
    %c0_i32_1 = arith.constant 0 : i32
    return %c0_i32, %c0_i32_0 : i32, i32
  }
  func.func @transform_5(%arg0: i32) -> (i32, i32) {
    %c0_i32 = arith.constant 0 : i32
    %c0_i32_0 = arith.constant 0 : i32
    %c0_i32_1 = arith.constant 0 : i32
    return %c0_i32, %c0_i32_0 : i32, i32
  }
  func.func @transform_6(%arg0: i32) -> (i32, i32) {
    %c0_i32 = arith.constant 0 : i32
    %c0_i32_0 = arith.constant 0 : i32
    %c0_i32_1 = arith.constant 0 : i32
    return %c0_i32, %c0_i32_0 : i32, i32
  }
  func.func @transform_7(%arg0: i32) -> (i32, i32, i32) {
    %c0_i32 = arith.constant 0 : i32
    %c0_i32_0 = arith.constant 0 : i32
    %c0_i32_1 = arith.constant 0 : i32
    %c0_i32_2 = arith.constant 0 : i32
    return %c0_i32, %c0_i32_0, %c0_i32_1 : i32, i32, i32
  }
  func.func @transform_8(%arg0: i32) -> (i32, i32, i32) {
    %c0_i32 = arith.constant 0 : i32
    %c0_i32_0 = arith.constant 0 : i32
    %c0_i32_1 = arith.constant 0 : i32
    %c0_i32_2 = arith.constant 0 : i32
    return %c0_i32, %c0_i32_0, %c0_i32_1 : i32, i32, i32
  }
  func.func @transform_9(%arg0: i32) -> (i32, i32) {
    %c0_i32 = arith.constant 0 : i32
    %c0_i32_0 = arith.constant 0 : i32
    %c0_i32_1 = arith.constant 0 : i32
    return %c0_i32, %c0_i32_0 : i32, i32
  }
  func.func @transform_10(%arg0: i32) -> (i32, i32) {
    %c0_i32 = arith.constant 0 : i32
    %c0_i32_0 = arith.constant 0 : i32
    %c0_i32_1 = arith.constant 0 : i32
    return %c0_i32, %c0_i32_0 : i32, i32
  }
  func.func @transform_11(%arg0: i32) -> (i32, i32) {
    %c0_i32 = arith.constant 0 : i32
    %c0_i32_0 = arith.constant 0 : i32
    %c0_i32_1 = arith.constant 0 : i32
    return %c0_i32, %c0_i32_0 : i32, i32
  }
  func.func @transform_12(%arg0: i32) -> (i32, i32) {
    %c0_i32 = arith.constant 0 : i32
    %c0_i32_0 = arith.constant 0 : i32
    %c0_i32_1 = arith.constant 0 : i32
    return %c0_i32, %c0_i32_0 : i32, i32
  }
  func.func @transform_13(%arg0: i32) -> (i32, i32) {
    %c0_i32 = arith.constant 0 : i32
    %c0_i32_0 = arith.constant 0 : i32
    %c0_i32_1 = arith.constant 0 : i32
    return %c0_i32, %c0_i32_0 : i32, i32
  }
  func.func @transform_14(%arg0: i32) -> (i32, i32, i32) {
    %c0_i32 = arith.constant 0 : i32
    %c0_i32_0 = arith.constant 0 : i32
    %c0_i32_1 = arith.constant 0 : i32
    %c0_i32_2 = arith.constant 0 : i32
    return %c0_i32, %c0_i32_0, %c0_i32_1 : i32, i32, i32
  }
  func.func @transform_15(%arg0: i32) -> (i32, i32) {
    %c0_i32 = arith.constant 0 : i32
    %c0_i32_0 = arith.constant 0 : i32
    %c0_i32_1 = arith.constant 0 : i32
    return %c0_i32, %c0_i32_0 : i32, i32
  }
  func.func @transform_16(%arg0: i32) -> (i32, i32) {
    %c0_i32 = arith.constant 0 : i32
    %c0_i32_0 = arith.constant 0 : i32
    %c0_i32_1 = arith.constant 0 : i32
    return %c0_i32, %c0_i32_0 : i32, i32
  }
  func.func @transform_17(%arg0: i32) -> (i32, i32) {
    %c0_i32 = arith.constant 0 : i32
    %c0_i32_0 = arith.constant 0 : i32
    %c0_i32_1 = arith.constant 0 : i32
    return %c0_i32, %c0_i32_0 : i32, i32
  }
  func.func @transform_18(%arg0: i32) -> (i32, i32) {
    %c0_i32 = arith.constant 0 : i32
    %c0_i32_0 = arith.constant 0 : i32
    %c0_i32_1 = arith.constant 0 : i32
    return %c0_i32, %c0_i32_0 : i32, i32
  }
  func.func @transform_19(%arg0: i32) -> (i32, i32) {
    %c0_i32 = arith.constant 0 : i32
    %c0_i32_0 = arith.constant 0 : i32
    %c0_i32_1 = arith.constant 0 : i32
    return %c0_i32, %c0_i32_0 : i32, i32
  }
  func.func @transform_20(%arg0: i32) -> (i32, i32) {
    %c0_i32 = arith.constant 0 : i32
    %c0_i32_0 = arith.constant 0 : i32
    %c0_i32_1 = arith.constant 0 : i32
    return %c0_i32, %c0_i32_0 : i32, i32
  }
  func.func @transform_21(%arg0: i32) -> (i32, i32) {
    %c0_i32 = arith.constant 0 : i32
    %c0_i32_0 = arith.constant 0 : i32
    %c0_i32_1 = arith.constant 0 : i32
    return %c0_i32, %c0_i32_0 : i32, i32
  }
  func.func @transform_22(%arg0: i32) -> (i32, i32) {
    %c0_i32 = arith.constant 0 : i32
    %c0_i32_0 = arith.constant 0 : i32
    %c0_i32_1 = arith.constant 0 : i32
    return %c0_i32, %c0_i32_0 : i32, i32
  }
  func.func @transform_23(%arg0: i32) -> (i32, i32, i32, i32) {
    %c0_i32 = arith.constant 0 : i32
    %c0_i32_0 = arith.constant 0 : i32
    %c0_i32_1 = arith.constant 0 : i32
    %c0_i32_2 = arith.constant 0 : i32
    %c0_i32_3 = arith.constant 0 : i32
    return %c0_i32, %c0_i32_0, %c0_i32_1, %c0_i32_2 : i32, i32, i32, i32
  }
  func.func @transform_24(%arg0: i32) -> (i32, i32, i32) {
    %c0_i32 = arith.constant 0 : i32
    %c0_i32_0 = arith.constant 0 : i32
    %c0_i32_1 = arith.constant 0 : i32
    %c0_i32_2 = arith.constant 0 : i32
    return %c0_i32, %c0_i32_0, %c0_i32_1 : i32, i32, i32
  }
  func.func @transform_25(%arg0: i32) -> (i32, i32, i32) {
    %c0_i32 = arith.constant 0 : i32
    %c0_i32_0 = arith.constant 0 : i32
    %c0_i32_1 = arith.constant 0 : i32
    %c0_i32_2 = arith.constant 0 : i32
    return %c0_i32, %c0_i32_0, %c0_i32_1 : i32, i32, i32
  }
  func.func @transform_26(%arg0: i32) -> (i32, i32, i32) {
    %c0_i32 = arith.constant 0 : i32
    %c0_i32_0 = arith.constant 0 : i32
    %c0_i32_1 = arith.constant 0 : i32
    %c0_i32_2 = arith.constant 0 : i32
    return %c0_i32, %c0_i32_0, %c0_i32_1 : i32, i32, i32
  }
  func.func @transform_27(%arg0: i32) -> (i32, i32, i32) {
    %c0_i32 = arith.constant 0 : i32
    %c0_i32_0 = arith.constant 0 : i32
    %c0_i32_1 = arith.constant 0 : i32
    %c0_i32_2 = arith.constant 0 : i32
    return %c0_i32, %c0_i32_0, %c0_i32_1 : i32, i32, i32
  }
  func.func @transform_28(%arg0: i32) -> (i32, i32, i32) {
    %c0_i32 = arith.constant 0 : i32
    %c0_i32_0 = arith.constant 0 : i32
    %c0_i32_1 = arith.constant 0 : i32
    %c0_i32_2 = arith.constant 0 : i32
    return %c0_i32, %c0_i32_0, %c0_i32_1 : i32, i32, i32
  }
  func.func @transform_29(%arg0: i32) -> (i32, i32, i32, i32) {
    %c0_i32 = arith.constant 0 : i32
    %c0_i32_0 = arith.constant 0 : i32
    %c0_i32_1 = arith.constant 0 : i32
    %c0_i32_2 = arith.constant 0 : i32
    %c0_i32_3 = arith.constant 0 : i32
    return %c0_i32, %c0_i32_0, %c0_i32_1, %c0_i32_2 : i32, i32, i32, i32
  }
  func.func @transform_30(%arg0: i32) -> (i32, i32, i32) {
    %c0_i32 = arith.constant 0 : i32
    %c0_i32_0 = arith.constant 0 : i32
    %c0_i32_1 = arith.constant 0 : i32
    %c0_i32_2 = arith.constant 0 : i32
    return %c0_i32, %c0_i32_0, %c0_i32_1 : i32, i32, i32
  }
  func.func @transform_31(%arg0: i32) -> (i32, i32, i32) {
    %c0_i32 = arith.constant 0 : i32
    %c0_i32_0 = arith.constant 0 : i32
    %c0_i32_1 = arith.constant 0 : i32
    %c0_i32_2 = arith.constant 0 : i32
    return %c0_i32, %c0_i32_0, %c0_i32_1 : i32, i32, i32
  }
  func.func @transform_32(%arg0: i32) -> (i32, i32, i32) {
    %c0_i32 = arith.constant 0 : i32
    %c0_i32_0 = arith.constant 0 : i32
    %c0_i32_1 = arith.constant 0 : i32
    %c0_i32_2 = arith.constant 0 : i32
    return %c0_i32, %c0_i32_0, %c0_i32_1 : i32, i32, i32
  }
  func.func @transform_33(%arg0: i32) -> (i32, i32, i32) {
    %c0_i32 = arith.constant 0 : i32
    %c0_i32_0 = arith.constant 0 : i32
    %c0_i32_1 = arith.constant 0 : i32
    return %arg0, %c0_i32, %c0_i32_0 : i32, i32, i32
  }
}

</mosaic_0001>

<bundles_post_ra>
// kernel: tpu_custom_call.1
= control target key start
LH: loop header
LB: loop body
LE: loop exit
PB: predicated region body
PF: predicated region fallthrough
CT: control target
= control target key end

     0   :  { %s7844_s6 = smov 1   ;;  %s7845_s10 = smov 2   ;;  %s9023_s0 = inlined_call_operand.smem [shape: u32[34], index: -1, kind: input, shape index: {}] }
   0x1   :  { %s7915_s5 = sld [smem:[%s9023_s0]]   ;;  %s7846_s14 = smov 3  }
   0x2   :  { %s7920_s9 = sld [smem:[%s9023_s0 + %s7844_s6]]   ;;  %s7847_s18 = smov 4  }
   0x3   :  { %s7925_s13 = sld [smem:[%s9023_s0 + %s7845_s10]]   ;;  %s7848_s22 = smov 5  }
   0x4   :  { %s7930_s17 = sld [smem:[%s9023_s0 + %s7846_s14]]   ;;  %s7849_s26 = smov 6  }
   0x5   :  { %s7935_s21 = sld [smem:[%s9023_s0 + %s7847_s18]]   ;;  %s7850_s30 = smov 7  }
   0x6   :  { %s7940_s25 = sld [smem:[%s9023_s0 + %s7848_s22]]   ;;  %s7851_s4 = smov 8  }
   0x7   :  { %9038 = sst [smem:[#allocation51_spill]] %s7915_s5  ;;  %s7852_s10 = smov 9  }
   0x8   :  { %9039 = sst [smem:[#allocation52_spill]] %s7920_s9  ;;  %s7853_s15 = smov 10  }
   0x9   :  { %9040 = sst [smem:[#allocation53_spill]] %s7925_s13  ;;  %s7854_s20 = smov 11  }
   0xa   :  { %9041 = sst [smem:[#allocation54_spill]] %s7930_s17  ;;  %s7856_s1 = smov 13  }
   0xb   :  { %s7945_s29 = sld [smem:[%s9023_s0 + %s7849_s26]]   ;;  %s7855_s26 = smov 12  }
   0xc   :  { %9042 = sst [smem:[#allocation55_spill]] %s7940_s25  ;;  %s7857_s7 = smov 14  }
   0xd   :  { %s7950_s3 = sld [smem:[%s9023_s0 + %s7850_s30]]   ;;  %s7859_s22 = smov 16  }
   0xe   :  { %s7955_s8 = sld [smem:[%s9023_s0 + %s7851_s4]]   ;;  %s7860_s28 = smov 17  }
   0xf   :  { %s7960_s14 = sld [smem:[%s9023_s0 + %s7852_s10]]  }
  0x10   :  { %s7965_s19 = sld [smem:[%s9023_s0 + %s7853_s15]]   ;;  %s7858_s15 = smov 15  }
  0x11   :  { %s7970_s24 = sld [smem:[%s9023_s0 + %s7854_s20]]  }
  0x12   :  { %s7975_s30 = sld [smem:[%s9023_s0 + %s7855_s26]]  }
  0x13   :  { %9043 = sst [smem:[#allocation56_spill]] %s7950_s3 }
  0x14   :  { %9044 = sst [smem:[#allocation57_spill]] %s7955_s8 }
  0x15   :  { %s7980_s6 = sld [smem:[%s9023_s0 + %s7856_s1]]  }
  0x16   :  { %s7985_s12 = sld [smem:[%s9023_s0 + %s7857_s7]]   ;;  %s7861_s7 = smov 18  }
  0x17   :  { %s7990_s20 = sld [smem:[%s9023_s0 + %s7858_s15]]   ;;  %s7862_s15 = smov 19  }
  0x18   :  { %9045 = sst [smem:[#allocation58_spill]] %s7975_s30 }
  0x19   :  { %s7995_s27 = sld [smem:[%s9023_s0 + %s7859_s22]]   ;;  %s7863_s22 = smov 20  }
  0x1a   :  { %s8000_s4 = sld [smem:[%s9023_s0 + %s7860_s28]]   ;;  %s7864_s28 = smov 21  }
  0x1b   :  { %9046 = sst [smem:[#allocation59_spill]] %s7980_s6 }
  0x1c   :  { %9047 = sst [smem:[#allocation60_spill]] %s7985_s12 }
  0x1d   :  { %s8005_s9 = sld [smem:[%s9023_s0 + %s7861_s7]]   ;;  %s7865_s7 = smov 22  }
  0x1e   :  { %s8010_s13 = sld [smem:[%s9023_s0 + %s7862_s15]]   ;;  %s7866_s15 = smov 23  }
  0x1f   :  { %9048 = sst [smem:[#allocation61_spill]] %s7995_s27 }
  0x20   :  { %9049 = sst [smem:[#allocation62_spill]] %s8000_s4 }
  0x21   :  { %s8015_s5 = sld [smem:[%s9023_s0 + %s7863_s22]]   ;;  %s7867_s22 = smov 24  }
  0x22   :  { %s8020_s27 = sld [smem:[%s9023_s0 + %s7864_s28]]   ;;  %s7868_s28 = smov 25  }
  0x23   :  { %9050 = sst [smem:[#allocation63_spill]] %s8005_s9 }
  0x24   :  { %9051 = sst [smem:[#allocation64_spill]] %s8010_s13 }
  0x25   :  { %s8025_s9 = sld [smem:[%s9023_s0 + %s7865_s7]]   ;;  %s7869_s7 = smov 26  }
  0x26   :  { %s8030_s13 = sld [smem:[%s9023_s0 + %s7866_s15]]   ;;  %s7870_s15 = smov 27  }
  0x27   :  { %9052 = sst [smem:[#allocation65_spill]] %s8015_s5 }
  0x28   :  { %9053 = sst [smem:[#allocation66_spill]] %s8020_s27 }
  0x29   :  { %s8035_s12 = sld [smem:[%s9023_s0 + %s7867_s22]]   ;;  %s7871_s22 = smov 28  }
  0x2a   :  { %s8040_s27 = sld [smem:[%s9023_s0 + %s7868_s28]]   ;;  %s7872_s28 = smov 29  }
  0x2b   :  { %9054 = sst [smem:[#allocation67_spill]] %s8025_s9 }
  0x2c   :  { %9055 = sst [smem:[#allocation68_spill]] %s8030_s13 }
  0x2d   :  { %s8045_s9 = sld [smem:[%s9023_s0 + %s7869_s7]]   ;;  %s7873_s7 = smov 30  }
  0x2e   :  { %s8050_s13 = sld [smem:[%s9023_s0 + %s7870_s15]]   ;;  %s7874_s15 = smov 31  }
  0x2f   :  { %9056 = sst [smem:[#allocation69_spill]] %s8035_s12 }
  0x30   :  { %9057 = sst [smem:[#allocation70_spill]] %s8040_s27 }
  0x31   :  { %s8055_s12 = sld [smem:[%s9023_s0 + %s7871_s22]]   ;;  %s7875_s22 = smov 32  }
  0x32   :  { %s8060_s27 = sld [smem:[%s9023_s0 + %s7872_s28]]   ;;  %s7876_s28 = smov 33  }
  0x33   :  { %9058 = sst [smem:[#allocation71_spill]] %s8045_s9 }
  0x34   :  { %s8065_s9 = sld [smem:[%s9023_s0 + %s7873_s7]]  }
  0x35   :  { %s8070_s30 = sld [smem:[%s9023_s0 + %s7874_s15]]  }
  0x37   :  { %9059 = sst [smem:[#allocation72_spill]] %s8055_s12 }
  0x38   :  { %9060 = sst [smem:[#allocation73_spill]] %s8060_s27 }
  0x39   :  { %s8075_s12 = sld [smem:[%s9023_s0 + %s7875_s22]]  }
  0x3a   :  { %s8080_s27 = sld [smem:[%s9023_s0 + %s7876_s28]]  }
  0x3f   :  { %9061 = sst [smem:[#allocation74_spill]] %s8075_s12 }
  0x40   :  { %9062 = sst [smem:[#allocation75_spill]] %s8080_s27 }
  0x41   :  { %72 = vsyncpa [#allocation6], 0 }
  0x42   :  { %74 = vsyncpa [#allocation6 + $0x1], 0 }
  0x43   :  { %75 = vsyncpa [#allocation9], 0 }
  0x44   :  { %76 = vsyncpa [#allocation12], 0 }
  0x45   :  { %77 = vsyncpa [#allocation15], 0 }
  0x46   :  { %78 = vsyncpa [#allocation18], 0 }
  0x47   :  { %79 = vsyncpa [#allocation21], 0 }
  0x48   :  { %80 = vsyncpa [#allocation24], 0 }
  0x49   :  { %81 = vsyncpa [#allocation27], 0 }
  0x4a   :  { %82 = vsyncpa [#allocation30], 0 }
  0x4b   :  { %83 = vsyncpa [#allocation33], 0 }
  0x4c   :  { %84 = vsyncpa [#allocation36], 0 }
  0x4d   :  { %85 = vsyncpa [#allocation7], 0 }
  0x4e   :  { %87 = vsyncpa [#allocation7 + $0x1], 0  ;;  %s8082_s7 = smov 0   ;;  %s8084_s10 = smov 0  }
  0x4f   :  { %s8086_s0 = smov 0   ;;  %s8088_s11 = smov 0  }
  0x50 LB: > { %s7877_s15 = smov [#allocation8]   ;;  %s8103_s18 = sadd.s32 4294967295, %s7842_s11   ;;  %s7842_s11 = sphi %s8088_s11, %s9128_s11   ;;  %s7838_s0 = sphi %s8086_s0, %s9127_s0   ;;  %s7834_s10 = sphi %s8084_s10, %s9126_s10   ;;  %s7830_s7 = sphi %s8082_s7, %s9125_s7  }
  0x51   : > { %s844_s16 = sshll.u32 %s7877_s15, 4  ;;  %p5417_p0 = scmp.ge.s32.totalorder %s7842_s11, 1  ;;  %s845_s16 = int_to_ptr.vmem [resolvable:$true] %s844_s16 }
  0x52   : > { %p9029_p1 = scmp.eq.s32.totalorder %s8103_s18, 0  ;;  %p832_p2 = scmp.lt.s32.totalorder %s7842_s11, 3 }
  0x53   : > { %s7878_s23 = smov [#allocation11]   ;;  %s7879_s1 = smov [#allocation14]  }
  0x54   : > { %p8108_p3 = pnand %p5417_p0, %p832_p2  ;;  %s870_s26 = sshll.u32 %s7878_s23, 4  ;;  %s8121_s26 = int_to_ptr.vmem [resolvable:$true] %s870_s26 }
  0x55   : > { %s894_s2 = sshll.u32 %s7879_s1, 4  ;;  %s7201_s27 = scalar_lea.vmem %s845_s16, 512  ;;  %s8123_s2 = int_to_ptr.vmem [resolvable:$true] %s894_s2 }
  0x56   : > { %s9063_s22 = scalar_select %p8108_p3, 1, 0 }
  0x57   : > { %p6958_p5 = pneg %p8108_p3  ;;  %p7202_p8 = scmp.ne.s32.totalorder %s845_s16, %s7201_s27 }
  0x58   : > { %p7209_p11 = scmp.lt.s32.totalorder %s845_s16, %s845_s16  ;;  %p7210_p12 = scmp.lt.s32.totalorder %s7201_s27, %s7201_s27 }
  0x59   : > { %p8117_p6 = pnand %p6958_p5, %p9029_p1 }
  0x5a   : > { %p7211_p13 = por %p7210_p12, %p7209_p11 }
  0x5b   : > { %p8127_p7 = pneg %p8117_p6 }
  0x5d   : > { %p7204_p9 = pnand %p7202_p8, %p8127_p7 }
  0x5f   : > { %p7205_p10 = pneg %p7204_p9 }
  0x61   : > { %p7212_p0 = pnand %p7211_p13, %p7205_p10 }
  0x63   : > { %7215 = shalt.err (!%p7212_p0)
}
  0x64   : > { %s9031_s23 = smov 128   ;;  %s9066_s17 = sld [smem:[#allocation54_spill]] }
  0x65   : > { %s9033_s1 = smov 8   ;;  %s7227_s12 = scalar_lea.vmem %s8121_s26, 512 }
  0x66   : > { %p7228_p2 = scmp.ne.s32.totalorder %s8121_s26, %s7227_s12  ;;  %p7235_p9 = scmp.lt.s32.totalorder %s8121_s26, %s8121_s26 }
  0x67   : > { %p7236_p10 = scmp.lt.s32.totalorder %s7227_s12, %s7227_s12 }
  0x68   : > { %p7230_p5 = pnand %p7228_p2, %p8127_p7 }
  0x69   : > { %p7237_p11 = por %p7236_p10, %p7235_p9 }
  0x6a   : > { %6961 = dma.hbm_to_vmem [thread:$0]  (!%p8117_p6), %s9066_s17, 512, %s845_s16, [#allocation9], %s9031_s23, %s9031_s23, %s9033_s1  }
  0x6b   : > { %p7231_p8 = pneg %p7230_p5 }
  0x6d   : > { %p7238_p12 = pnand %p7237_p11, %p7231_p8 }
  0x6f   : > { %7241 = shalt.err (!%p7238_p12)
}
  0x70   : > { %s9067_s25 = sld [smem:[#allocation55_spill]]  ;;  %s7253_s27 = scalar_lea.vmem %s8123_s2, 6144 }
  0x71   : > { %p7254_p13 = scmp.ne.s32.totalorder %s8123_s2, %s7253_s27  ;;  %p7261_p5 = scmp.lt.s32.totalorder %s8123_s2, %s8123_s2 }
  0x72   : > { %p7262_p8 = scmp.lt.s32.totalorder %s7253_s27, %s7253_s27 }
  0x73   : > { %p7256_p0 = pnand %p7254_p13, %p8127_p7 }
  0x74   : > { %p7263_p9 = por %p7262_p8, %p7261_p5 }
  0x75   : > { %p7257_p2 = pneg %p7256_p0 }
  0x76   : > { %6967 = dma.hbm_to_vmem [thread:$0]  (!%p8117_p6), %s9067_s25, 512, %s8121_s26, [#allocation12], %s9031_s23, %s9031_s23, %s9033_s1  }
  0x77   : > { %p7264_p10 = pnand %p7263_p9, %p7257_p2 }
  0x79   : > { %7267 = shalt.err (!%p7264_p10)
}
  0x7a   : > { %s9068_s3 = sld [smem:[#allocation56_spill]]  ;;  %s7882_s12 = smov [#allocation17]  }
  0x7b   : > { %s921_s16 = sshll.u32 %s7882_s12, 4  ;;  %s7883_s26 = smov [#allocation20]   ;;  %s922_s16 = int_to_ptr.vmem [resolvable:$true] %s921_s16 }
  0x7c   : > { %s943_s17 = sshll.u32 %s7883_s26, 4  ;;  %s7279_s25 = scalar_lea.vmem %s922_s16, 16  ;;  %s944_s17 = int_to_ptr.vmem [resolvable:$true] %s943_s17 }
  0x7d   : > { %p7280_p11 = scmp.ne.s32.totalorder %s922_s16, %s7279_s25  ;;  %s7286_s27 = scalar_lea.vmem %s922_s16, 32 }
  0x7e   : > { %p7287_p0 = scmp.lt.s32.totalorder %s922_s16, %s922_s16  ;;  %p7288_p2 = scmp.lt.s32.totalorder %s7286_s27, %s7279_s25 }
  0x7f   : > { %p7282_p12 = pnand %p7280_p11, %p8127_p7 }
  0x80   : > { %6973 = dma.hbm_to_vmem [thread:$0]  (!%p8117_p6), %s9068_s3, 6144, %s8123_s2, [#allocation15], %s9031_s23, %s9031_s23, %s9033_s1  }
  0x81   : > { %p7283_p13 = pneg %p7282_p12  ;;  %p7289_p5 = por %p7288_p2, %p7287_p0 }
  0x83   : > { %p7290_p8 = pnand %p7289_p5, %p7283_p13 }
  0x85   : > { %7293 = shalt.err (!%p7290_p8)
}
  0x86   : > { %6979 = dma.hbm_to_vmem [thread:$0]  (!%p8117_p6), %s7960_s14, 16, %s922_s16, [#allocation18]  }
  0x87   : > { %s7305_s2 = scalar_lea.vmem %s944_s17, 16  ;;  %s7312_s12 = scalar_lea.vmem %s944_s17, 32 }
  0x88   : > { %p7306_p9 = scmp.ne.s32.totalorder %s944_s17, %s7305_s2  ;;  %p7313_p11 = scmp.lt.s32.totalorder %s944_s17, %s944_s17 }
  0x89   : > { %p7314_p12 = scmp.lt.s32.totalorder %s7312_s12, %s7305_s2 }
  0x8a   : > { %p7308_p10 = pnand %p7306_p9, %p8127_p7 }
  0x8b   : > { %p7315_p1 = por %p7314_p12, %p7313_p11 }
  0x8c   : > { %p7309_p4 = pneg %p7308_p10 }
  0x8e   : > { %p7316_p3 = pnand %p7315_p1, %p7309_p4 }
  0x90   : > { %7319 = shalt.err (!%p7316_p3)
}
  0x91   : > { %6985 = dma.hbm_to_vmem [thread:$0]  (!%p8117_p6), %s7970_s24, 16, %s944_s17, [#allocation21]  }
  0x92   : > { %s7884_s25 = smov [#allocation23]   ;;  %s7885_s16 = smov [#allocation26]  }
  0x93   : > { %s967_s26 = sshll.u32 %s7884_s25, 4  ;;  %s991_s27 = sshll.u32 %s7885_s16, 4  ;;  %s968_s26 = int_to_ptr.vmem [resolvable:$true] %s967_s26  ;;  %s992_s27 = int_to_ptr.vmem [resolvable:$true] %s991_s27 }
  0x94   : > { %s7331_s23 = scalar_lea.vmem %s968_s26, 16  ;;  %s7338_s1 = scalar_lea.vmem %s968_s26, 32 }
  0x95   : > { %p7332_p13 = scmp.ne.s32.totalorder %s968_s26, %s7331_s23  ;;  %p7339_p5 = scmp.lt.s32.totalorder %s968_s26, %s968_s26 }
  0x96   : > { %p7340_p8 = scmp.lt.s32.totalorder %s7338_s1, %s7331_s23 }
  0x97   : > { %p7334_p0 = pnand %p7332_p13, %p8127_p7 }
  0x98   : > { %p7341_p1 = por %p7340_p8, %p7339_p5 }
  0x99   : > { %p7335_p2 = pneg %p7334_p0 }
  0x9b   : > { %p7342_p3 = pnand %p7341_p1, %p7335_p2 }
  0x9d   : > { %7345 = shalt.err (!%p7342_p3)
}
  0x9e   : > { %s9069_s6 = sld [smem:[#allocation59_spill]]  ;;  %s7357_s17 = scalar_lea.vmem %s992_s27, 16 }
  0x9f   : > { %p7358_p4 = scmp.ne.s32.totalorder %s992_s27, %s7357_s17  ;;  %s7364_s2 = scalar_lea.vmem %s992_s27, 32 }
  0xa0   : > { %p7365_p11 = scmp.lt.s32.totalorder %s992_s27, %s992_s27  ;;  %p7366_p12 = scmp.lt.s32.totalorder %s7364_s2, %s7357_s17 }
  0xa1   : > { %p7360_p9 = pnand %p7358_p4, %p8127_p7 }
  0xa2   : > { %p7367_p13 = por %p7366_p12, %p7365_p11 }
  0xa3   : > { %p7361_p10 = pneg %p7360_p9 }
  0xa4   : > { %6991 = dma.hbm_to_vmem [thread:$0]  (!%p8117_p6), %s9069_s6, 16, %s968_s26, [#allocation24]  }
  0xa5   : > { %p7368_p0 = pnand %p7367_p13, %p7361_p10 }
  0xa7   : > { %7371 = shalt.err (!%p7368_p0)
}
  0xa8   : > { %6997 = dma.hbm_to_vmem [thread:$0]  (!%p8117_p6), %s7990_s20, 16, %s992_s27, [#allocation27]  }
  0xa9   : > { %s7886_s23 = smov [#allocation29]   ;;  %s7887_s12 = smov [#allocation32]  }
  0xaa   : > { %s1013_s1 = sshll.u32 %s7886_s23, 4  ;;  %s1040_s25 = sshll.u32 %s7887_s12, 4  ;;  %s1014_s1 = int_to_ptr.vmem [resolvable:$true] %s1013_s1  ;;  %s1041_s25 = int_to_ptr.vmem [resolvable:$true] %s1040_s25 }
  0xab   : > { %s7383_s26 = scalar_lea.vmem %s1014_s1, 16  ;;  %s7390_s16 = scalar_lea.vmem %s1014_s1, 32 }
  0xac   : > { %p7384_p2 = scmp.ne.s32.totalorder %s1014_s1, %s7383_s26  ;;  %p7391_p1 = scmp.lt.s32.totalorder %s1014_s1, %s1014_s1 }
  0xad   : > { %p7392_p3 = scmp.lt.s32.totalorder %s7390_s16, %s7383_s26 }
  0xae   : > { %p7386_p5 = pnand %p7384_p2, %p8127_p7 }
  0xaf   : > { %p7393_p4 = por %p7392_p3, %p7391_p1 }
  0xb0   : > { %p7387_p8 = pneg %p7386_p5 }
  0xb2   : > { %p7394_p9 = pnand %p7393_p4, %p7387_p8 }
  0xb4   : > { %7397 = shalt.err (!%p7394_p9)
}
  0xb5   : > { %s9070_s4 = sld [smem:[#allocation62_spill]]  ;;  %s7409_s27 = scalar_lea.vmem %s1041_s25, 16 }
  0xb6   : > { %p7410_p10 = scmp.ne.s32.totalorder %s1041_s25, %s7409_s27  ;;  %s7416_s17 = scalar_lea.vmem %s1041_s25, 32 }
  0xb7   : > { %p7417_p13 = scmp.lt.s32.totalorder %s1041_s25, %s1041_s25  ;;  %p7418_p0 = scmp.lt.s32.totalorder %s7416_s17, %s7409_s27 }
  0xb8   : > { %p7412_p11 = pnand %p7410_p10, %p8127_p7 }
  0xb9   : > { %p7419_p2 = por %p7418_p0, %p7417_p13 }
  0xba   : > { %p7413_p12 = pneg %p7412_p11 }
  0xbb   : > { %7003 = dma.hbm_to_vmem [thread:$0]  (!%p8117_p6), %s9070_s4, 16, %s1014_s1, [#allocation30]  }
  0xbc   : > { %p7420_p5 = pnand %p7419_p2, %p7413_p12 }
  0xbe   : > { %7423 = shalt.err (!%p7420_p5)
}
  0xbf   : > { %s9071_s5 = sld [smem:[#allocation65_spill]]  ;;  %s7888_s2 = smov [#allocation35]  }
  0xc0   : > { %s1078_s23 = sshll.u32 %s7888_s2, 4  ;;  %s7889_s1 = smov [#allocation10]   ;;  %s1079_s23 = int_to_ptr.vmem [resolvable:$true] %s1078_s23 }
  0xc1   : > { %s857_s12 = sshll.u32 %s7889_s1, 4  ;;  %s7435_s26 = scalar_lea.vmem %s1079_s23, 512  ;;  %s858_s12 = int_to_ptr.vmem [resolvable:$true] %s857_s12 }
  0xc2   : > { %p7436_p8 = scmp.ne.s32.totalorder %s1079_s23, %s7435_s26  ;;  %p7443_p4 = scmp.lt.s32.totalorder %s1079_s23, %s1079_s23 }
  0xc3   : > { %p7444_p9 = scmp.lt.s32.totalorder %s7435_s26, %s7435_s26 }
  0xc4   : > { %p7438_p1 = pnand %p7436_p8, %p8127_p7 }
  0xc5   : > { %7009 = dma.hbm_to_vmem [thread:$0]  (!%p8117_p6), %s9071_s5, 16, %s1041_s25, [#allocation33]  }
  0xc6   : > { %p7439_p3 = pneg %p7438_p1  ;;  %p7445_p10 = por %p7444_p9, %p7443_p4 }
  0xc8   : > { %p7446_p11 = pnand %p7445_p10, %p7439_p3 }
  0xca   : > { %7449 = shalt.err (!%p7446_p11)
}
  0xcb   : > { %s9072_s16 = smov 8   ;;  %s9073_s27 = smov 128  }
  0xcc   : > { %7015 = dma.hbm_to_vmem [thread:$0]  (!%p8117_p6), %s8050_s13, 512, %s1079_s23, [#allocation36], %s9073_s27, %s9073_s27, %s9072_s16  }
  0xcd   : > { %s7461_s25 = scalar_lea.vmem %s858_s12, 512  ;;  %p7469_p2 = scmp.lt.s32.totalorder %s858_s12, %s858_s12 }
  0xce   : > { %p7462_p12 = scmp.ne.s32.totalorder %s858_s12, %s7461_s25  ;;  %p7470_p5 = scmp.lt.s32.totalorder %s7461_s25, %s7461_s25 }
  0xd0   : > { %p7464_p13 = pnand %p7462_p12, %p8127_p7  ;;  %p7471_p8 = por %p7470_p5, %p7469_p2 }
  0xd2   : > { %p7465_p0 = pneg %p7464_p13 }
  0xd4   : > { %p7472_p1 = pnand %p7471_p8, %p7465_p0 }
  0xd6   : > { %7475 = shalt.err (!%p7472_p1)
}
  0xd7   : > { %6964 = dma.hbm_to_vmem [thread:$0]  (!%p8117_p6), %s7935_s21, 512, %s858_s12, [#allocation9], %s9073_s27, %s9073_s27, %s9072_s16  }
  0xd8   : > { %s7890_s17 = smov [#allocation13]   ;;  %s7891_s23 = smov [#allocation16]  }
  0xd9   : > { %s884_s2 = sshll.u32 %s7890_s17, 4  ;;  %s907_s1 = sshll.u32 %s7891_s23, 4  ;;  %s885_s2 = int_to_ptr.vmem [resolvable:$true] %s884_s2  ;;  %s908_s1 = int_to_ptr.vmem [resolvable:$true] %s907_s1 }
  0xda   : > { %s7487_s26 = scalar_lea.vmem %s885_s2, 16  ;;  %s7494_s25 = scalar_lea.vmem %s885_s2, 32 }
  0xdb   : > { %p7488_p3 = scmp.ne.s32.totalorder %s885_s2, %s7487_s26  ;;  %p7495_p10 = scmp.lt.s32.totalorder %s885_s2, %s885_s2 }
  0xdc   : > { %p7496_p11 = scmp.lt.s32.totalorder %s7494_s25, %s7487_s26 }
  0xdd   : > { %p7490_p4 = pnand %p7488_p3, %p8127_p7 }
  0xde   : > { %p7497_p12 = por %p7496_p11, %p7495_p10 }
  0xdf   : > { %p7491_p9 = pneg %p7490_p4 }
  0xe1   : > { %p7498_p13 = pnand %p7497_p12, %p7491_p9 }
  0xe3   : > { %7501 = shalt.err (!%p7498_p13)
}
  0xe4   : > { %6970 = dma.hbm_to_vmem [thread:$0]  (!%p8117_p6), %s7945_s29, 16, %s885_s2, [#allocation12]  }
  0xe5   : > { %s7513_s12 = scalar_lea.vmem %s908_s1, 3072  ;;  %p7521_p8 = scmp.lt.s32.totalorder %s908_s1, %s908_s1 }
  0xe6   : > { %p7514_p0 = scmp.ne.s32.totalorder %s908_s1, %s7513_s12  ;;  %p7522_p1 = scmp.lt.s32.totalorder %s7513_s12, %s7513_s12 }
  0xe8   : > { %p7516_p2 = pnand %p7514_p0, %p8127_p7  ;;  %p7523_p3 = por %p7522_p1, %p7521_p8 }
  0xea   : > { %p7517_p5 = pneg %p7516_p2 }
  0xec   : > { %p7524_p4 = pnand %p7523_p3, %p7517_p5 }
  0xee   : > { %7527 = shalt.err (!%p7524_p4)
}
  0xef   : > { %s9074_s8 = sld [smem:[#allocation57_spill]]  ;;  %s7892_s17 = smov [#allocation19]  }
  0xf0   : > { %s932_s2 = sshll.u32 %s7892_s17, 4  ;;  %s7893_s23 = smov [#allocation22]   ;;  %s933_s2 = int_to_ptr.vmem [resolvable:$true] %s932_s2 }
  0xf1   : > { %s953_s26 = sshll.u32 %s7893_s23, 4  ;;  %s7539_s25 = scalar_lea.vmem %s933_s2, 16  ;;  %s954_s26 = int_to_ptr.vmem [resolvable:$true] %s953_s26 }
  0xf2   : > { %p7540_p9 = scmp.ne.s32.totalorder %s933_s2, %s7539_s25  ;;  %s7546_s12 = scalar_lea.vmem %s933_s2, 32 }
  0xf3   : > { %p7547_p12 = scmp.lt.s32.totalorder %s933_s2, %s933_s2  ;;  %p7548_p13 = scmp.lt.s32.totalorder %s7546_s12, %s7539_s25 }
  0xf4   : > { %p7542_p10 = pnand %p7540_p9, %p8127_p7 }
  0xf5   : > { %6976 = dma.hbm_to_vmem [thread:$0]  (!%p8117_p6), %s9074_s8, 3072, %s908_s1, [#allocation15], %s9073_s27, %s9073_s27, %s9072_s16  }
  0xf6   : > { %p7543_p11 = pneg %p7542_p10  ;;  %p7549_p0 = por %p7548_p13, %p7547_p12 }
  0xf8   : > { %p7550_p2 = pnand %p7549_p0, %p7543_p11 }
  0xfa   : > { %7553 = shalt.err (!%p7550_p2)
}
  0xfb   : > { %6982 = dma.hbm_to_vmem [thread:$0]  (!%p8117_p6), %s7965_s19, 16, %s933_s2, [#allocation18]  }
  0xfc   : > { %s7565_s1 = scalar_lea.vmem %s954_s26, 512  ;;  %p7573_p3 = scmp.lt.s32.totalorder %s954_s26, %s954_s26 }
  0xfd   : > { %p7566_p5 = scmp.ne.s32.totalorder %s954_s26, %s7565_s1  ;;  %p7574_p4 = scmp.lt.s32.totalorder %s7565_s1, %s7565_s1 }
  0xff   : > { %p7568_p8 = pnand %p7566_p5, %p8127_p7  ;;  %p7575_p9 = por %p7574_p4, %p7573_p3 }
 0x101   : > { %p7569_p1 = pneg %p7568_p8 }
 0x103   : > { %p7576_p10 = pnand %p7575_p9, %p7569_p1 }
 0x105   : > { %7579 = shalt.err (!%p7576_p10)
}
 0x106   : > { %s9075_s17 = sld [smem:[#allocation58_spill]]  ;;  %s7894_s2 = smov [#allocation25]  }
 0x107   : > { %s977_s23 = sshll.u32 %s7894_s2, 4  ;;  %s7895_s25 = smov [#allocation28]   ;;  %s978_s23 = int_to_ptr.vmem [resolvable:$true] %s977_s23 }
 0x108   : > { %s1002_s12 = sshll.u32 %s7895_s25, 4  ;;  %s7591_s3 = scalar_lea.vmem %s978_s23, 6144  ;;  %s1003_s12 = int_to_ptr.vmem [resolvable:$true] %s1002_s12 }
 0x109   : > { %p7592_p11 = scmp.ne.s32.totalorder %s978_s23, %s7591_s3  ;;  %p7599_p0 = scmp.lt.s32.totalorder %s978_s23, %s978_s23 }
 0x10a   : > { %p7600_p2 = scmp.lt.s32.totalorder %s7591_s3, %s7591_s3 }
 0x10b   : > { %p7594_p12 = pnand %p7592_p11, %p8127_p7 }
 0x10c   : > { %6988 = dma.hbm_to_vmem [thread:$0]  (!%p8117_p6), %s9075_s17, 512, %s954_s26, [#allocation21], %s9073_s27, %s9073_s27, %s9072_s16  }
 0x10d   : > { %p7595_p13 = pneg %p7594_p12  ;;  %p7601_p5 = por %p7600_p2, %p7599_p0 }
 0x10f   : > { %p7602_p8 = pnand %p7601_p5, %p7595_p13 }
 0x111   : > { %7605 = shalt.err (!%p7602_p8)
}
 0x112   : > { %s9076_s26 = sld [smem:[#allocation60_spill]]  ;;  %s7617_s1 = scalar_lea.vmem %s1003_s12, 16 }
 0x113   : > { %p7618_p1 = scmp.ne.s32.totalorder %s1003_s12, %s7617_s1  ;;  %s7624_s17 = scalar_lea.vmem %s1003_s12, 32 }
 0x114   : > { %p7625_p9 = scmp.lt.s32.totalorder %s1003_s12, %s1003_s12  ;;  %p7626_p10 = scmp.lt.s32.totalorder %s7624_s17, %s7617_s1 }
 0x115   : > { %p7620_p3 = pnand %p7618_p1, %p8127_p7 }
 0x116   : > { %p7627_p11 = por %p7626_p10, %p7625_p9 }
 0x117   : > { %p7621_p4 = pneg %p7620_p3 }
 0x118   : > { %6994 = dma.hbm_to_vmem [thread:$0]  (!%p8117_p6), %s9076_s26, 6144, %s978_s23, [#allocation24], %s9073_s27, %s9073_s27, %s9072_s16  }
 0x119   : > { %p7628_p12 = pnand %p7627_p11, %p7621_p4 }
 0x11b   : > { %7631 = shalt.err (!%p7628_p12)
}
 0x11c   : > { %s9077_s3 = sld [smem:[#allocation61_spill]]  ;;  %s7896_s2 = smov [#allocation31]  }
 0x11d   : > { %s1026_s25 = sshll.u32 %s7896_s2, 4  ;;  %s7897_s23 = smov [#allocation34]   ;;  %s1027_s25 = int_to_ptr.vmem [resolvable:$true] %s1026_s25 }
 0x11e   : > { %s1056_s26 = sshll.u32 %s7897_s23, 4  ;;  %s7643_s4 = scalar_lea.vmem %s1027_s25, 1024  ;;  %s1057_s26 = int_to_ptr.vmem [resolvable:$true] %s1056_s26 }
 0x11f   : > { %p7644_p13 = scmp.ne.s32.totalorder %s1027_s25, %s7643_s4  ;;  %p7651_p5 = scmp.lt.s32.totalorder %s1027_s25, %s1027_s25 }
 0x120   : > { %p7652_p8 = scmp.lt.s32.totalorder %s7643_s4, %s7643_s4 }
 0x121   : > { %p7646_p0 = pnand %p7644_p13, %p8127_p7 }
 0x122   : > { %7000 = dma.hbm_to_vmem [thread:$0]  (!%p8117_p6), %s9077_s3, 16, %s1003_s12, [#allocation27]  }
 0x123   : > { %p7647_p2 = pneg %p7646_p0  ;;  %p7653_p1 = por %p7652_p8, %p7651_p5 }
 0x125   : > { %p7654_p3 = pnand %p7653_p1, %p7647_p2 }
 0x127   : > { %7657 = shalt.err (!%p7654_p3)
}
 0x128   : > { %s9078_s12 = sld [smem:[#allocation64_spill]]  ;;  %s7669_s1 = scalar_lea.vmem %s1057_s26, 6144 }
 0x129   : > { %p7670_p4 = scmp.ne.s32.totalorder %s1057_s26, %s7669_s1  ;;  %p7677_p11 = scmp.lt.s32.totalorder %s1057_s26, %s1057_s26 }
 0x12a   : > { %p7678_p12 = scmp.lt.s32.totalorder %s7669_s1, %s7669_s1 }
 0x12b   : > { %p7672_p9 = pnand %p7670_p4, %p8127_p7 }
 0x12c   : > { %p7679_p13 = por %p7678_p12, %p7677_p11 }
 0x12d   : > { %p7673_p10 = pneg %p7672_p9 }
 0x12e   : > { %7006 = dma.hbm_to_vmem [thread:$0]  (!%p8117_p6), %s9078_s12, 1024, %s1027_s25, [#allocation30], %s9073_s27, %s9073_s27, %s9072_s16  }
 0x12f   : > { %p7680_p0 = pnand %p7679_p13, %p7673_p10 }
 0x131   : > { %7683 = shalt.err (!%p7680_p0)
}
 0x132   : > { %s9079_s4 = sld [smem:[#allocation68_spill]]  ;;  %s7898_s17 = smov [#allocation37]  }
 0x133   : > { %s1094_s3 = sshll.u32 %s7898_s17, 4  ;;  %s1095_s3 = int_to_ptr.vmem [resolvable:$true] %s1094_s3 }
 0x134   : > { %s7695_s2 = scalar_lea.vmem %s1095_s3, 6144  ;;  %p7703_p1 = scmp.lt.s32.totalorder %s1095_s3, %s1095_s3 }
 0x135   : > { %p7696_p2 = scmp.ne.s32.totalorder %s1095_s3, %s7695_s2  ;;  %p7704_p3 = scmp.lt.s32.totalorder %s7695_s2, %s7695_s2 }
 0x137   : > { %p7698_p5 = pnand %p7696_p2, %p8127_p7  ;;  %p7705_p4 = por %p7704_p3, %p7703_p1 }
 0x138   : > { %7012 = dma.hbm_to_vmem [thread:$0]  (!%p8117_p6), %s9079_s4, 6144, %s1057_s26, [#allocation33], %s9073_s27, %s9073_s27, %s9072_s16  }
 0x139   : > { %p7699_p8 = pneg %p7698_p5 }
 0x13b   : > { %p7706_p9 = pnand %p7705_p4, %p7699_p8 }
 0x13d   : > { %7709 = shalt.err (!%p7706_p9)
}
 0x13e   : > { %s9080_s25 = sld [smem:[#allocation73_spill]]  ;;  %s5416_s28 = sadd.s32 4294967294, %s7842_s11  }
 0x13f   : > { %s8276_s15 = sadd.s32 1, %s7842_s11   ;;  %s100_s26 = sadd.s32 1, %s7838_s0 }
 0x140   : > { %s97_s23 = ssub.s32 %s7842_s11, %s8276_s15  ;;  %s9081_s12 = sld [smem:[#allocation51_spill]] }
 0x141   : > { %p98_p7 = scmp.eq.s32.totalorder %s97_s23, 0  ;;  %p107_p10 = scmp.ne.s32.totalorder %s7838_s0, %s7834_s10 }
 0x142   : > { %p108_p11 = scmp.eq.s32.totalorder %s7842_s11, 0  ;;  %p113_p12 = scmp.ne.s32.totalorder %s7834_s10, %s7830_s7 }
 0x143   : > { %s8287_s1 = scalar_select %p98_p7, %s7838_s0, %s100_s26  }
 0x144   : > { %7018 = dma.hbm_to_vmem [thread:$0]  (!%p8117_p6), %s9080_s25, 6144, %s1095_s3, [#allocation36], %s9073_s27, %s9073_s27, %s9072_s16  }
 0x145   : > { %p8289_p13 = por %p108_p11, %p107_p10  ;;  %p9083_p0 = scmp.eq.s32.totalorder %s8103_s18, 0 }
 0x146   : > { %p819_p2 = scmp.eq.s32.totalorder %s8103_s18, 1  ;;  %p825_p5 = scmp.eq.s32.totalorder %s5416_s28, 1 }
 0x147   : > { %p8295_p6 = por %p9083_p0, %p113_p12  ;;  %p7047_p8 = scmp.lt.s32.totalorder %s7842_s11, 2 }
 0x148   : > { %s1117_s27 = sand.u32 1, %s7838_s0   ;;  %p8302_p1 = por %p819_p2, %p107_p10 }
 0x149   : > { %s9084_s16 = scalar_select %p8295_p6, 1, 0 }
 0x14a   : > { %s9085_s17 = scalar_select %p8302_p1, 1, 0 }
 0x14b   : > { %p8306_p3 = por %p825_p5, %p113_p12  ;;  %s5439_s2 = sshll.u32 %s1117_s27, 3 }
 0x14c   : > { %s5440_s25 = sshll.u32 %s7842_s11, 7  ;;  %s1121_s28 = scalar_lea.vmem [#allocation5], %s5439_s2 }
 0x14d   : > { %s9086_s3 = scalar_select %p8306_p3, 1, 0 }
 0x14e   : > { %s8312_s23 = scalar_lea.hbm %s9081_s12, %s5440_s25  ;;  %s1128_s26 = sshll.u32 %s1121_s28, 4  ;;  %s1129_s26 = int_to_ptr.vmem [resolvable:$true] %s1128_s26 }
 0x14f   : > { %p8316_p4 = pnand %p7047_p8, %p8289_p13  ;;  %s1118_s6 = scalar_lea.sflag [#allocation6], %s1117_s27 }
 0x150   : > { %s7710_s8 = scalar_lea.hbm %s8312_s23, 128  ;;  %s7715_s25 = scalar_lea.hbm %s9081_s12, 256 }
 0x151   : > { %s9087_s5 = scalar_select %p8316_p4, 1, 0 }
 0x152   : > { %p7711_p9 = scmp.ne.s32.totalorder %s8312_s23, %s7710_s8  ;;  %p7712_p7 = pneg %p8316_p4 }
 0x153   : > { %p7716_p12 = scmp.lt.s32.totalorder %s8312_s23, %s9081_s12  ;;  %p7717_p0 = scmp.lt.s32.totalorder %s7715_s25, %s7710_s8 }
 0x154   : > { %p7713_p10 = pnand %p7712_p7, %p7711_p9 }
 0x155   : > { %p7718_p2 = por %p7717_p0, %p7716_p12 }
 0x156   : > { %p7714_p11 = pneg %p7713_p10 }
 0x158   : > { %p7719_p5 = pnand %p7718_p2, %p7714_p11 }
 0x15a   : > { %7722 = shalt.err (!%p7719_p5)
}
 0x15b   : > { %s7723_s2 = scalar_lea.vmem %s1129_s26, 128  ;;  %s7899_s4 = smov [#allocation5]  }
 0x15c   : > { %p7724_p3 = scmp.ne.s32.totalorder %s1129_s26, %s7723_s2  ;;  %s7728_s28 = sshll.u32 %s7899_s4, 4  ;;  %s7729_s28 = int_to_ptr.vmem [resolvable:$false] %s7728_s28 }
 0x15d   : > { %s7730_s27 = scalar_lea.vmem %s7729_s28, 256  ;;  %p7731_p1 = scmp.lt.s32.totalorder %s1129_s26, %s7729_s28 }
 0x15e   : > { %p7726_p13 = pnand %p7724_p3, %p7712_p7  ;;  %p7732_p6 = scmp.lt.s32.totalorder %s7730_s27, %s7723_s2 }
 0x160   : > { %p7727_p8 = pneg %p7726_p13  ;;  %p7733_p4 = por %p7732_p6, %p7731_p1 }
 0x162   : > { %p7734_p9 = pnand %p7733_p4, %p7727_p8 }
 0x164   : > { %7737 = shalt.err (!%p7734_p9)
}
 0x165   : > { %p9088_p10 = scmp.ne.s32.totalorder %s9087_s5, 0  ;;  %p9089_p11 = scmp.ne.s32.totalorder %s9063_s22, 0 }
 0x166   : > { %s8333_s8 = sand.u32 (!%p9089_p11), 1, %s7834_s10   ;;  %p9090_p6 = scmp.ne.s32.totalorder (!%p9089_p11), %s9084_s16, 0 }
 0x167   : > { %7022 = dma.hbm_to_vmem [thread:$0]  (!%p9088_p10), %s8312_s23, 128, %s1129_s26, %s1118_s6  }
 0x168   : > { %1151 = sbr.rel (%p9089_p11) target bundleno = 5033 (0x13a9), region = 152  ;;  %s5442_s25 = sshll.u32 (!%p9089_p11), %s8333_s8, 3 }
 0x169   : > { %s1154_s4 = scalar_lea.sflag (!%p9089_p11), [#allocation6], %s8333_s8  ;;  %s8337_s28 = scalar_lea.vmem (!%p9089_p11), [#allocation5], %s5442_s25 }
 0x16d   : > { %7781 = dma.done.wait (%p9090_p6), %s1154_s4, 128  }
 0x16e   : > { %7783 = vsyncadd (%p9090_p6), %s1154_s4, 4294967168  ;;  %p9091_p1 = scmp.eq.s32.totalorder %s8103_s18, 0 }
 0x170   : > { %7785 = dma.done.wait (%p9091_p1), [#allocation9], 1024   ;;  %p9092_p3 = pmov %p9091_p1 }
 0x171   : > { %p9093_p4 = pmov %p9091_p1 }
 0x172   : > { %7787 = vsyncadd (%p9092_p3), [#allocation9], 4294966272 }
 0x173   : > { %7789 = dma.done.wait (%p9093_p4), [#allocation12], 528   ;;  %p9094_p7 = pmov %p9091_p1 }
 0x174   : > { %p9095_p12 = pmov %p9091_p1 }
 0x175   : > { %7791 = vsyncadd (%p9094_p7), [#allocation12], 4294966768 }
 0x176   : > { %7793 = dma.done.wait (%p9095_p12), [#allocation15], 9216   ;;  %p9096_p0 = pmov %p9091_p1 }
 0x178   : > { %7795 = vsyncadd (%p9096_p0), [#allocation15], 4294958080  ;;  %p9097_p2 = pmov %p9096_p0 }
 0x179   : > { %p9098_p5 = pmov %p9096_p0 }
 0x17a   : > { %7797 = dma.done.wait (%p9097_p2), [#allocation18], 32  }
 0x17b   : > { %7799 = vsyncadd (%p9098_p5), [#allocation18], 4294967264  ;;  %p9099_p13 = pmov %p9096_p0 }
 0x17c   : > { %p9100_p8 = pmov %p9096_p0 }
 0x17d   : > { %7801 = dma.done.wait (%p9099_p13), [#allocation21], 528  }
 0x17e   : > { %7803 = vsyncadd (%p9100_p8), [#allocation21], 4294966768  ;;  %p9101_p9 = pmov %p9096_p0 }
 0x17f   : > { %p9102_p10 = pmov %p9096_p0 }
 0x180   : > { %7805 = dma.done.wait (%p9101_p9), [#allocation24], 6160  }
 0x181   : > { %7807 = vsyncadd (%p9102_p10), [#allocation24], 4294961136  ;;  %p9103_p11 = pmov %p9096_p0 }
 0x182   : > { %p9104_p6 = pmov %p9096_p0 }
 0x183   : > { %7809 = dma.done.wait (%p9103_p11), [#allocation27], 32  }
 0x184   : > { %7811 = vsyncadd (%p9104_p6), [#allocation27], 4294967264  ;;  %p9105_p1 = pmov %p9096_p0 }
 0x185   : > { %p9106_p3 = pmov %p9096_p0 }
 0x186   : > { %7813 = dma.done.wait (%p9105_p1), [#allocation30], 1040  }
 0x187   : > { %7815 = vsyncadd (%p9106_p3), [#allocation30], 4294966256  ;;  %p9107_p4 = pmov %p9096_p0 }
 0x188   : > { %p9108_p7 = pmov %p9096_p0 }
 0x189   : > { %7817 = dma.done.wait (%p9107_p4), [#allocation33], 6160  }
 0x18a   : > { %7819 = vsyncadd (%p9108_p7), [#allocation33], 4294961136  ;;  %p9109_p12 = pmov %p9096_p0 }
 0x18c   : > { %7821 = dma.done.wait (%p9109_p12), [#allocation36], 6656  }
 0x18d   : > { %7823 = vsyncadd (%p9096_p0), [#allocation36], 4294960640  ;;  %vm1341_vm0 = vcmask 253952   ;;  %v7900_v0 = vmov 0.0   ;;  %vm7901_vm1 = vmmov 0   ;;  %vm1344_vm2 = vcmask 261120  }
 0x18e   : > { %5968 = vmatprep.subr.mxu0 %v7900_v0  ;;  %1336 = vst [vmem:[#allocation3] sm:$0x1] %v7900_v0  ;;  %1337 = vst [vmem:[#allocation3 + $0x11] sm:$0x1] %v7900_v0  ;;  %5976 = vmatprep.mubr.msk.f32.mxu0 %vm7901_vm1, %v7900_v0  ;;  %v1351_v1 = vld [vmem:[#allocation8 + $0x18] sm:$0xff]  ;;  %v1350_v2 = vld [vmem:[#allocation8 + $0x10] sm:$0xff] }
 0x18f   : > { %1342 = vst.msk [vmem:[#allocation2 + $0x8] sm:$0x1] %vm1341_vm0, %v7900_v0  ;;  %5969 = vmatpush3.msra.mxu0 %v1351_v1  ;;  %v1343_v3 = vld [vmem:[%s8337_s28] sm:$0xff]  ;;  %v1349_v4 = vld [vmem:[#allocation8 + $0x8] sm:$0xff]  ;;  %v1348_v5 = vld [vmem:[#allocation8] sm:$0xff]  ;;  %s9110_s5 = sld [smem:[#allocation53_spill]] }
 0x190   : > { %5970 = vmatprep.subr.mxu0 %v7900_v0  ;;  %1345 = vst.msk [vmem:[#allocation2] sm:$0xff] %vm1344_vm2, %v1343_v3  ;;  %v1863_v6 = vld [vmem:[#allocation31 + $0x38] sm:$0xff]  ;;  %v1862_v7 = vld [vmem:[#allocation31 + $0x30] sm:$0xff]  ;;  %v1861_v8 = vld [vmem:[#allocation31 + $0x28] sm:$0xff]  ;;  %p1328_p2 = scmp.lt.s32.totalorder %s8103_s18, 1  ;;  %s9111_s16 = sld [smem:[#allocation52_spill]] }
 0x191   : > { %5971 = vmatpush3.msra.mxu0 %v1350_v2  ;;  %6001 = vmatprep.subr.mxu1 %v1863_v6  ;;  %v1432_v9 = vld [vmem:[#allocation11 + $0x18] sm:$0xff]  ;;  %v1860_v11 = vld [vmem:[#allocation31 + $0x20] sm:$0xff]  ;;  %v1859_v13 = vld [vmem:[#allocation31 + $0x18] sm:$0xff]  ;;  %vm1864_vm3 = vcmask 523264   ;;  %s9112_s2 = sld [smem:[#allocation63_spill]]  ;;  %vm1338_vm4 = vcmask 516096  }
 0x192   : > { %5972 = vmatprep.subr.mxu0 %v7900_v0  ;;  %6002 = vmatpush3.msra.mxu1 %v1863_v6  ;;  %v1431_v12 = vld [vmem:[#allocation11 + $0x10] sm:$0xff]  ;;  %v1430_v14 = vld [vmem:[#allocation11 + $0x8] sm:$0xff]  ;;  %v1429_v15 = vld [vmem:[#allocation11] sm:$0xff]  ;;  %s1329_s6 = scalar_select %p1328_p2, %s8103_s18, 1  ;;  %1339 = vst.msk [vmem:[#allocation4] sm:$0x1] %vm1338_vm4, %v7900_v0 }
 0x193   : > { %5973 = vmatpush3.msra.mxu0 %v1349_v4  ;;  %6003 = vmatprep.subr.mxu1 %v1862_v7  ;;  %v1428_v17 = vld [vmem:[#allocation10 + $0x18] sm:$0xff]  ;;  %v1427_v18 = vld [vmem:[#allocation10 + $0x10] sm:$0xff]  ;;  %v1426_v19 = vld [vmem:[#allocation10 + $0x8] sm:$0xff]  ;;  %1340 = vst.msk [vmem:[#allocation4 + $0x11] sm:$0x1] %vm1338_vm4, %v7900_v0  ;;  %s9113_s27 = sld [smem:[#allocation66_spill]] }
 0x194   : > { %5974 = vmatprep.subr.mxu0 %v7900_v0  ;;  %6004 = vmatpush3.msra.mxu1 %v1862_v7  ;;  %v1425_v20 = vld [vmem:[#allocation10] sm:$0xff]  ;;  %v1857_v26 = vld [vmem:[#allocation31 + $0x8] sm:$0xff]  ;;  %v1856_v27 = vld [vmem:[#allocation31] sm:$0xff]  ;;  %s5515_s23 = sshll.u32 %s1329_s6, 4  ;;  %v7902_v7 = vmov 1966171168  }
 0x195   : > { %5975 = vmatpush3.msra.mxu0 %v1348_v5  ;;  %6005 = vmatprep.subr.mxu1 %v1861_v8  ;;  %s1335_s22 = scalar_lea.vmem %s9110_s5, %s1329_s6  ;;  %v1858_v25 = vld [vmem:[#allocation31 + $0x10] sm:$0xff]  ;;  %v2032_v31 = vld [vmem:[#allocation22 + $0x10] sm:$0xff]  ;;  %v2031_v32 = vld [vmem:[#allocation22 + $0x8] sm:$0xff]  ;;  %s9114_s25 = sld [smem:[#allocation67_spill]]  ;;  %vm2785_vm7 = vcmask 1041408   ;;  %vm2781_vm8 = vcmask 15360  }
 0x196   : > { %5979 = vmatprep.subr.mxu0 %v7900_v0  ;;  %6006 = vmatpush3.msra.mxu1 %v1861_v8  ;;  %v1832_v21 = vld [vmem:[%s1335_s22] sm:$0x1]  ;;  %s1332_s26 = scalar_lea.vmem %s9111_s16, %s5515_s23  ;;  %v2033_v30 = vld [vmem:[#allocation22 + $0x18] sm:$0xff]  ;;  %v2030_v34 = vld [vmem:[#allocation22] sm:$0xff]  ;;  %v1579_v8 = vunpack.c.l.s4 %v7902_v7  ;;  %s9115_s4 = sld [smem:[#allocation69_spill]] }
 0x197   : > { %v1346_v10 = vld [vmem:[#allocation2] sm:$0xff]  ;;  %6007 = vmatprep.subr.mxu1 %v1860_v11  ;;  %v5470_v22 = vmul.f32 -1.442695, %v1832_v21  ;;  %v1831_v29 = vld [vmem:[%s1332_s26 + $0x8] sm:$0xff]  ;;  %v1855_v36 = vld [vmem:[%s9112_s2 + $0x78] sm:$0xff]  ;;  %s9116_s28 = sld [smem:[#allocation70_spill]] }
 0x198   : > { %5977 = vmatmul.mubr.msk.f32.vlgmr.msra.gmra.mxu0 %vm1344_vm2, %v1346_v10  ;;  %6008 = vmatpush3.msra.mxu1 %v1860_v11  ;;  %v1347_v16 = vld [vmem:[#allocation2 + $0x1] sm:$0xff]  ;;  %2111 = vst.msk [vmem:[#allocation4 + $0x9] sm:$0xff] %vm1864_vm3, %v1831_v29  ;;  %v2148_v37 = vld [vmem:[#allocation14 + $0xf8] sm:$0xff]  ;;  %v1851_v43 = vld [vmem:[%s9112_s2 + $0x58] sm:$0xff]  ;;  %s9117_s5 = sld [smem:[#allocation71_spill]]  ;;  %s5463_s23 = sshll.u32 %s8333_s8, 4 }
 0x199   : > { %5980 = vmatpush3.msra.mxu0 %v1432_v9  ;;  %5987 = vmatprep.mubr.msk.f32.mxu0 %vm7901_vm1, %v7900_v0  ;;  %7162 = vpow2.f32 %v5470_v22  ;;  %v1830_v28 = vld [vmem:[%s1332_s26] sm:$0xff]  ;;  %v1854_v38 = vld [vmem:[%s9112_s2 + $0x70] sm:$0xff]  ;;  %v1853_v40 = vld [vmem:[%s9112_s2 + $0x68] sm:$0xff]  ;;  %v1581_v9 = vlaneseq  ;;  %s9118_s6 = sld [smem:[#allocation72_spill]]  ;;  %s5516_s26 = sshll.u32 %s8103_s18, 8 }
 0x19a   : > { %5981 = vmatprep.subr.mxu0 %v7900_v0  ;;  %6009 = vmatprep.subr.mxu1 %v1859_v13  ;;  %2110 = vst.msk [vmem:[#allocation4 + $0x1] sm:$0xff] %vm1864_vm3, %v1830_v28  ;;  %v2147_v39 = vld [vmem:[#allocation14 + $0xf0] sm:$0xff]  ;;  %v2146_v41 = vld [vmem:[#allocation14 + $0xe8] sm:$0xff]  ;;  %v2145_v44 = vld [vmem:[#allocation14 + $0xe0] sm:$0xff]  ;;  %s9119_s22 = sld [smem:[#allocation74_spill]]  ;;  %p9121_p13 = scmp.ne.s32.totalorder %s9085_s17, 0 }
 0x19b   : > { %5982 = vmatpush3.msra.mxu0 %v1431_v12  ;;  %6010 = vmatpush3.msra.mxu1 %v1859_v13  ;;  %v1852_v42 = vld [vmem:[%s9112_s2 + $0x60] sm:$0xff]  ;;  %v2144_v45 = vld [vmem:[#allocation14 + $0xd8] sm:$0xff]  ;;  %v2141_v51 = vld [vmem:[#allocation14 + $0xc0] sm:$0xff]  ;;  %v8451_v11 = vshrl.u32 %v1581_v9, 7  ;;  %s9120_s16 = sld [smem:[#allocation75_spill]]  ;;  %s7904_s18 = smov [#allocation38]  }
 0x19c   : > { %5983 = vmatprep.subr.mxu0 %v7900_v0  ;;  %6011 = vmatprep.subr.mxu1 %v1858_v25  ;;  %v1850_v46 = vld [vmem:[%s9112_s2 + $0x50] sm:$0xff]  ;;  %v2143_v47 = vld [vmem:[#allocation14 + $0xd0] sm:$0xff]  ;;  %v2142_v49 = vld [vmem:[#allocation14 + $0xc8] sm:$0xff] }
 0x19d   : > { %5984 = vmatpush3.msra.mxu0 %v1430_v14  ;;  %6012 = vmatpush3.msra.mxu1 %v1858_v25  ;;  %v1849_v48 = vld [vmem:[%s9112_s2 + $0x48] sm:$0xff]  ;;  %v1848_v50 = vld [vmem:[%s9112_s2 + $0x40] sm:$0xff]  ;;  %v1847_v52 = vld [vmem:[%s9112_s2 + $0x38] sm:$0xff] }
 0x19e   : > { %5985 = vmatprep.subr.mxu0 %v7900_v0  ;;  %6013 = vmatprep.subr.mxu1 %v1857_v26  ;;  %v2140_v53 = vld [vmem:[#allocation14 + $0xb8] sm:$0xff]  ;;  %v2139_v55 = vld [vmem:[#allocation14 + $0xb0] sm:$0xff]  ;;  %v2138_v57 = vld [vmem:[#allocation14 + $0xa8] sm:$0xff] }
 0x19f   : > { %5986 = vmatpush3.msra.mxu0 %v1429_v15  ;;  %6014 = vmatpush3.msra.mxu1 %v1857_v26  ;;  %v1846_v54 = vld [vmem:[%s9112_s2 + $0x30] sm:$0xff]  ;;  %v1845_v56 = vld [vmem:[%s9112_s2 + $0x28] sm:$0xff]  ;;  %v1844_v58 = vld [vmem:[%s9112_s2 + $0x20] sm:$0xff] }
 0x1a0   : > { %5988 = vmatmul.mubr.msk.f32.vlgmr.msra.gmra.mxu0 %vm1344_vm2, %v1347_v16  ;;  %5990 = vmatprep.subr.mxu0 %v7900_v0  ;;  %v2137_v59 = vld [vmem:[#allocation14 + $0xa0] sm:$0xff]  ;;  %v2136_v62 = vld [vmem:[#allocation14 + $0x98] sm:$0xff]  ;;  %v2135_v1 = vld [vmem:[#allocation14 + $0x90] sm:$0xff] }
 0x1a1   : > { %5991 = vmatpush3.msra.mxu0 %v1428_v17  ;;  %5998 = vmatprep.mubr.msk.f32.mxu0 %vm7901_vm1, %v7900_v0  ;;  %v1843_v60 = vld [vmem:[%s9112_s2 + $0x18] sm:$0xff]  ;;  %v1842_v61 = vld [vmem:[%s9112_s2 + $0x10] sm:$0xff]  ;;  %v1841_v63 = vld [vmem:[%s9112_s2 + $0x8] sm:$0xff] }
 0x1a2   : > { %5992 = vmatprep.subr.mxu0 %v7900_v0  ;;  %6015 = vmatprep.subr.mxu1 %v1856_v27  ;;  %v1840_v2 = vld [vmem:[%s9112_s2] sm:$0xff]  ;;  %v2133_v4 = vld [vmem:[#allocation14 + $0x80] sm:$0xff]  ;;  %v8443_v5 = vld [vmem:[#allocation14 + $0x78] sm:$0xff] }
 0x1a3   : > { %5993 = vmatpush3.msra.mxu0 %v1427_v18  ;;  %6016 = vmatpush3.msra.mxu1 %v1856_v27  ;;  %v2134_v3 = vld [vmem:[#allocation14 + $0x88] sm:$0xff]  ;;  %v8445_v6 = vld [vmem:[#allocation14 + $0x178] sm:$0xff] }
 0x1a4   : > { %5994 = vmatprep.subr.mxu0 %v7900_v0  ;;  %6017 = vmatprep.mubr.msk.f32.mxu1 %vm1864_vm3, %v1830_v28 }
 0x1a5   : > { %5995 = vmatpush3.msra.mxu0 %v1426_v19  ;;  %6055 = vmatprep.subr.mxu1 %v7900_v0 }
 0x1a6   : > { %5996 = vmatprep.subr.mxu0 %v7900_v0  ;;  %v7163_v23 = vpop.eup %7162  ;;  %6018 = vmatmul.mubr.msk.f32.vlgmr.msra.gmra.mxu1 %vm1864_vm3, %v1831_v29 }
 0x1a7   : > { %5997 = vmatpush3.msra.mxu0 %v1425_v20  ;;  %v1836_v24 = vadd.f32 1.0, %v7163_v23  ;;  %6056 = vmatpush3.msra.mxu1 %v2033_v30  ;;  %v7903_v23 = vmov 1983009808  }
 0x1a8   : > { %5999 = vmatmul.mubr.msk.f32.vlgmr.msra.gmra.mxu0 %vm1344_vm2, %v1346_v10  ;;  %6063 = vmatprep.mubr.msk.f32.mxu1 %vm7901_vm1, %v7900_v0  ;;  %v1580_v10 = vunpack.c.0.s8 %v1579_v8 }
 0x1a9   : > { %7164 = vrcp.f32 %v1836_v24  ;;  %6057 = vmatprep.subr.mxu1 %v7900_v0  ;;  %6020 = vmatprep.subr.mxu0 %v1855_v36  ;;  %v1750_v24 = vunpack.c.l.s4 %v7903_v23 }
 0x1aa   : > { %6058 = vmatpush3.msra.mxu1 %v2032_v31  ;;  %6021 = vmatpush3.msra.mxu0 %v1855_v36  ;;  %v1583_v13 = vsub.s32 %v1580_v10, %v8451_v11 }
 0x1ab   : > { %6059 = vmatprep.subr.mxu1 %v7900_v0  ;;  %6022 = vmatprep.subr.mxu0 %v1854_v38  ;;  %v1751_v29 = vunpack.c.0.s8 %v1750_v24 }
 0x1ac   : > { %6060 = vmatpush3.msra.mxu1 %v2031_v32  ;;  %6023 = vmatpush3.msra.mxu0 %v1854_v38 }
 0x1ad   : > { %6061 = vmatprep.subr.mxu1 %v7900_v0  ;;  %6024 = vmatprep.subr.mxu0 %v1853_v40 }
 0x1ae   : > { %6062 = vmatpush3.msra.mxu1 %v2030_v34  ;;  %6025 = vmatpush3.msra.mxu0 %v1853_v40  ;;  %v8455_v34 = vsub.s32 0, %v8451_v11 }
 0x1af   : > { %6066 = vmatprep.subr.mxu1 %v2148_v37  ;;  %6026 = vmatprep.subr.mxu0 %v1852_v42 }
 0x1b0   : > { %6027 = vmatpush3.msra.mxu0 %v1852_v42 }
 0x1b1   : > { %6028 = vmatprep.subr.mxu0 %v1851_v43 }
 0x1b2   : > { %6029 = vmatpush3.msra.mxu0 %v1851_v43 }
 0x1b3   : > { %6030 = vmatprep.subr.mxu0 %v1850_v46 }
 0x1b4   : > { %6031 = vmatpush3.msra.mxu0 %v1850_v46 }
 0x1b5   : > { %6032 = vmatprep.subr.mxu0 %v1849_v48 }
 0x1b6   : > { %v7165_v33 = vpop.eup %7164  ;;  %6033 = vmatpush3.msra.mxu0 %v1849_v48 }
 0x1b7   : > { %v8422_v35 = vmul.f32 %v7165_v33, %v1832_v21  ;;  %6034 = vmatprep.subr.mxu0 %v1848_v50 }
 0x1b8   : > { %6035 = vmatpush3.msra.mxu0 %v1848_v50 }
 0x1b9   : > { %6064 = vmatmul.mubr.msk.f32.vlgmr.msra.gmra.mxu1 %vm1344_vm2, %v8422_v35  ;;  %6036 = vmatprep.subr.mxu0 %v1847_v52 }
 0x1ba   : > { %6067 = vmatpush3.msra.mxu1 %v2148_v37  ;;  %6037 = vmatpush3.msra.mxu0 %v1847_v52 }
 0x1bb   : > { %6068 = vmatprep.subr.mxu1 %v2147_v39  ;;  %6038 = vmatprep.subr.mxu0 %v1846_v54 }
 0x1bc   : > { %6069 = vmatpush3.msra.mxu1 %v2147_v39  ;;  %6039 = vmatpush3.msra.mxu0 %v1846_v54 }
 0x1bd   : > { %6070 = vmatprep.subr.mxu1 %v2146_v41  ;;  %6040 = vmatprep.subr.mxu0 %v1845_v56 }
 0x1be   : > { %6071 = vmatpush3.msra.mxu1 %v2146_v41  ;;  %6041 = vmatpush3.msra.mxu0 %v1845_v56  ;;  %v1754_v41 = vsub.s32 %v1751_v29, %v8451_v11 }
 0x1bf   : > { %6072 = vmatprep.subr.mxu1 %v2145_v44  ;;  %6042 = vmatprep.subr.mxu0 %v1844_v58 }
 0x1c0   : > { %6073 = vmatpush3.msra.mxu1 %v2145_v44  ;;  %6043 = vmatpush3.msra.mxu0 %v1844_v58 }
 0x1c1   : > { %6074 = vmatprep.subr.mxu1 %v2144_v45  ;;  %6044 = vmatprep.subr.mxu0 %v1843_v60 }
 0x1c2   : > { %6075 = vmatpush3.msra.mxu1 %v2144_v45  ;;  %6045 = vmatpush3.msra.mxu0 %v1843_v60  ;;  %v1742_v45 = vadd.s32 8, %v8451_v11 }
 0x1c3   : > { %6076 = vmatprep.subr.mxu1 %v2143_v47  ;;  %6046 = vmatprep.subr.mxu0 %v1842_v61 }
 0x1c4   : > { %6077 = vmatpush3.msra.mxu1 %v2143_v47  ;;  %6047 = vmatpush3.msra.mxu0 %v1842_v61 }
 0x1c5   : > { %6078 = vmatprep.subr.mxu1 %v2142_v49  ;;  %6048 = vmatprep.subr.mxu0 %v1841_v63 }
 0x1c6   : > { %6079 = vmatpush3.msra.mxu1 %v2142_v49  ;;  %6049 = vmatpush3.msra.mxu0 %v1841_v63 }
 0x1c7   : > { %6080 = vmatprep.subr.mxu1 %v2141_v51  ;;  %6050 = vmatprep.subr.mxu0 %v1840_v2 }
 0x1c8   : > { %6081 = vmatpush3.msra.mxu1 %v2141_v51  ;;  %6051 = vmatpush3.msra.mxu0 %v1840_v2 }
 0x1c9   : > { %6082 = vmatprep.subr.mxu1 %v2140_v53  ;;  %6101 = vmatprep.subr.mxu0 %v8443_v5 }
 0x1ca   : > { %6083 = vmatpush3.msra.mxu1 %v2140_v53 }
 0x1cb   : > { %6084 = vmatprep.subr.mxu1 %v2139_v55 }
 0x1cc   : > { %6085 = vmatpush3.msra.mxu1 %v2139_v55 }
 0x1cd   : > { %6086 = vmatprep.subr.mxu1 %v2138_v57 }
 0x1ce   : > { %6087 = vmatpush3.msra.mxu1 %v2138_v57 }
 0x1cf   : > { %6088 = vmatprep.subr.mxu1 %v2137_v59 }
 0x1d0   : > { %6089 = vmatpush3.msra.mxu1 %v2137_v59 }
 0x1d1   : > { %6090 = vmatprep.subr.mxu1 %v2136_v62 }
 0x1d2   : > { %6091 = vmatpush3.msra.mxu1 %v2136_v62 }
 0x1d3   : > { %6092 = vmatprep.subr.mxu1 %v2135_v1 }
 0x1d4   : > { %6093 = vmatpush3.msra.mxu1 %v2135_v1 }
 0x1d5   : > { %6094 = vmatprep.subr.mxu1 %v2134_v3 }
 0x1d6   : > { %6095 = vmatpush3.msra.mxu1 %v2134_v3 }
 0x1d7   : > { %6096 = vmatprep.subr.mxu1 %v2133_v4 }
 0x1d8   : > { %6097 = vmatpush3.msra.mxu1 %v2133_v4 }
 0x1d9   : > { %6136 = vmatprep.subr.mxu1 %v8445_v6 }
 0x258   : > { %v1421_v12 = vpop.f32.mrf.mxu0 }
 0x259   : > { %v1577_v14 = vcombine.high %v1421_v12, %v1421_v12  ;;  %v1584_v16 = vrot.slane %v1421_v12, %v1583_v13  ;;  %v1743_v12 = vand.u32 1, %v8451_v11  ;;  %v5469_v11 = vld [vmem:[#allocation13] ss:$0 sm:$0xff] }
 0x25a   : > { %v5978_v15 = vpop.f32.mrf.mxu0 }
 0x25b   : > { %v1591_v17 = vrot.slane %v1577_v14, %v1583_v13  ;;  %v1592_v18 = vcombine.high %v1584_v16, %v1584_v16  ;;  %v1600_v25 = vrot.slane %v1584_v16, %v1583_v13  ;;  %vm1745_vm5 = vcmp.eq.s32.totalorder %v1743_v12, 0  ;;  %v2413_v12 = vld [vmem:[#allocation16 + $0x68] sm:$0xff] }
 0x25d   : > { %v1593_v20 = vcombine.high %v1591_v17, %v1591_v17  ;;  %v1614_v22 = vrot.slane %v1592_v18, %v1583_v13  ;;  %v1607_v27 = vrot.slane %v1591_v17, %v1583_v13  ;;  %v1622_v32 = vcombine.high %v1600_v25, %v1600_v25 }
 0x25e   : > { %v1629_v46 = vrot.slane %v1600_v25, %v8455_v34 }
 0x25f   : > { %v1621_v26 = vrot.slane %v1593_v20, %v1583_v13  ;;  %v1624_v28 = vcombine.high %v1614_v22, %v1614_v22  ;;  %v1623_v39 = vcombine.high %v1607_v27, %v1607_v27  ;;  %v1633_v47 = vrot.slane %v1614_v22, %v8455_v34 }
 0x260   : > { %v1502_v19 = vpop.f32.mrf.mxu0  ;;  %v1637_v48 = vrot.slane %v1622_v32, %v8455_v34  ;;  %v1645_v54 = vrot.slane %v1607_v27, %v8455_v34 }
 0x261   : > { %v1625_v33 = vcombine.high %v1621_v26, %v1621_v26  ;;  %v1641_v40 = vrot.slane %v1624_v28, %v8455_v34  ;;  %v1649_v55 = vrot.slane %v1621_v26, %v8455_v34  ;;  %v1653_v56 = vrot.slane %v1623_v39, %v8455_v34  ;;  %v2127_v39 = vld [vmem:[#allocation14 + $0x68] sm:$0xff] }
 0x262   : > { %v5989_v21 = vpop.f32.mrf.mxu0  ;;  %v1747_v62 = vcombine.low %v1629_v46, %v1633_v47  ;;  %v2123_v46 = vld [vmem:[#allocation14 + $0x48] sm:$0xff]  ;;  %v2312_v47 = vld [vmem:[#allocation14 + $0x150] sm:$0xff] }
 0x263   : > { %v1657_v49 = vrot.slane %v1625_v33, %v8455_v34  ;;  %v1748_v57 = vcombine.low %v1637_v48, %v1641_v40  ;;  %v1764_v9 = vcombine.low %v1645_v54, %v1649_v55  ;;  %v2315_v40 = vld [vmem:[#allocation14 + $0x168] sm:$0xff]  ;;  %v2122_v48 = vld [vmem:[#allocation14 + $0x40] sm:$0xff]  ;;  %v2308_v55 = vld [vmem:[#allocation14 + $0x130] sm:$0xff] }
 0x264   : > { %v1755_v18 = vrot.slane %v1747_v62, %v1754_v41  ;;  %v2119_v54 = vld [vmem:[#allocation14 + $0x28] sm:$0xff] }
 0x265   : > { %v1765_v63 = vcombine.low %v1653_v56, %v1657_v49  ;;  %v1772_v24 = vrot.slane %v1764_v9, %v1754_v41  ;;  %v2311_v49 = vld [vmem:[#allocation14 + $0x148] sm:$0xff]  ;;  %v2118_v56 = vld [vmem:[#allocation14 + $0x20] sm:$0xff]  ;;  %v2414_v9 = vld [vmem:[#allocation16 + $0x70] sm:$0xff] }
 0x266   : > { %v2115_v62 = vld [vmem:[#allocation14 + $0x8] sm:$0xff] }
 0x267   : > { %v1779_v22 = vrot.slane %v1765_v63, %v1754_v41  ;;  %v2304_v63 = vld [vmem:[#allocation14 + $0x110] sm:$0xff] }
 0x268   : > { %v1572_v30 = vpop.f32.mrf.mxu0 }
 0x269   : > { %v1573_v31 = vadd.f32 %v1572_v30, %v1502_v19  ;;  %v1744_v19 = vand.u32 1, %v1742_v45  ;;  %v1780_v29 = vcombine.low %v1772_v24, %v1779_v22  ;;  %v2410_v22 = vld [vmem:[#allocation16 + $0x50] sm:$0xff]  ;;  %v2409_v24 = vld [vmem:[#allocation16 + $0x48] sm:$0xff] }
 0x26a   : > { %v6000_v36 = vpop.f32.mrf.mxu0 }
 0x26b   : > { %v1659_v37 = vcombine.high %v1573_v31, %v1573_v31  ;;  %v1666_v38 = vrot.slane %v1573_v31, %v1583_v13  ;;  %vm1746_vm6 = vcmp.eq.s32.totalorder %v1744_v19, 0  ;;  %v2587_v19 = vld [vmem:[#allocation16 + $0xb0] sm:$0xff] }
 0x26d   : > { %v1673_v42 = vrot.slane %v1659_v37, %v1583_v13  ;;  %v1674_v43 = vcombine.high %v1666_v38, %v1666_v38  ;;  %v1682_v44 = vrot.slane %v1666_v38, %v1583_v13  ;;  %v2128_v37 = vld [vmem:[#allocation14 + $0x70] sm:$0xff] }
 0x26e   : > { %v2316_v38 = vld [vmem:[#allocation14 + $0x170] sm:$0xff] }
 0x26f   : > { %v1675_v50 = vcombine.high %v1673_v42, %v1673_v42  ;;  %v1689_v51 = vrot.slane %v1673_v42, %v1583_v13  ;;  %v1696_v52 = vrot.slane %v1674_v43, %v1583_v13  ;;  %v1704_v53 = vcombine.high %v1682_v44, %v1682_v44  ;;  %v2314_v42 = vld [vmem:[#allocation14 + $0x160] sm:$0xff] }
 0x270   : > { %v1711_v1 = vrot.slane %v1682_v44, %v8455_v34  ;;  %v2125_v44 = vld [vmem:[#allocation14 + $0x58] sm:$0xff] }
 0x271   : > { %v1703_v58 = vrot.slane %v1675_v50, %v1583_v13  ;;  %v1705_v59 = vcombine.high %v1689_v51, %v1689_v51  ;;  %v1706_v60 = vcombine.high %v1696_v52, %v1696_v52  ;;  %v1715_v61 = vrot.slane %v1696_v52, %v8455_v34  ;;  %v2121_v50 = vld [vmem:[#allocation14 + $0x38] sm:$0xff]  ;;  %v2120_v52 = vld [vmem:[#allocation14 + $0x30] sm:$0xff] }
 0x272   : > { %v1719_v2 = vrot.slane %v1704_v53, %v8455_v34  ;;  %v1727_v7 = vrot.slane %v1689_v51, %v8455_v34  ;;  %v1762_v13 = vrot.slane %v1748_v57, %v1754_v41  ;;  %v2310_v51 = vld [vmem:[#allocation14 + $0x140] sm:$0xff]  ;;  %v2309_v53 = vld [vmem:[#allocation14 + $0x138] sm:$0xff]  ;;  %v2307_v57 = vld [vmem:[#allocation14 + $0x128] sm:$0xff] }
 0x273   : > { %v1707_v3 = vcombine.high %v1703_v58, %v1703_v58  ;;  %v1723_v4 = vrot.slane %v1706_v60, %v8455_v34  ;;  %v1731_v8 = vrot.slane %v1703_v58, %v8455_v34  ;;  %v1783_v10 = vcombine.low %v1711_v1, %v1715_v61  ;;  %v2117_v58 = vld [vmem:[#allocation14 + $0x18] sm:$0xff]  ;;  %v2116_v60 = vld [vmem:[#allocation14 + $0x10] sm:$0xff]  ;;  %v2114_v1 = vld [vmem:[#allocation14] sm:$0xff] }
 0x274   : > { %v1735_v14 = vrot.slane %v1705_v59, %v8455_v34  ;;  %v1763_v26 = vcombine.low %v1755_v18, %v1762_v13  ;;  %v2306_v59 = vld [vmem:[#allocation14 + $0x120] sm:$0xff]  ;;  %v2305_v61 = vld [vmem:[#allocation14 + $0x118] sm:$0xff] }
 0x275   : > { %v1739_v15 = vrot.slane %v1707_v3, %v8455_v34  ;;  %v1784_v16 = vcombine.low %v1719_v2, %v1723_v4  ;;  %v1800_v17 = vcombine.low %v1727_v7, %v1731_v8  ;;  %v1791_v20 = vrot.slane %v1783_v10, %v1754_v41  ;;  %v2303_v2 = vld [vmem:[#allocation14 + $0x108] sm:$0xff]  ;;  %v8478_v3 = vpop.f32.mrf.mxu1  ;;  %v2415_v4 = vld [vmem:[#allocation16 + $0x78] sm:$0xff]  ;;  %v2302_v7 = vld [vmem:[#allocation14 + $0x100] sm:$0xff] }
 0x276   : > { %v2405_v13 = vld [vmem:[#allocation4 + $0x1] sm:$0xff] }
 0x277   : > { %v1801_v21 = vcombine.low %v1735_v14, %v1739_v15  ;;  %v1798_v23 = vrot.slane %v1784_v16, %v1754_v41  ;;  %v1808_v25 = vrot.slane %v1800_v17, %v1754_v41  ;;  %v8480_v10 = vpop.f32.mrf.mxu1  ;;  %v2588_v16 = vld [vmem:[#allocation16 + $0xb8] sm:$0xff]  ;;  %v2412_v17 = vld [vmem:[#allocation16 + $0x60] sm:$0xff] }
 0x279   : > { %v1799_v27 = vcombine.low %v1791_v20, %v1798_v23  ;;  %v1815_v28 = vrot.slane %v1801_v21, %v1754_v41  ;;  %v2126_v41 = vld [vmem:[#allocation14 + $0x60] sm:$0xff]  ;;  %v8482_v14 = vpop.f32.mrf.mxu1  ;;  %v2411_v20 = vld [vmem:[#allocation16 + $0x58] sm:$0xff]  ;;  %v2586_v21 = vld [vmem:[#allocation16 + $0xa8] sm:$0xff] }
 0x27a   : > { %v2585_v23 = vld [vmem:[#allocation16 + $0xa0] sm:$0xff] }
 0x27b   : > { %v1816_v30 = vcombine.low %v1808_v25, %v1815_v28  ;;  %v1819_v31 = vsel %vm1745_vm5, %v1763_v26, %v1799_v27  ;;  %v6065_v18 = vpop.f32.mrf.mxu1  ;;  %v2584_v25 = vld [vmem:[#allocation16 + $0x98] sm:$0xff]  ;;  %v2408_v26 = vld [vmem:[#allocation16 + $0x40] sm:$0xff]  ;;  %v2583_v27 = vld [vmem:[#allocation16 + $0x90] sm:$0xff] }
 0x27c   : > { %v1828_v32 = vadd.f32 %v5469_v11, %v1819_v31  ;;  %v2406_v28 = vld [vmem:[#allocation4 + $0x9] sm:$0xff]  ;;  %v2402_v31 = vld [vmem:[#allocation16 + $0x28] sm:$0xff] }
 0x27d   : > { %v1820_v33 = vsel %vm1746_vm6, %v1780_v29, %v1816_v30  ;;  %v2403_v29 = vld [vmem:[#allocation16 + $0x30] sm:$0xff]  ;;  %v2582_v30 = vld [vmem:[#allocation16 + $0x88] sm:$0xff] }
 0x27e   : > { %v1829_v36 = vadd.f32 %v5469_v11, %v1820_v33  ;;  %6052 = vmatprep.mubr.f32.mxu0 %v1828_v32  ;;  %2108 = vst [vmem:[#allocation3 + $0x1] sm:$0xff] %v1828_v32  ;;  %6098 = vmatprep.mubr.f32.mxu1 %v1828_v32  ;;  %v2404_v11 = vld [vmem:[#allocation16 + $0x38] sm:$0xff]  ;;  %v2581_v32 = vld [vmem:[#allocation16 + $0x80] sm:$0xff] }
 0x27f   : > { %v2395_v33 = vld [vmem:[#allocation4] sm:$0xff] }
 0x280   : > { %2109 = vst [vmem:[#allocation3 + $0x9] sm:$0xff] %v1829_v36  ;;  %6053 = vmatmul.mubr.f32.vlgmr.msra.gmra.mxu0 %v1829_v36  ;;  %6099 = vmatmul.mubr.f32.vlgmr.msra.gmra.mxu1 %v1829_v36  ;;  %v2401_v36 = vld [vmem:[#allocation16 + $0x20] sm:$0xff] }
 0x281   : > { %6102 = vmatpush3.msra.mxu0 %v8443_v5  ;;  %6137 = vmatpush3.msra.mxu1 %v8445_v6  ;;  %v2124_v5 = vld [vmem:[#allocation14 + $0x50] sm:$0xff]  ;;  %v2313_v6 = vld [vmem:[#allocation14 + $0x158] sm:$0xff] }
 0x282   : > { %6103 = vmatprep.subr.mxu0 %v2128_v37  ;;  %6138 = vmatprep.subr.mxu1 %v2316_v38 }
 0x283   : > { %6104 = vmatpush3.msra.mxu0 %v2128_v37  ;;  %6139 = vmatpush3.msra.mxu1 %v2316_v38  ;;  %v2578_v37 = vld [vmem:[#allocation4 + $0x2] sm:$0xff] }
 0x284   : > { %6105 = vmatprep.subr.mxu0 %v2127_v39  ;;  %6140 = vmatprep.subr.mxu1 %v2315_v40  ;;  %v2400_v38 = vld [vmem:[#allocation16 + $0x18] sm:$0xff] }
 0x285   : > { %6106 = vmatpush3.msra.mxu0 %v2127_v39  ;;  %v2112_v43 = vld [vmem:[#allocation3] sm:$0xff]  ;;  %6141 = vmatpush3.msra.mxu1 %v2315_v40  ;;  %v2399_v40 = vld [vmem:[#allocation16 + $0x10] sm:$0xff] }
 0x286   : > { %6107 = vmatprep.subr.mxu0 %v2126_v41  ;;  %6133 = vmatprep.mubr.f32.mxu0 %v2112_v43  ;;  %v2579_v39 = vld [vmem:[#allocation4 + $0xa] sm:$0xff] }
 0x287   : > { %6108 = vmatpush3.msra.mxu0 %v2126_v41  ;;  %v2299_v45 = vld [vmem:[#allocation3 + $0x2] sm:$0xff]  ;;  %6142 = vmatprep.subr.mxu1 %v2314_v42  ;;  %v2300_v15 = vld [vmem:[#allocation3 + $0xa] sm:$0xff] }
 0x288   : > { %6109 = vmatprep.subr.mxu0 %v2125_v44  ;;  %6168 = vmatprep.mubr.f32.mxu1 %v2299_v45  ;;  %v2113_v8 = vld [vmem:[#allocation3 + $0x8] sm:$0xff]  ;;  %v2396_v43 = vld [vmem:[#allocation4 + $0x8] sm:$0xff]  ;;  %v8505_v45 = vld [vmem:[%s9113_s27 + $0x68] sm:$0xff] }
 0x289   : > { %6110 = vmatpush3.msra.mxu0 %v2125_v44  ;;  %6143 = vmatpush3.msra.mxu1 %v2314_v42  ;;  %v2398_v41 = vld [vmem:[#allocation16 + $0x8] sm:$0xff]  ;;  %v2397_v42 = vld [vmem:[#allocation16] sm:$0xff] }
 0x28a   : > { %6111 = vmatprep.subr.mxu0 %v2124_v5  ;;  %6144 = vmatprep.subr.mxu1 %v2313_v6  ;;  %v8497_v44 = vld [vmem:[%s9113_s27 + $0x78] sm:$0xff] }
 0x28b   : > { %6112 = vmatpush3.msra.mxu0 %v2124_v5  ;;  %6145 = vmatpush3.msra.mxu1 %v2313_v6  ;;  %v8500_v5 = vld [vmem:[%s9113_s27 + $0x70] sm:$0xff]  ;;  %v8512_v6 = vld [vmem:[%s9113_s27 + $0x60] sm:$0xff] }
 0x28c   : > { %6113 = vmatprep.subr.mxu0 %v2123_v46  ;;  %6146 = vmatprep.subr.mxu1 %v2312_v47 }
 0x28d   : > { %6114 = vmatpush3.msra.mxu0 %v2123_v46  ;;  %6147 = vmatpush3.msra.mxu1 %v2312_v47  ;;  %v8517_v46 = vld [vmem:[%s9113_s27 + $0x58] sm:$0xff]  ;;  %v8522_v47 = vld [vmem:[%s9113_s27 + $0x50] sm:$0xff] }
 0x28e   : > { %6115 = vmatprep.subr.mxu0 %v2122_v48  ;;  %6148 = vmatprep.subr.mxu1 %v2311_v49 }
 0x28f   : > { %6116 = vmatpush3.msra.mxu0 %v2122_v48  ;;  %6149 = vmatpush3.msra.mxu1 %v2311_v49  ;;  %v8527_v48 = vld [vmem:[%s9113_s27 + $0x48] sm:$0xff]  ;;  %v8532_v49 = vld [vmem:[%s9113_s27 + $0x40] sm:$0xff] }
 0x290   : > { %6117 = vmatprep.subr.mxu0 %v2121_v50  ;;  %6150 = vmatprep.subr.mxu1 %v2310_v51 }
 0x291   : > { %6118 = vmatpush3.msra.mxu0 %v2121_v50  ;;  %6151 = vmatpush3.msra.mxu1 %v2310_v51  ;;  %v8537_v50 = vld [vmem:[%s9113_s27 + $0x38] sm:$0xff]  ;;  %v8542_v51 = vld [vmem:[%s9113_s27 + $0x30] sm:$0xff] }
 0x292   : > { %6119 = vmatprep.subr.mxu0 %v2120_v52  ;;  %6152 = vmatprep.subr.mxu1 %v2309_v53 }
 0x293   : > { %6120 = vmatpush3.msra.mxu0 %v2120_v52  ;;  %6153 = vmatpush3.msra.mxu1 %v2309_v53  ;;  %v8547_v52 = vld [vmem:[%s9113_s27 + $0x28] sm:$0xff]  ;;  %v8551_v53 = vld [vmem:[%s9113_s27 + $0x20] sm:$0xff] }
 0x294   : > { %6121 = vmatprep.subr.mxu0 %v2119_v54  ;;  %6154 = vmatprep.subr.mxu1 %v2308_v55 }
 0x295   : > { %6122 = vmatpush3.msra.mxu0 %v2119_v54  ;;  %6155 = vmatpush3.msra.mxu1 %v2308_v55  ;;  %v8555_v54 = vld [vmem:[%s9113_s27 + $0x18] sm:$0xff]  ;;  %v8560_v55 = vld [vmem:[%s9113_s27 + $0x10] sm:$0xff] }
 0x296   : > { %6123 = vmatprep.subr.mxu0 %v2118_v56  ;;  %6156 = vmatprep.subr.mxu1 %v2307_v57 }
 0x297   : > { %6124 = vmatpush3.msra.mxu0 %v2118_v56  ;;  %6157 = vmatpush3.msra.mxu1 %v2307_v57  ;;  %v8565_v56 = vld [vmem:[%s9113_s27 + $0x8] sm:$0xff]  ;;  %v8570_v57 = vld [vmem:[%s9113_s27] sm:$0xff] }
 0x298   : > { %6125 = vmatprep.subr.mxu0 %v2117_v58  ;;  %6158 = vmatprep.subr.mxu1 %v2306_v59 }
 0x299   : > { %6126 = vmatpush3.msra.mxu0 %v2117_v58  ;;  %6159 = vmatpush3.msra.mxu1 %v2306_v59  ;;  %v2701_v58 = vld [vmem:[%s9114_s25] sm:$0x3] }
 0x29a   : > { %6127 = vmatprep.subr.mxu0 %v2116_v60  ;;  %6160 = vmatprep.subr.mxu1 %v2305_v61 }
 0x29b   : > { %6128 = vmatpush3.msra.mxu0 %v2116_v60  ;;  %6161 = vmatpush3.msra.mxu1 %v2305_v61 }
 0x29c   : > { %6129 = vmatprep.subr.mxu0 %v2115_v62  ;;  %6162 = vmatprep.subr.mxu1 %v2304_v63 }
 0x29d   : > { %6130 = vmatpush3.msra.mxu0 %v2115_v62  ;;  %6163 = vmatpush3.msra.mxu1 %v2304_v63 }
 0x29e   : > { %6131 = vmatprep.subr.mxu0 %v2114_v1  ;;  %6164 = vmatprep.subr.mxu1 %v2303_v2 }
 0x29f   : > { %6132 = vmatpush3.msra.mxu0 %v2114_v1  ;;  %6165 = vmatpush3.msra.mxu1 %v2303_v2 }
 0x2a0   : > { %6134 = vmatmul.mubr.f32.vlgmr.msra.gmra.mxu0 %v2113_v8  ;;  %6171 = vmatprep.subr.mxu0 %v2415_v4 }
 0x2a1   : > { %6172 = vmatpush3.msra.mxu0 %v2415_v4  ;;  %6166 = vmatprep.subr.mxu1 %v2302_v7 }
 0x2a2   : > { %6173 = vmatprep.subr.mxu0 %v2414_v9  ;;  %6167 = vmatpush3.msra.mxu1 %v2302_v7 }
 0x2a3   : > { %6174 = vmatpush3.msra.mxu0 %v2414_v9  ;;  %6169 = vmatmul.mubr.f32.vlgmr.msra.gmra.mxu1 %v2300_v15 }
 0x2a4   : > { %6175 = vmatprep.subr.mxu0 %v2413_v12  ;;  %6187 = vmatprep.mubr.msk.f32.mxu0 %vm1864_vm3, %v2405_v13 }
 0x2a5   : > { %6176 = vmatpush3.msra.mxu0 %v2413_v12  ;;  %6209 = vmatprep.subr.mxu1 %v2588_v16 }
 0x2a6   : > { %6177 = vmatprep.subr.mxu0 %v2412_v17  ;;  %6210 = vmatpush3.msra.mxu1 %v2588_v16 }
 0x2a7   : > { %6178 = vmatpush3.msra.mxu0 %v2412_v17  ;;  %6211 = vmatprep.subr.mxu1 %v2587_v19 }
 0x2a8   : > { %6179 = vmatprep.subr.mxu0 %v2411_v20  ;;  %6212 = vmatpush3.msra.mxu1 %v2587_v19 }
 0x2a9   : > { %6180 = vmatpush3.msra.mxu0 %v2411_v20  ;;  %6213 = vmatprep.subr.mxu1 %v2586_v21 }
 0x2aa   : > { %6181 = vmatprep.subr.mxu0 %v2410_v22  ;;  %6214 = vmatpush3.msra.mxu1 %v2586_v21 }
 0x2ab   : > { %6182 = vmatpush3.msra.mxu0 %v2410_v22  ;;  %6215 = vmatprep.subr.mxu1 %v2585_v23 }
 0x2ac   : > { %6183 = vmatprep.subr.mxu0 %v2409_v24  ;;  %6216 = vmatpush3.msra.mxu1 %v2585_v23 }
 0x2ad   : > { %6184 = vmatpush3.msra.mxu0 %v2409_v24  ;;  %6217 = vmatprep.subr.mxu1 %v2584_v25 }
 0x2ae   : > { %6185 = vmatprep.subr.mxu0 %v2408_v26  ;;  %6218 = vmatpush3.msra.mxu1 %v2584_v25  ;;  %v5481_v25 = vld [vmem:[#allocation17] ss:$0 sm:$0xff] }
 0x2af   : > { %6186 = vmatpush3.msra.mxu0 %v2408_v26  ;;  %6219 = vmatprep.subr.mxu1 %v2583_v27 }
 0x2b0   : > { %6188 = vmatmul.mubr.msk.f32.vlgmr.msra.gmra.mxu0 %vm1864_vm3, %v2406_v28  ;;  %6190 = vmatprep.subr.mxu0 %v2404_v11 }
 0x2b1   : > { %6191 = vmatpush3.msra.mxu0 %v2404_v11  ;;  %6220 = vmatpush3.msra.mxu1 %v2583_v27 }
 0x2b2   : > { %6192 = vmatprep.subr.mxu0 %v2403_v29  ;;  %6221 = vmatprep.subr.mxu1 %v2582_v30 }
 0x2b3   : > { %6193 = vmatpush3.msra.mxu0 %v2403_v29  ;;  %6222 = vmatpush3.msra.mxu1 %v2582_v30 }
 0x2b4   : > { %6194 = vmatprep.subr.mxu0 %v2402_v31  ;;  %6223 = vmatprep.subr.mxu1 %v2581_v32 }
 0x2b5   : > { %6195 = vmatpush3.msra.mxu0 %v2402_v31  ;;  %6206 = vmatprep.mubr.msk.f32.mxu0 %vm1864_vm3, %v2395_v33 }
 0x2b6   : > { %6196 = vmatprep.subr.mxu0 %v2401_v36  ;;  %6224 = vmatpush3.msra.mxu1 %v2581_v32 }
 0x2b7   : > { %6197 = vmatpush3.msra.mxu0 %v2401_v36  ;;  %6225 = vmatprep.mubr.msk.f32.mxu1 %vm1864_vm3, %v2578_v37 }
 0x2b8   : > { %6198 = vmatprep.subr.mxu0 %v2400_v38  ;;  %6226 = vmatmul.mubr.msk.f32.vlgmr.msra.gmra.mxu1 %vm1864_vm3, %v2579_v39 }
 0x2b9   : > { %6199 = vmatpush3.msra.mxu0 %v2400_v38  ;;  %6263 = vmatprep.subr.mxu1 %v7900_v0 }
 0x2ba   : > { %6200 = vmatprep.subr.mxu0 %v2399_v40  ;;  %6265 = vmatprep.mubr.msk.f32.mxu1 %vm7901_vm1, %v7900_v0 }
 0x2bb   : > { %6201 = vmatpush3.msra.mxu0 %v2399_v40  ;;  %6264 = vmatpush3.msk.msra.mxu1 %vm2785_vm7, %v2701_v58 }
 0x2bc   : > { %6202 = vmatprep.subr.mxu0 %v2398_v41  ;;  %6268 = vmatprep.subr.mxu1 %v7900_v0 }
 0x2bd   : > { %6203 = vmatpush3.msra.mxu0 %v2398_v41 }
 0x2be   : > { %6204 = vmatprep.subr.mxu0 %v2397_v42 }
 0x2bf   : > { %6205 = vmatpush3.msra.mxu0 %v2397_v42 }
 0x2c0   : > { %6207 = vmatmul.mubr.msk.f32.vlgmr.msra.gmra.mxu0 %vm1864_vm3, %v2396_v43  ;;  %6228 = vmatprep.subr.mxu0 %v7900_v0 }
 0x2c1   : > { %6260 = vmatprep.mubr.msk.f32.mxu0 %vm7901_vm1, %v7900_v0  ;;  %6229 = vmatpush3.msra.mxu0 %v8497_v44 }
 0x2c2   : > { %6230 = vmatprep.subr.mxu0 %v7900_v0 }
 0x2c3   : > { %6231 = vmatpush3.msra.mxu0 %v8500_v5 }
 0x2c4   : > { %6232 = vmatprep.subr.mxu0 %v7900_v0 }
 0x2c5   : > { %6233 = vmatpush3.msra.mxu0 %v8505_v45 }
 0x2c6   : > { %6234 = vmatprep.subr.mxu0 %v7900_v0 }
 0x2c7   : > { %6235 = vmatpush3.msra.mxu0 %v8512_v6 }
 0x2c8   : > { %6236 = vmatprep.subr.mxu0 %v7900_v0 }
 0x2c9   : > { %6237 = vmatpush3.msra.mxu0 %v8517_v46 }
 0x2ca   : > { %6238 = vmatprep.subr.mxu0 %v7900_v0 }
 0x2cb   : > { %6239 = vmatpush3.msra.mxu0 %v8522_v47 }
 0x2cc   : > { %6240 = vmatprep.subr.mxu0 %v7900_v0 }
 0x2cd   : > { %6241 = vmatpush3.msra.mxu0 %v8527_v48 }
 0x2ce   : > { %6242 = vmatprep.subr.mxu0 %v7900_v0 }
 0x2cf   : > { %6243 = vmatpush3.msra.mxu0 %v8532_v49 }
 0x2d0   : > { %6244 = vmatprep.subr.mxu0 %v7900_v0 }
 0x2d1   : > { %6245 = vmatpush3.msra.mxu0 %v8537_v50 }
 0x2d2   : > { %6246 = vmatprep.subr.mxu0 %v7900_v0 }
 0x2d3   : > { %6247 = vmatpush3.msra.mxu0 %v8542_v51 }
 0x2d4   : > { %6248 = vmatprep.subr.mxu0 %v7900_v0 }
 0x2d5   : > { %6249 = vmatpush3.msra.mxu0 %v8547_v52 }
 0x2d6   : > { %6250 = vmatprep.subr.mxu0 %v7900_v0 }
 0x2d7   : > { %6251 = vmatpush3.msra.mxu0 %v8551_v53 }
 0x2d8   : > { %6252 = vmatprep.subr.mxu0 %v7900_v0 }
 0x2d9   : > { %6253 = vmatpush3.msra.mxu0 %v8555_v54 }
 0x2da   : > { %6254 = vmatprep.subr.mxu0 %v7900_v0 }
 0x2db   : > { %6255 = vmatpush3.msra.mxu0 %v8560_v55 }
 0x2dc   : > { %6256 = vmatprep.subr.mxu0 %v7900_v0 }
 0x2dd   : > { %6257 = vmatpush3.msra.mxu0 %v8565_v56 }
 0x2de   : > { %6258 = vmatprep.subr.mxu0 %v7900_v0 }
 0x2df   : > { %6259 = vmatpush3.msra.mxu0 %v8570_v57 }
 0x2e0   : > { %6303 = vmatprep.subr.mxu0 %v7900_v0 }
 0x340   : > { %v8579_v59 = vpop.f32.mrf.mxu0  ;;  %v6100_v61 = vpop.f32.mrf.mxu1 }
 0x342   : > { %v8581_v60 = vpop.f32.mrf.mxu0  ;;  %v2215_v63 = vpop.f32.mrf.mxu1 }
 0x360   : > { %v6135_v62 = vpop.f32.mrf.mxu0 }
 0x361   : > { %v2296_v9 = vadd.f32 %v6135_v62, %v6100_v61 }
 0x362   : > { %v2290_v1 = vpop.f32.mrf.mxu0 }
 0x363   : > { %v6170_v2 = vpop.f32.mrf.mxu1  ;;  %v2291_v15 = vadd.f32 %v2290_v1, %v2215_v63 }
 0x364   : > { %v2394_v18 = vadd.f32 %v6170_v2, %v2296_v9 }
 0x365   : > { %v2384_v7 = vpop.f32.mrf.mxu1 }
 0x366   : > { %v2393_v22 = vadd.f32 %v2384_v7, %v2291_v15 }
 0x370   : > { %v6189_v4 = vpop.f32.mrf.mxu0 }
 0x372   : > { %v2488_v8 = vpop.f32.mrf.mxu0 }
 0x378   : > { %v6227_v13 = vpop.f32.mrf.mxu1 }
 0x37a   : > { %v2661_v21 = vpop.f32.mrf.mxu1 }
 0x380   : > { %v6208_v12 = vpop.f32.mrf.mxu0 }
 0x381   : > { %v2575_v16 = vadd.f32 %v6208_v12, %v6189_v4 }
 0x382   : > { %v2569_v17 = vpop.f32.mrf.mxu0 }
 0x383   : > { %v2671_v19 = vadd.f32 %v6227_v13, %v2575_v16  ;;  %v2570_v20 = vadd.f32 %v2569_v17, %v2488_v8 }
 0x385   : > { %v2673_v23 = vadd.f32 %v2671_v19, %v2394_v18  ;;  %v2670_v24 = vadd.f32 %v2661_v21, %v2570_v20  ;;  %v3093_v18 = vld [vmem:[#allocation25 + $0xf8] sm:$0xff]  ;;  %v3092_v19 = vld [vmem:[#allocation25 + $0xf0] sm:$0xff]  ;;  %v3091_v20 = vld [vmem:[#allocation25 + $0xe8] sm:$0xff] }
 0x386   : > { %v3090_v21 = vld [vmem:[#allocation25 + $0xe0] sm:$0xff] }
 0x387   : > { %v2672_v26 = vadd.f32 %v2670_v24, %v2393_v22  ;;  %v2682_v27 = vadd.f32 %v5481_v25, %v2673_v23  ;;  %v3089_v22 = vld [vmem:[#allocation25 + $0xd8] sm:$0xff]  ;;  %v3088_v24 = vld [vmem:[#allocation25 + $0xd0] sm:$0xff] }
 0x388   : > { %v3074_v23 = vld [vmem:[#allocation25 + $0x78] sm:$0xff] }
 0x389   : > { %v2681_v28 = vadd.f32 %v5481_v25, %v2672_v26  ;;  %v3073_v25 = vld [vmem:[#allocation25 + $0x70] sm:$0xff]  ;;  %v3087_v26 = vld [vmem:[#allocation25 + $0xc8] sm:$0xff] }
 0x38b   : > { %v2702_v11 = vadd.f32 %v2682_v27, %v2681_v28 }
 0x38d   : > { %v2703_v29 = vrot.slane %v2702_v11, 4 }
 0x38f   : > { %v2704_v30 = vadd.f32 %v2703_v29, %v2702_v11  ;;  %v3071_v11 = vld [vmem:[#allocation25 + $0x60] sm:$0xff]  ;;  %v3085_v29 = vld [vmem:[#allocation25 + $0xb8] sm:$0xff] }
 0x391   : > { %v2705_v31 = vrot.slane %v2704_v30, 2 }
 0x393   : > { %v2706_v32 = vadd.f32 %v2705_v31, %v2704_v30  ;;  %v3070_v30 = vld [vmem:[#allocation25 + $0x58] sm:$0xff]  ;;  %v3084_v31 = vld [vmem:[#allocation25 + $0xb0] sm:$0xff] }
 0x395   : > { %v2707_v33 = vrot.slane %v2706_v32, 1 }
 0x397   : > { %v2708_v36 = vadd.f32 %v2707_v33, %v2706_v32  ;;  %v3069_v32 = vld [vmem:[#allocation25 + $0x50] sm:$0xff]  ;;  %v3083_v33 = vld [vmem:[#allocation25 + $0xa8] sm:$0xff] }
 0x399   : > { %6261 = vmatmul.mubr.f32.vlgmr.msra.gmra.mxu0 %v2708_v36  ;;  %v3068_v36 = vld [vmem:[#allocation25 + $0x48] sm:$0xff] }
 0x39a   : > { %6304 = vmatpush3.msk.msra.mxu0 %vm2785_vm7, %v2701_v58  ;;  %6305 = vmatprep.mubr.msk.f32.mxu0 %vm7901_vm1, %v7900_v0 }
 0x39b   : > { %6308 = vmatprep.subr.mxu0 %v3093_v18 }
 0x459   : > { %v2775_v37 = vpop.f32.mrf.mxu0 }
 0x45a   : > { %v2780_v38 = vmul.f32 0.0009765625, %v2775_v37  ;;  %v3082_v37 = vld [vmem:[#allocation25 + $0xa0] sm:$0xff] }
 0x45b   : > { %v6262_v39 = vpop.f32.mrf.mxu0 }
 0x45c   : > { %6266 = vmatmul.mubr.msk.f32.vlgmr.msra.gmra.mxu1 %vm2781_vm8, %v2780_v38  ;;  %v3067_v38 = vld [vmem:[#allocation25 + $0x40] sm:$0xff]  ;;  %v3081_v39 = vld [vmem:[#allocation25 + $0x98] sm:$0xff] }
 0x45d   : > { %6269 = vmatpush3.msra.mxu1 %v8497_v44  ;;  %6300 = vmatprep.mubr.msk.f32.mxu1 %vm7901_vm1, %v7900_v0 }
 0x45e   : > { %6270 = vmatprep.subr.mxu1 %v7900_v0 }
 0x45f   : > { %6271 = vmatpush3.msra.mxu1 %v8500_v5 }
 0x460   : > { %6272 = vmatprep.subr.mxu1 %v7900_v0 }
 0x461   : > { %6273 = vmatpush3.msra.mxu1 %v8505_v45 }
 0x462   : > { %6274 = vmatprep.subr.mxu1 %v7900_v0 }
 0x463   : > { %6275 = vmatpush3.msra.mxu1 %v8512_v6 }
 0x464   : > { %6276 = vmatprep.subr.mxu1 %v7900_v0 }
 0x465   : > { %6277 = vmatpush3.msra.mxu1 %v8517_v46 }
 0x466   : > { %6278 = vmatprep.subr.mxu1 %v7900_v0 }
 0x467   : > { %6279 = vmatpush3.msra.mxu1 %v8522_v47 }
 0x468   : > { %6280 = vmatprep.subr.mxu1 %v7900_v0 }
 0x469   : > { %6281 = vmatpush3.msra.mxu1 %v8527_v48 }
 0x46a   : > { %6282 = vmatprep.subr.mxu1 %v7900_v0 }
 0x46b   : > { %6283 = vmatpush3.msra.mxu1 %v8532_v49 }
 0x46c   : > { %6284 = vmatprep.subr.mxu1 %v7900_v0 }
 0x46d   : > { %6285 = vmatpush3.msra.mxu1 %v8537_v50 }
 0x46e   : > { %6286 = vmatprep.subr.mxu1 %v7900_v0 }
 0x46f   : > { %6287 = vmatpush3.msra.mxu1 %v8542_v51 }
 0x470   : > { %6288 = vmatprep.subr.mxu1 %v7900_v0 }
 0x471   : > { %6289 = vmatpush3.msra.mxu1 %v8547_v52 }
 0x472   : > { %6290 = vmatprep.subr.mxu1 %v7900_v0 }
 0x473   : > { %6291 = vmatpush3.msra.mxu1 %v8551_v53 }
 0x474   : > { %6292 = vmatprep.subr.mxu1 %v7900_v0 }
 0x475   : > { %6293 = vmatpush3.msra.mxu1 %v8555_v54 }
 0x476   : > { %6294 = vmatprep.subr.mxu1 %v7900_v0 }
 0x477   : > { %6295 = vmatpush3.msra.mxu1 %v8560_v55 }
 0x478   : > { %6296 = vmatprep.subr.mxu1 %v7900_v0 }
 0x479   : > { %6297 = vmatpush3.msra.mxu1 %v8565_v56 }
 0x47a   : > { %6298 = vmatprep.subr.mxu1 %v7900_v0 }
 0x47b   : > { %6299 = vmatpush3.msra.mxu1 %v8570_v57 }
 0x47c   : > { %6343 = vmatprep.subr.mxu1 %v3074_v23 }
 0x51c   : > { %v2855_v40 = vpop.f32.mrf.mxu1 }
 0x51d   : > { %v2862_v41 = vrot.slane %v2855_v40, %v8455_v34  ;;  %v3066_v40 = vld [vmem:[#allocation25 + $0x38] sm:$0xff] }
 0x51e   : > { %v6267_v42 = vpop.f32.mrf.mxu1 }
 0x51f   : > { %v8621_v43 = vsub.f32 %v2681_v28, %v2862_v41  ;;  %v8623_v58 = vsub.f32 %v2682_v27, %v2862_v41  ;;  %v3072_v27 = vld [vmem:[#allocation25 + $0x68] sm:$0xff]  ;;  %v3086_v28 = vld [vmem:[#allocation25 + $0xc0] sm:$0xff]  ;;  %v3080_v41 = vld [vmem:[#allocation25 + $0x90] sm:$0xff] }
 0x520   : > { %v3065_v42 = vld [vmem:[#allocation25 + $0x30] sm:$0xff] }
 0x521   : > { %v2865_v61 = vmul.f32 %v8621_v43, %v8621_v43  ;;  %v2866_v62 = vmul.f32 %v8623_v58, %v8623_v58 }
 0x523   : > { %v2867_v63 = vadd.f32 %v2866_v62, %v2865_v61  ;;  %v3079_v61 = vld [vmem:[#allocation25 + $0x88] sm:$0xff] }
 0x524   : > { %v3064_v62 = vld [vmem:[#allocation25 + $0x28] sm:$0xff] }
 0x525   : > { %v2868_v1 = vrot.slane %v2867_v63, 4 }
 0x527   : > { %v2869_v2 = vadd.f32 %v2868_v1, %v2867_v63  ;;  %v3078_v63 = vld [vmem:[#allocation25 + $0x80] sm:$0xff] }
 0x528   : > { %v3063_v1 = vld [vmem:[#allocation25 + $0x20] sm:$0xff] }
 0x529   : > { %v2870_v4 = vrot.slane %v2869_v2, 2 }
 0x52b   : > { %v2871_v7 = vadd.f32 %v2870_v4, %v2869_v2  ;;  %v3062_v2 = vld [vmem:[#allocation25 + $0x18] sm:$0xff] }
 0x52c   : > { %v3262_v4 = vld [vmem:[#allocation25 + $0x178] sm:$0xff] }
 0x52d   : > { %v2872_v8 = vrot.slane %v2871_v7, 1 }
 0x52f   : > { %v2873_v9 = vadd.f32 %v2872_v8, %v2871_v7  ;;  %v3061_v7 = vld [vmem:[#allocation25 + $0x10] sm:$0xff]  ;;  %v3060_v8 = vld [vmem:[#allocation25 + $0x8] sm:$0xff] }
 0x531   : > { %6301 = vmatmul.mubr.f32.vlgmr.msra.gmra.mxu1 %v2873_v9  ;;  %v3059_v9 = vld [vmem:[#allocation25] sm:$0xff] }
 0x532   : > { %6344 = vmatpush3.msra.mxu1 %v3074_v23 }
 0x533   : > { %6345 = vmatprep.subr.mxu1 %v3073_v25 }
 0x534   : > { %6346 = vmatpush3.msra.mxu1 %v3073_v25 }
 0x535   : > { %6347 = vmatprep.subr.mxu1 %v3072_v27 }
 0x536   : > { %6348 = vmatpush3.msra.mxu1 %v3072_v27 }
 0x537   : > { %6349 = vmatprep.subr.mxu1 %v3071_v11 }
 0x538   : > { %6350 = vmatpush3.msra.mxu1 %v3071_v11  ;;  %v2034_v11 = vld [vmem:[#allocation23] sm:$0x1] }
 0x539   : > { %6351 = vmatprep.subr.mxu1 %v3070_v30 }
 0x53a   : > { %6352 = vmatpush3.msra.mxu1 %v3070_v30 }
 0x53b   : > { %6353 = vmatprep.subr.mxu1 %v3069_v32 }
 0x53c   : > { %6354 = vmatpush3.msra.mxu1 %v3069_v32 }
 0x53d   : > { %6355 = vmatprep.subr.mxu1 %v3068_v36 }
 0x53e   : > { %6356 = vmatpush3.msra.mxu1 %v3068_v36 }
 0x53f   : > { %6357 = vmatprep.subr.mxu1 %v3067_v38 }
 0x540   : > { %6358 = vmatpush3.msra.mxu1 %v3067_v38  ;;  %v3260_v38 = vld [vmem:[#allocation25 + $0x168] sm:$0xff] }
 0x541   : > { %6359 = vmatprep.subr.mxu1 %v3066_v40 }
 0x542   : > { %6360 = vmatpush3.msra.mxu1 %v3066_v40  ;;  %v3258_v40 = vld [vmem:[#allocation25 + $0x158] sm:$0xff] }
 0x543   : > { %6361 = vmatprep.subr.mxu1 %v3065_v42 }
 0x544   : > { %6362 = vmatpush3.msra.mxu1 %v3065_v42 }
 0x545   : > { %6363 = vmatprep.subr.mxu1 %v3064_v62 }
 0x546   : > { %6364 = vmatpush3.msra.mxu1 %v3064_v62  ;;  %v3256_v62 = vld [vmem:[#allocation25 + $0x148] sm:$0xff] }
 0x547   : > { %6365 = vmatprep.subr.mxu1 %v3063_v1 }
 0x548   : > { %6366 = vmatpush3.msra.mxu1 %v3063_v1  ;;  %v3254_v1 = vld [vmem:[#allocation25 + $0x138] sm:$0xff] }
 0x549   : > { %6367 = vmatprep.subr.mxu1 %v3062_v2 }
 0x54a   : > { %6368 = vmatpush3.msra.mxu1 %v3062_v2  ;;  %v3253_v2 = vld [vmem:[#allocation25 + $0x130] sm:$0xff] }
 0x54b   : > { %6369 = vmatprep.subr.mxu1 %v3061_v7 }
 0x54c   : > { %6370 = vmatpush3.msra.mxu1 %v3061_v7  ;;  %v3251_v7 = vld [vmem:[#allocation25 + $0x120] sm:$0xff] }
 0x54d   : > { %6371 = vmatprep.subr.mxu1 %v3060_v8 }
 0x54e   : > { %6372 = vmatpush3.msra.mxu1 %v3060_v8  ;;  %v3250_v8 = vld [vmem:[#allocation25 + $0x118] sm:$0xff] }
 0x54f   : > { %6373 = vmatprep.subr.mxu1 %v3059_v9 }
 0x550   : > { %6374 = vmatpush3.msra.mxu1 %v3059_v9  ;;  %v3249_v9 = vld [vmem:[#allocation25 + $0x110] sm:$0xff] }
 0x551   : > { %6413 = vmatprep.subr.mxu1 %v7900_v0 }
 0x5f1   : > { %v2940_v12 = vpop.f32.mrf.mxu1 }
 0x5f2   : > { %v2944_v13 = vmul.f32 0.0009765625, %v2940_v12  ;;  %v2683_v12 = vld [vmem:[#allocation19] sm:$0x1] }
 0x5f3   : > { %v6302_v15 = vpop.f32.mrf.mxu1 }
 0x5f4   : > { %v2945_v16 = vadd.f32 1e-05, %v2944_v13 }
 0x5f6   : > { %7166 = vrsqrt.f32 %v2945_v16 }
 0x603   : > { %v7167_v17 = vpop.eup %7166 }
 0x604   : > { %6306 = vmatmul.mubr.msk.f32.vlgmr.msra.gmra.mxu0 %vm2781_vm8, %v7167_v17 }
 0x605   : > { %6309 = vmatpush3.msra.mxu0 %v3093_v18  ;;  %v5486_v18 = vld [vmem:[#allocation20] ss:$0 sm:$0xff] }
 0x606   : > { %6310 = vmatprep.subr.mxu0 %v3092_v19 }
 0x607   : > { %6311 = vmatpush3.msra.mxu0 %v3092_v19 }
 0x608   : > { %6312 = vmatprep.subr.mxu0 %v3091_v20 }
 0x609   : > { %6313 = vmatpush3.msra.mxu0 %v3091_v20 }
 0x60a   : > { %6314 = vmatprep.subr.mxu0 %v3090_v21 }
 0x60b   : > { %6315 = vmatpush3.msra.mxu0 %v3090_v21 }
 0x60c   : > { %6316 = vmatprep.subr.mxu0 %v3089_v22 }
 0x60d   : > { %6317 = vmatpush3.msra.mxu0 %v3089_v22 }
 0x60e   : > { %6318 = vmatprep.subr.mxu0 %v3088_v24 }
 0x60f   : > { %6319 = vmatpush3.msra.mxu0 %v3088_v24 }
 0x610   : > { %6320 = vmatprep.subr.mxu0 %v3087_v26 }
 0x611   : > { %6321 = vmatpush3.msra.mxu0 %v3087_v26 }
 0x612   : > { %6322 = vmatprep.subr.mxu0 %v3086_v28 }
 0x613   : > { %6323 = vmatpush3.msra.mxu0 %v3086_v28 }
 0x614   : > { %6324 = vmatprep.subr.mxu0 %v3085_v29 }
 0x615   : > { %6325 = vmatpush3.msra.mxu0 %v3085_v29  ;;  %v2105_v29 = vadd.f32 %v8482_v14, %v2034_v11 }
 0x616   : > { %6326 = vmatprep.subr.mxu0 %v3084_v31 }
 0x617   : > { %6327 = vmatpush3.msra.mxu0 %v3084_v31 }
 0x618   : > { %6328 = vmatprep.subr.mxu0 %v3083_v33 }
 0x619   : > { %6329 = vmatpush3.msra.mxu0 %v3083_v33 }
 0x61a   : > { %6330 = vmatprep.subr.mxu0 %v3082_v37 }
 0x61b   : > { %6331 = vmatpush3.msra.mxu0 %v3082_v37  ;;  %v3261_v37 = vld [vmem:[#allocation25 + $0x170] sm:$0xff] }
 0x61c   : > { %6332 = vmatprep.subr.mxu0 %v3081_v39 }
 0x61d   : > { %6333 = vmatpush3.msra.mxu0 %v3081_v39  ;;  %v3259_v39 = vld [vmem:[#allocation25 + $0x160] sm:$0xff] }
 0x61e   : > { %6334 = vmatprep.subr.mxu0 %v3080_v41 }
 0x61f   : > { %6335 = vmatpush3.msra.mxu0 %v3080_v41 }
 0x620   : > { %6336 = vmatprep.subr.mxu0 %v3079_v61 }
 0x621   : > { %6337 = vmatpush3.msra.mxu0 %v3079_v61  ;;  %v3257_v61 = vld [vmem:[#allocation25 + $0x150] sm:$0xff] }
 0x622   : > { %6338 = vmatprep.subr.mxu0 %v3078_v63 }
 0x623   : > { %6339 = vmatpush3.msra.mxu0 %v3078_v63  ;;  %v3255_v63 = vld [vmem:[#allocation25 + $0x140] sm:$0xff] }
 0x624   : > { %6378 = vmatprep.subr.mxu0 %v3262_v4 }
 0x6c4   : > { %v3016_v13 = vpop.f32.mrf.mxu0 }
 0x6c5   : > { %v3020_v15 = vmul.f32 %v3016_v13, %v2683_v12  ;;  %v3248_v12 = vld [vmem:[#allocation25 + $0x108] sm:$0xff]  ;;  %v3247_v13 = vld [vmem:[#allocation25 + $0x100] sm:$0xff] }
 0x6c6   : > { %v6307_v16 = vpop.f32.mrf.mxu0 }
 0x6c7   : > { %v3024_v17 = vrot.slane %v3020_v15, %v8455_v34  ;;  %v3367_v16 = vld [vmem:[%s9114_s25] sm:$0x3] }
 0x6c9   : > { %v3025_v19 = vmul.f32 %v3024_v17, %v8621_v43  ;;  %v3026_v20 = vmul.f32 %v3024_v17, %v8623_v58  ;;  %v3052_v43 = vrot.slane %v2105_v29, %v8455_v34 }
 0x6cb   : > { %v3033_v21 = vadd.f32 %v5486_v18, %v3025_v19  ;;  %v3034_v22 = vadd.f32 %v5486_v18, %v3026_v20 }
 0x6cd   : > { %v5487_v23 = vmul.f32 -1.442695, %v3033_v21  ;;  %v5488_v24 = vmul.f32 -1.442695, %v3034_v22 }
 0x6cf   : > { %7168 = vpow2.f32 %v5487_v23 }
 0x6d0   : > { %7170 = vpow2.f32 %v5488_v24 }
 0x6dc   : > { %v7169_v25 = vpop.eup %7168 }
 0x6dd   : > { %v7171_v26 = vpop.eup %7170  ;;  %v3041_v27 = vadd.f32 1.0, %v7169_v25  ;;  %v5489_v25 = vld [vmem:[#allocation26] ss:$0 sm:$0xff] }
 0x6de   : > { %v3042_v28 = vadd.f32 1.0, %v7171_v26 }
 0x6df   : > { %7172 = vrcp.f32 %v3041_v27 }
 0x6e0   : > { %7174 = vrcp.f32 %v3042_v28 }
 0x6ec   : > { %v7173_v30 = vpop.eup %7172 }
 0x6ed   : > { %v7175_v31 = vpop.eup %7174  ;;  %v3047_v58 = vmul.f32 %v7173_v30, %v3033_v21 }
 0x6ee   : > { %v3048_v32 = vmul.f32 %v7175_v31, %v3034_v22 }
 0x6ef   : > { %v3053_v33 = vadd.f32 %v3052_v43, %v3047_v58 }
 0x6f0   : > { %v3054_v36 = vadd.f32 %v3052_v43, %v3048_v32 }
 0x6f1   : > { %3055 = vst [vmem:[#allocation3 + $0x1] sm:$0xff] %v3053_v33  ;;  %6340 = vmatprep.mubr.f32.mxu0 %v3053_v33 }
 0x6f2   : > { %3056 = vst [vmem:[#allocation3 + $0x9] sm:$0xff] %v3054_v36  ;;  %6341 = vmatmul.mubr.f32.vlgmr.msra.gmra.mxu0 %v3054_v36 }
 0x6f3   : > { %6379 = vmatpush3.msra.mxu0 %v3262_v4  ;;  %v3252_v4 = vld [vmem:[#allocation25 + $0x128] sm:$0xff] }
 0x6f4   : > { %6380 = vmatprep.subr.mxu0 %v3261_v37 }
 0x6f5   : > { %6381 = vmatpush3.msra.mxu0 %v3261_v37  ;;  %v3794_v37 = vld [vmem:[#allocation34 + $0x78] sm:$0xff] }
 0x6f6   : > { %6382 = vmatprep.subr.mxu0 %v3260_v38 }
 0x6f7   : > { %6383 = vmatpush3.msra.mxu0 %v3260_v38  ;;  %v3793_v38 = vld [vmem:[#allocation34 + $0x70] sm:$0xff] }
 0x6f8   : > { %v3057_v14 = vld [vmem:[#allocation3] sm:$0xff]  ;;  %6384 = vmatprep.subr.mxu0 %v3259_v39 }
 0x6f9   : > { %6375 = vmatprep.mubr.f32.mxu1 %v3057_v14  ;;  %v3058_v41 = vld [vmem:[#allocation3 + $0x8] sm:$0xff]  ;;  %6385 = vmatpush3.msra.mxu0 %v3259_v39  ;;  %v3792_v39 = vld [vmem:[#allocation34 + $0x68] sm:$0xff]  ;;  %v3791_v14 = vld [vmem:[#allocation34 + $0x60] sm:$0xff] }
 0x6fa   : > { %v3244_v42 = vld [vmem:[#allocation3 + $0x2] sm:$0xff]  ;;  %6376 = vmatmul.mubr.f32.vlgmr.msra.gmra.mxu1 %v3058_v41  ;;  %6386 = vmatprep.subr.mxu0 %v3258_v40  ;;  %v3245_v15 = vld [vmem:[#allocation3 + $0xa] sm:$0xff] }
 0x6fb   : > { %6410 = vmatprep.mubr.f32.mxu0 %v3244_v42  ;;  %6414 = vmatpush3.msra.mxu1 %v8497_v44  ;;  %v3789_v41 = vld [vmem:[#allocation34 + $0x50] sm:$0xff] }
 0x6fc   : > { %6387 = vmatpush3.msra.mxu0 %v3258_v40  ;;  %6415 = vmatprep.subr.mxu1 %v7900_v0  ;;  %v3790_v40 = vld [vmem:[#allocation34 + $0x58] sm:$0xff] }
 0x6fd   : > { %6388 = vmatprep.subr.mxu0 %v3257_v61  ;;  %6416 = vmatpush3.msra.mxu1 %v8500_v5 }
 0x6fe   : > { %6389 = vmatpush3.msra.mxu0 %v3257_v61  ;;  %6417 = vmatprep.subr.mxu1 %v7900_v0 }
 0x6ff   : > { %6390 = vmatprep.subr.mxu0 %v3256_v62  ;;  %6418 = vmatpush3.msra.mxu1 %v8505_v45 }
 0x700   : > { %6391 = vmatpush3.msra.mxu0 %v3256_v62  ;;  %6419 = vmatprep.subr.mxu1 %v7900_v0 }
 0x701   : > { %6392 = vmatprep.subr.mxu0 %v3255_v63  ;;  %6420 = vmatpush3.msra.mxu1 %v8512_v6 }
 0x702   : > { %6393 = vmatpush3.msra.mxu0 %v3255_v63  ;;  %6421 = vmatprep.subr.mxu1 %v7900_v0 }
 0x703   : > { %6394 = vmatprep.subr.mxu0 %v3254_v1  ;;  %6422 = vmatpush3.msra.mxu1 %v8517_v46 }
 0x704   : > { %6395 = vmatpush3.msra.mxu0 %v3254_v1  ;;  %6423 = vmatprep.subr.mxu1 %v7900_v0  ;;  %v3703_v1 = vld [vmem:[#allocation35 + $0x18] sm:$0xff] }
 0x705   : > { %6396 = vmatprep.subr.mxu0 %v3253_v2  ;;  %6424 = vmatpush3.msra.mxu1 %v8522_v47 }
 0x706   : > { %6397 = vmatpush3.msra.mxu0 %v3253_v2  ;;  %6425 = vmatprep.subr.mxu1 %v7900_v0 }
 0x707   : > { %6398 = vmatprep.subr.mxu0 %v3252_v4  ;;  %6426 = vmatpush3.msra.mxu1 %v8527_v48 }
 0x708   : > { %6399 = vmatpush3.msra.mxu0 %v3252_v4  ;;  %6427 = vmatprep.subr.mxu1 %v7900_v0  ;;  %v3702_v4 = vld [vmem:[#allocation35 + $0x10] sm:$0xff] }
 0x709   : > { %6400 = vmatprep.subr.mxu0 %v3251_v7  ;;  %6428 = vmatpush3.msra.mxu1 %v8532_v49 }
 0x70a   : > { %6401 = vmatpush3.msra.mxu0 %v3251_v7  ;;  %6429 = vmatprep.subr.mxu1 %v7900_v0  ;;  %v3701_v7 = vld [vmem:[#allocation35 + $0x8] sm:$0xff] }
 0x70b   : > { %6402 = vmatprep.subr.mxu0 %v3250_v8  ;;  %6430 = vmatpush3.msra.mxu1 %v8537_v50 }
 0x70c   : > { %6403 = vmatpush3.msra.mxu0 %v3250_v8  ;;  %6431 = vmatprep.subr.mxu1 %v7900_v0  ;;  %v3700_v8 = vld [vmem:[#allocation35] sm:$0xff] }
 0x70d   : > { %6404 = vmatprep.subr.mxu0 %v3249_v9  ;;  %6432 = vmatpush3.msra.mxu1 %v8542_v51 }
 0x70e   : > { %6405 = vmatpush3.msra.mxu0 %v3249_v9  ;;  %6433 = vmatprep.subr.mxu1 %v7900_v0  ;;  %v3813_v9 = vld [vmem:[#allocation34 + $0xf8] sm:$0xff] }
 0x70f   : > { %6406 = vmatprep.subr.mxu0 %v3248_v12  ;;  %6434 = vmatpush3.msra.mxu1 %v8547_v52 }
 0x710   : > { %6407 = vmatpush3.msra.mxu0 %v3248_v12  ;;  %6435 = vmatprep.subr.mxu1 %v7900_v0  ;;  %v3812_v12 = vld [vmem:[#allocation34 + $0xf0] sm:$0xff] }
 0x711   : > { %6408 = vmatprep.subr.mxu0 %v3247_v13  ;;  %6436 = vmatpush3.msra.mxu1 %v8551_v53 }
 0x712   : > { %6409 = vmatpush3.msra.mxu0 %v3247_v13  ;;  %6437 = vmatprep.subr.mxu1 %v7900_v0  ;;  %v3811_v13 = vld [vmem:[#allocation34 + $0xe8] sm:$0xff] }
 0x713   : > { %6411 = vmatmul.mubr.f32.vlgmr.msra.gmra.mxu0 %v3245_v15  ;;  %6438 = vmatpush3.msra.mxu1 %v8555_v54  ;;  %v3810_v15 = vld [vmem:[#allocation34 + $0xe0] sm:$0xff] }
 0x714   : > { %6439 = vmatprep.subr.mxu1 %v7900_v0  ;;  %6445 = vmatprep.mubr.msk.f32.mxu1 %vm7901_vm1, %v7900_v0 }
 0x715   : > { %6440 = vmatpush3.msra.mxu1 %v8560_v55  ;;  %6448 = vmatprep.subr.mxu0 %v7900_v0 }
 0x716   : > { %6441 = vmatprep.subr.mxu1 %v7900_v0  ;;  %6450 = vmatprep.mubr.msk.f32.mxu0 %vm7901_vm1, %v7900_v0 }
 0x717   : > { %6442 = vmatpush3.msra.mxu1 %v8565_v56  ;;  %6449 = vmatpush3.msk.msra.mxu0 %vm2785_vm7, %v3367_v16 }
 0x718   : > { %6443 = vmatprep.subr.mxu1 %v7900_v0  ;;  %6488 = vmatprep.subr.mxu0 %v7900_v0 }
 0x719   : > { %6444 = vmatpush3.msra.mxu1 %v8570_v57 }
 0x71a   : > { %6453 = vmatprep.subr.mxu1 %v7900_v0 }
 0x7b2   : > { %v6342_v17 = vpop.f32.mrf.mxu0 }
 0x7b4   : > { %v3160_v19 = vpop.f32.mrf.mxu0 }
 0x7ba   : > { %v6377_v18 = vpop.f32.mrf.mxu1 }
 0x7bb   : > { %v3241_v21 = vadd.f32 %v6377_v18, %v6342_v17  ;;  %v3808_v17 = vld [vmem:[#allocation34 + $0xd0] sm:$0xff]  ;;  %v3807_v18 = vld [vmem:[#allocation34 + $0xc8] sm:$0xff] }
 0x7bc   : > { %v3235_v20 = vpop.f32.mrf.mxu1 }
 0x7bd   : > { %v3236_v23 = vadd.f32 %v3235_v20, %v3160_v19  ;;  %v3805_v19 = vld [vmem:[#allocation34 + $0xb8] sm:$0xff]  ;;  %v3804_v20 = vld [vmem:[#allocation34 + $0xb0] sm:$0xff] }
 0x7d3   : > { %v6412_v22 = vpop.f32.mrf.mxu0 }
 0x7d4   : > { %v3339_v24 = vadd.f32 %v6412_v22, %v3241_v21  ;;  %v3803_v21 = vld [vmem:[#allocation34 + $0xa8] sm:$0xff] }
 0x7d5   : > { %v3329_v26 = vpop.f32.mrf.mxu0  ;;  %v3788_v22 = vld [vmem:[#allocation34 + $0x48] sm:$0xff] }
 0x7d6   : > { %v3338_v27 = vadd.f32 %v3329_v26, %v3236_v23  ;;  %v3348_v28 = vadd.f32 %v5489_v25, %v3339_v24  ;;  %v3802_v23 = vld [vmem:[#allocation34 + $0xa0] sm:$0xff]  ;;  %v3786_v26 = vld [vmem:[#allocation34 + $0x38] sm:$0xff] }
 0x7d7   : > { %v3787_v24 = vld [vmem:[#allocation34 + $0x40] sm:$0xff] }
 0x7d8   : > { %v3347_v11 = vadd.f32 %v5489_v25, %v3338_v27  ;;  %v3801_v25 = vld [vmem:[#allocation34 + $0x98] sm:$0xff]  ;;  %v3800_v27 = vld [vmem:[#allocation34 + $0x90] sm:$0xff] }
 0x7da   : > { %v3368_v29 = vadd.f32 %v3348_v28, %v3347_v11 }
 0x7dc   : > { %v3369_v30 = vrot.slane %v3368_v29, 4 }
 0x7de   : > { %v3370_v31 = vadd.f32 %v3369_v30, %v3368_v29  ;;  %v3784_v29 = vld [vmem:[#allocation34 + $0x28] sm:$0xff]  ;;  %v3798_v30 = vld [vmem:[#allocation34 + $0x80] sm:$0xff] }
 0x7e0   : > { %v3371_v43 = vrot.slane %v3370_v31, 2 }
 0x7e2   : > { %v3372_v58 = vadd.f32 %v3371_v43, %v3370_v31  ;;  %v3783_v31 = vld [vmem:[#allocation34 + $0x20] sm:$0xff]  ;;  %v3782_v43 = vld [vmem:[#allocation34 + $0x18] sm:$0xff] }
 0x7e4   : > { %v3373_v32 = vrot.slane %v3372_v58, 1 }
 0x7e6   : > { %v3374_v33 = vadd.f32 %v3373_v32, %v3372_v58  ;;  %v3781_v58 = vld [vmem:[#allocation34 + $0x10] sm:$0xff]  ;;  %v3982_v32 = vld [vmem:[#allocation34 + $0x178] sm:$0xff] }
 0x7e8   : > { %6446 = vmatmul.mubr.f32.vlgmr.msra.gmra.mxu1 %v3374_v33  ;;  %v3780_v33 = vld [vmem:[#allocation34 + $0x8] sm:$0xff] }
 0x7e9   : > { %6454 = vmatpush3.msra.mxu1 %v8497_v44  ;;  %6485 = vmatprep.mubr.msk.f32.mxu1 %vm7901_vm1, %v7900_v0 }
 0x7ea   : > { %6455 = vmatprep.subr.mxu1 %v7900_v0 }
 0x7eb   : > { %6456 = vmatpush3.msra.mxu1 %v8500_v5 }
 0x7ec   : > { %6457 = vmatprep.subr.mxu1 %v7900_v0 }
 0x7ed   : > { %6458 = vmatpush3.msra.mxu1 %v8505_v45 }
 0x7ee   : > { %6459 = vmatprep.subr.mxu1 %v7900_v0 }
 0x7ef   : > { %6460 = vmatpush3.msra.mxu1 %v8512_v6 }
 0x7f0   : > { %6461 = vmatprep.subr.mxu1 %v7900_v0 }
 0x7f1   : > { %6462 = vmatpush3.msra.mxu1 %v8517_v46 }
 0x7f2   : > { %6463 = vmatprep.subr.mxu1 %v7900_v0 }
 0x7f3   : > { %6464 = vmatpush3.msra.mxu1 %v8522_v47 }
 0x7f4   : > { %6465 = vmatprep.subr.mxu1 %v7900_v0 }
 0x7f5   : > { %6466 = vmatpush3.msra.mxu1 %v8527_v48 }
 0x7f6   : > { %6467 = vmatprep.subr.mxu1 %v7900_v0 }
 0x7f7   : > { %6468 = vmatpush3.msra.mxu1 %v8532_v49 }
 0x7f8   : > { %6469 = vmatprep.subr.mxu1 %v7900_v0 }
 0x7f9   : > { %6470 = vmatpush3.msra.mxu1 %v8537_v50 }
 0x7fa   : > { %6471 = vmatprep.subr.mxu1 %v7900_v0 }
 0x7fb   : > { %6472 = vmatpush3.msra.mxu1 %v8542_v51 }
 0x7fc   : > { %6473 = vmatprep.subr.mxu1 %v7900_v0 }
 0x7fd   : > { %6474 = vmatpush3.msra.mxu1 %v8547_v52 }
 0x7fe   : > { %6475 = vmatprep.subr.mxu1 %v7900_v0 }
 0x7ff   : > { %6476 = vmatpush3.msra.mxu1 %v8551_v53 }
 0x800   : > { %6477 = vmatprep.subr.mxu1 %v7900_v0 }
 0x801   : > { %6478 = vmatpush3.msra.mxu1 %v8555_v54 }
 0x802   : > { %6479 = vmatprep.subr.mxu1 %v7900_v0 }
 0x803   : > { %6480 = vmatpush3.msra.mxu1 %v8560_v55 }
 0x804   : > { %6481 = vmatprep.subr.mxu1 %v7900_v0 }
 0x805   : > { %6482 = vmatpush3.msra.mxu1 %v8565_v56 }
 0x806   : > { %6483 = vmatprep.subr.mxu1 %v7900_v0 }
 0x807   : > { %6484 = vmatpush3.msra.mxu1 %v8570_v57 }
 0x808   : > { %6539 = vmatprep.subr.mxu1 %v3794_v37 }
 0x8a8   : > { %v3441_v44 = vpop.f32.mrf.mxu1 }
 0x8a9   : > { %v3445_v5 = vmul.f32 0.0009765625, %v3441_v44  ;;  %v3779_v44 = vld [vmem:[#allocation34] sm:$0xff] }
 0x8aa   : > { %v6447_v45 = vpop.f32.mrf.mxu1 }
 0x8ab   : > { %6451 = vmatmul.mubr.msk.f32.vlgmr.msra.gmra.mxu0 %vm2781_vm8, %v3445_v5  ;;  %v3349_v5 = vld [vmem:[#allocation28] sm:$0x1] }
 0x8ac   : > { %6489 = vmatpush3.msk.msra.mxu0 %vm2785_vm7, %v3367_v16  ;;  %6490 = vmatprep.mubr.msk.f32.mxu0 %vm7901_vm1, %v7900_v0  ;;  %v3809_v16 = vld [vmem:[#allocation34 + $0xd8] sm:$0xff] }
 0x8ad   : > { %6493 = vmatprep.subr.mxu0 %v7900_v0 }
 0x96b   : > { %v3518_v6 = vpop.f32.mrf.mxu0 }
 0x96c   : > { %v3525_v46 = vrot.slane %v3518_v6, %v8455_v34 }
 0x96d   : > { %v6452_v47 = vpop.f32.mrf.mxu0 }
 0x96e   : > { %v8715_v48 = vsub.f32 %v3347_v11, %v3525_v46  ;;  %v8717_v49 = vsub.f32 %v3348_v28, %v3525_v46  ;;  %v3785_v28 = vld [vmem:[#allocation34 + $0x30] sm:$0xff]  ;;  %v3799_v11 = vld [vmem:[#allocation34 + $0x88] sm:$0xff]  ;;  %v2018_v47 = vadd.f32 %v8579_v59, %v8478_v3 }
 0x970   : > { %v3528_v50 = vmul.f32 %v8715_v48, %v8715_v48  ;;  %v3529_v51 = vmul.f32 %v8717_v49, %v8717_v49 }
 0x972   : > { %v3530_v52 = vadd.f32 %v3529_v51, %v3528_v50  ;;  %v2013_v50 = vadd.f32 %v8581_v60, %v8480_v10  ;;  %v3981_v10 = vld [vmem:[#allocation34 + $0x170] sm:$0xff]  ;;  %v3980_v60 = vld [vmem:[#allocation34 + $0x168] sm:$0xff] }
 0x974   : > { %v3531_v53 = vrot.slane %v3530_v52, 4 }
 0x976   : > { %v3532_v54 = vadd.f32 %v3531_v53, %v3530_v52  ;;  %v5473_v52 = vld [vmem:[#allocation32] ss:$0 sm:$0xff]  ;;  %v5494_v53 = vld [vmem:[#allocation29] ss:$0 sm:$0xff] }
 0x978   : > { %v3533_v55 = vrot.slane %v3532_v54, 2 }
 0x97a   : > { %v3534_v56 = vadd.f32 %v3533_v55, %v3532_v54 }
 0x97c   : > { %v3535_v57 = vrot.slane %v3534_v56, 1 }
 0x97e   : > { %v3536_v36 = vadd.f32 %v3535_v57, %v3534_v56  ;;  %v2029_v56 = vadd.f32 %v5473_v52, %v2018_v47  ;;  %v2028_v57 = vadd.f32 %v5473_v52, %v2013_v50 }
 0x980   : > { %6486 = vmatmul.mubr.f32.vlgmr.msra.gmra.mxu1 %v3536_v36 }
 0x981   : > { %6540 = vmatpush3.msra.mxu1 %v3794_v37 }
 0x982   : > { %6541 = vmatprep.subr.mxu1 %v3793_v38 }
 0x983   : > { %6542 = vmatpush3.msra.mxu1 %v3793_v38 }
 0x984   : > { %6543 = vmatprep.subr.mxu1 %v3792_v39 }
 0x985   : > { %6544 = vmatpush3.msra.mxu1 %v3792_v39 }
 0x986   : > { %6545 = vmatprep.subr.mxu1 %v3791_v14 }
 0x987   : > { %6546 = vmatpush3.msra.mxu1 %v3791_v14 }
 0x988   : > { %6547 = vmatprep.subr.mxu1 %v3790_v40 }
 0x989   : > { %6548 = vmatpush3.msra.mxu1 %v3790_v40 }
 0x98a   : > { %6549 = vmatprep.subr.mxu1 %v3789_v41 }
 0x98b   : > { %6550 = vmatpush3.msra.mxu1 %v3789_v41 }
 0x98c   : > { %6551 = vmatprep.subr.mxu1 %v3788_v22 }
 0x98d   : > { %6552 = vmatpush3.msra.mxu1 %v3788_v22  ;;  %v8795_v22 = vld [vmem:[%s9113_s27 + $0x38] sm:$0xff] }
 0x98e   : > { %6553 = vmatprep.subr.mxu1 %v3787_v24 }
 0x98f   : > { %6554 = vmatpush3.msra.mxu1 %v3787_v24  ;;  %v8805_v24 = vld [vmem:[%s9113_s27 + $0x28] sm:$0xff] }
 0x990   : > { %6555 = vmatprep.subr.mxu1 %v3786_v26 }
 0x991   : > { %6556 = vmatpush3.msra.mxu1 %v3786_v26  ;;  %v8815_v26 = vld [vmem:[%s9113_s27 + $0x18] sm:$0xff] }
 0x992   : > { %6557 = vmatprep.subr.mxu1 %v3785_v28 }
 0x993   : > { %6558 = vmatpush3.msra.mxu1 %v3785_v28  ;;  %v8823_v28 = vld [vmem:[%s9113_s27 + $0x8] sm:$0xff] }
 0x994   : > { %6559 = vmatprep.subr.mxu1 %v3784_v29 }
 0x995   : > { %6560 = vmatpush3.msra.mxu1 %v3784_v29  ;;  %v4087_v29 = vld [vmem:[%s9114_s25] sm:$0x3] }
 0x996   : > { %6561 = vmatprep.subr.mxu1 %v3783_v31 }
 0x997   : > { %6562 = vmatpush3.msra.mxu1 %v3783_v31 }
 0x998   : > { %6563 = vmatprep.subr.mxu1 %v3782_v43 }
 0x999   : > { %6564 = vmatpush3.msra.mxu1 %v3782_v43 }
 0x99a   : > { %6565 = vmatprep.subr.mxu1 %v3781_v58 }
 0x99b   : > { %6566 = vmatpush3.msra.mxu1 %v3781_v58 }
 0x99c   : > { %6567 = vmatprep.subr.mxu1 %v3780_v33 }
 0x99d   : > { %6568 = vmatpush3.msra.mxu1 %v3780_v33 }
 0x99e   : > { %6569 = vmatprep.subr.mxu1 %v3779_v44 }
 0x99f   : > { %6570 = vmatpush3.msra.mxu1 %v3779_v44 }
 0x9a0   : > { %6609 = vmatprep.subr.mxu1 %v7900_v0 }
 0xa40   : > { %v3603_v42 = vpop.f32.mrf.mxu1 }
 0xa41   : > { %v3607_v61 = vmul.f32 0.0009765625, %v3603_v42  ;;  %v3977_v42 = vld [vmem:[#allocation34 + $0x150] sm:$0xff] }
 0xa42   : > { %v6487_v62 = vpop.f32.mrf.mxu1 }
 0xa43   : > { %v3608_v63 = vadd.f32 1e-05, %v3607_v61  ;;  %v3976_v61 = vld [vmem:[#allocation34 + $0x148] sm:$0xff]  ;;  %v3975_v62 = vld [vmem:[#allocation34 + $0x140] sm:$0xff] }
 0xa45   : > { %7176 = vrsqrt.f32 %v3608_v63  ;;  %v3974_v63 = vld [vmem:[#allocation34 + $0x138] sm:$0xff] }
 0xa52   : > { %v7177_v2 = vpop.eup %7176 }
 0xa53   : > { %6491 = vmatmul.mubr.msk.f32.vlgmr.msra.gmra.mxu0 %vm2781_vm8, %v7177_v2  ;;  %v3972_v2 = vld [vmem:[#allocation34 + $0x128] sm:$0xff] }
 0xa54   : > { %6494 = vmatpush3.msra.mxu0 %v3703_v1  ;;  %6501 = vmatprep.mubr.msk.f32.mxu0 %vm7901_vm1, %v7900_v0  ;;  %v3973_v1 = vld [vmem:[#allocation34 + $0x130] sm:$0xff] }
 0xa55   : > { %6495 = vmatprep.subr.mxu0 %v7900_v0 }
 0xa56   : > { %6496 = vmatpush3.msra.mxu0 %v3702_v4  ;;  %v3971_v4 = vld [vmem:[#allocation34 + $0x120] sm:$0xff] }
 0xa57   : > { %6497 = vmatprep.subr.mxu0 %v7900_v0 }
 0xa58   : > { %6498 = vmatpush3.msra.mxu0 %v3701_v7  ;;  %v3970_v7 = vld [vmem:[#allocation34 + $0x118] sm:$0xff] }
 0xa59   : > { %6499 = vmatprep.subr.mxu0 %v7900_v0 }
 0xa5a   : > { %6500 = vmatpush3.msra.mxu0 %v3700_v8  ;;  %v3969_v8 = vld [vmem:[#allocation34 + $0x110] sm:$0xff] }
 0xa5b   : > { %6502 = vmatmul.mubr.msk.f32.vlgmr.msra.gmra.mxu0 %vm1344_vm2, %v8422_v35  ;;  %6504 = vmatprep.subr.mxu0 %v3813_v9  ;;  %v3806_v35 = vld [vmem:[#allocation34 + $0xc0] sm:$0xff] }
 0xa5c   : > { %6505 = vmatpush3.msra.mxu0 %v3813_v9  ;;  %v3968_v9 = vld [vmem:[#allocation34 + $0x108] sm:$0xff] }
 0xa5d   : > { %6506 = vmatprep.subr.mxu0 %v3812_v12 }
 0xa5e   : > { %6507 = vmatpush3.msra.mxu0 %v3812_v12  ;;  %v3967_v12 = vld [vmem:[#allocation34 + $0x100] sm:$0xff] }
 0xa5f   : > { %6508 = vmatprep.subr.mxu0 %v3811_v13 }
 0xa60   : > { %6509 = vmatpush3.msra.mxu0 %v3811_v13 }
 0xa61   : > { %6510 = vmatprep.subr.mxu0 %v3810_v15 }
 0xa62   : > { %6511 = vmatpush3.msra.mxu0 %v3810_v15  ;;  %v8755_v15 = vld [vmem:[%s9113_s27 + $0x78] sm:$0xff] }
 0xa63   : > { %6512 = vmatprep.subr.mxu0 %v3809_v16 }
 0xa64   : > { %6513 = vmatpush3.msra.mxu0 %v3809_v16  ;;  %v8758_v16 = vld [vmem:[%s9113_s27 + $0x70] sm:$0xff] }
 0xa65   : > { %6514 = vmatprep.subr.mxu0 %v3808_v17 }
 0xa66   : > { %6515 = vmatpush3.msra.mxu0 %v3808_v17  ;;  %v8763_v17 = vld [vmem:[%s9113_s27 + $0x68] sm:$0xff] }
 0xa67   : > { %6516 = vmatprep.subr.mxu0 %v3807_v18 }
 0xa68   : > { %6517 = vmatpush3.msra.mxu0 %v3807_v18  ;;  %v8768_v18 = vld [vmem:[%s9113_s27 + $0x60] sm:$0xff] }
 0xa69   : > { %6518 = vmatprep.subr.mxu0 %v3806_v35 }
 0xa6a   : > { %6519 = vmatpush3.msra.mxu0 %v3806_v35  ;;  %v8773_v35 = vld [vmem:[%s9113_s27 + $0x58] sm:$0xff] }
 0xa6b   : > { %6520 = vmatprep.subr.mxu0 %v3805_v19 }
 0xa6c   : > { %6521 = vmatpush3.msra.mxu0 %v3805_v19  ;;  %v8780_v19 = vld [vmem:[%s9113_s27 + $0x50] sm:$0xff] }
 0xa6d   : > { %6522 = vmatprep.subr.mxu0 %v3804_v20 }
 0xa6e   : > { %6523 = vmatpush3.msra.mxu0 %v3804_v20  ;;  %v8785_v20 = vld [vmem:[%s9113_s27 + $0x48] sm:$0xff] }
 0xa6f   : > { %6524 = vmatprep.subr.mxu0 %v3803_v21 }
 0xa70   : > { %6525 = vmatpush3.msra.mxu0 %v3803_v21  ;;  %v8790_v21 = vld [vmem:[%s9113_s27 + $0x40] sm:$0xff] }
 0xa71   : > { %6526 = vmatprep.subr.mxu0 %v3802_v23 }
 0xa72   : > { %6527 = vmatpush3.msra.mxu0 %v3802_v23  ;;  %v8800_v23 = vld [vmem:[%s9113_s27 + $0x30] sm:$0xff] }
 0xa73   : > { %6528 = vmatprep.subr.mxu0 %v3801_v25 }
 0xa74   : > { %6529 = vmatpush3.msra.mxu0 %v3801_v25  ;;  %v8810_v25 = vld [vmem:[%s9113_s27 + $0x20] sm:$0xff] }
 0xa75   : > { %6530 = vmatprep.subr.mxu0 %v3800_v27 }
 0xa76   : > { %6531 = vmatpush3.msra.mxu0 %v3800_v27  ;;  %v8820_v27 = vld [vmem:[%s9113_s27 + $0x10] sm:$0xff] }
 0xa77   : > { %6532 = vmatprep.subr.mxu0 %v3799_v11 }
 0xa78   : > { %6533 = vmatpush3.msra.mxu0 %v3799_v11  ;;  %v8828_v11 = vld [vmem:[%s9113_s27] sm:$0xff] }
 0xa79   : > { %6534 = vmatprep.subr.mxu0 %v3798_v30 }
 0xa7a   : > { %6535 = vmatpush3.msra.mxu0 %v3798_v30 }
 0xa7b   : > { %6574 = vmatprep.subr.mxu0 %v3982_v32 }
 0xb13   : > { %v3679_v45 = vpop.f32.mrf.mxu0 }
 0xb14   : > { %v3683_v6 = vmul.f32 %v3679_v45, %v3349_v5  ;;  %v5496_v45 = vld [vmem:[%s9115_s4] ss:$0 sm:$0xff]  ;;  %s1327_s4 = scalar_lea.vmem [#allocation38], %s5463_s23  ;;  %s7742_s23 = sshll.u32 %s7904_s18, 4  ;;  %s7743_s23 = int_to_ptr.vmem [resolvable:$false] %s7742_s23 }
 0xb15   : > { %v6492_v46 = vpop.f32.mrf.mxu0 }
 0xb16   : > { %v3687_v51 = vrot.slane %v3683_v6, %v8455_v34 }
 0xb18   : > { %v3688_v54 = vmul.f32 %v3687_v51, %v8715_v48  ;;  %v3689_v55 = vmul.f32 %v3687_v51, %v8717_v49  ;;  %v3979_v48 = vld [vmem:[#allocation34 + $0x160] sm:$0xff]  ;;  %v3978_v49 = vld [vmem:[#allocation34 + $0x158] sm:$0xff] }
 0xb1a   : > { %v3696_v36 = vadd.f32 %v5494_v53, %v3688_v54  ;;  %v3697_v37 = vadd.f32 %v5494_v53, %v3689_v55 }
 0xb1b   : > { %v8739_v38 = vpop.f32.mrf.mxu0 }
 0xb1c   : > { %v8741_v39 = vadd.f32 %v3696_v36, %v2028_v57  ;;  %v8743_v3 = vadd.f32 %v3697_v37, %v2029_v56 }
 0xb1d   : > { %v6503_v59 = vpop.f32.mrf.mxu0 }
 0xb1e   : > { %3775 = vst [vmem:[#allocation3 + $0x1] sm:$0xff] %v8741_v39  ;;  %3776 = vst [vmem:[#allocation3 + $0x9] sm:$0xff] %v8743_v3  ;;  %6536 = vmatprep.mubr.f32.mxu0 %v8741_v39 }
 0xb1f   : > { %6537 = vmatmul.mubr.f32.vlgmr.msra.gmra.mxu0 %v8743_v3 }
 0xb20   : > { %6575 = vmatpush3.msra.mxu0 %v3982_v32 }
 0xb21   : > { %6576 = vmatprep.subr.mxu0 %v3981_v10 }
 0xb22   : > { %6577 = vmatpush3.msra.mxu0 %v3981_v10 }
 0xb23   : > { %6578 = vmatprep.subr.mxu0 %v3980_v60 }
 0xb24   : > { %6579 = vmatpush3.msra.mxu0 %v3980_v60 }
 0xb25   : > { %v3777_v14 = vld [vmem:[#allocation3] sm:$0xff]  ;;  %v3778_v40 = vld [vmem:[#allocation3 + $0x8] sm:$0xff]  ;;  %6580 = vmatprep.subr.mxu0 %v3979_v48 }
 0xb26   : > { %v3964_v41 = vld [vmem:[#allocation3 + $0x2] sm:$0xff]  ;;  %6571 = vmatprep.mubr.f32.mxu1 %v3777_v14  ;;  %6581 = vmatpush3.msra.mxu0 %v3979_v48  ;;  %v3965_v13 = vld [vmem:[#allocation3 + $0xa] sm:$0xff] }
 0xb27   : > { %6606 = vmatprep.mubr.f32.mxu0 %v3964_v41  ;;  %6572 = vmatmul.mubr.f32.vlgmr.msra.gmra.mxu1 %v3778_v40 }
 0xb28   : > { %6582 = vmatprep.subr.mxu0 %v3978_v49  ;;  %6641 = vmatprep.mubr.msk.f32.mxu1 %vm7901_vm1, %v7900_v0 }
 0xb29   : > { %6583 = vmatpush3.msra.mxu0 %v3978_v49  ;;  %6610 = vmatpush3.msra.mxu1 %v8755_v15 }
 0xb2a   : > { %6584 = vmatprep.subr.mxu0 %v3977_v42  ;;  %6611 = vmatprep.subr.mxu1 %v7900_v0 }
 0xb2b   : > { %6585 = vmatpush3.msra.mxu0 %v3977_v42  ;;  %6612 = vmatpush3.msra.mxu1 %v8758_v16 }
 0xb2c   : > { %6586 = vmatprep.subr.mxu0 %v3976_v61  ;;  %6613 = vmatprep.subr.mxu1 %v7900_v0 }
 0xb2d   : > { %6587 = vmatpush3.msra.mxu0 %v3976_v61  ;;  %6614 = vmatpush3.msra.mxu1 %v8763_v17 }
 0xb2e   : > { %6588 = vmatprep.subr.mxu0 %v3975_v62  ;;  %6615 = vmatprep.subr.mxu1 %v7900_v0 }
 0xb2f   : > { %6589 = vmatpush3.msra.mxu0 %v3975_v62  ;;  %6616 = vmatpush3.msra.mxu1 %v8768_v18 }
 0xb30   : > { %6590 = vmatprep.subr.mxu0 %v3974_v63  ;;  %6617 = vmatprep.subr.mxu1 %v7900_v0 }
 0xb31   : > { %6591 = vmatpush3.msra.mxu0 %v3974_v63  ;;  %6618 = vmatpush3.msra.mxu1 %v8773_v35 }
 0xb32   : > { %6592 = vmatprep.subr.mxu0 %v3973_v1  ;;  %6619 = vmatprep.subr.mxu1 %v7900_v0 }
 0xb33   : > { %6593 = vmatpush3.msra.mxu0 %v3973_v1  ;;  %6620 = vmatpush3.msra.mxu1 %v8780_v19 }
 0xb34   : > { %6594 = vmatprep.subr.mxu0 %v3972_v2  ;;  %6621 = vmatprep.subr.mxu1 %v7900_v0 }
 0xb35   : > { %6595 = vmatpush3.msra.mxu0 %v3972_v2  ;;  %6622 = vmatpush3.msra.mxu1 %v8785_v20 }
 0xb36   : > { %6596 = vmatprep.subr.mxu0 %v3971_v4  ;;  %6623 = vmatprep.subr.mxu1 %v7900_v0 }
 0xb37   : > { %6597 = vmatpush3.msra.mxu0 %v3971_v4  ;;  %6624 = vmatpush3.msra.mxu1 %v8790_v21 }
 0xb38   : > { %6598 = vmatprep.subr.mxu0 %v3970_v7  ;;  %6625 = vmatprep.subr.mxu1 %v7900_v0 }
 0xb39   : > { %6599 = vmatpush3.msra.mxu0 %v3970_v7  ;;  %6626 = vmatpush3.msra.mxu1 %v8795_v22 }
 0xb3a   : > { %6600 = vmatprep.subr.mxu0 %v3969_v8  ;;  %6627 = vmatprep.subr.mxu1 %v7900_v0 }
 0xb3b   : > { %6601 = vmatpush3.msra.mxu0 %v3969_v8  ;;  %6628 = vmatpush3.msra.mxu1 %v8800_v23 }
 0xb3c   : > { %6602 = vmatprep.subr.mxu0 %v3968_v9  ;;  %6629 = vmatprep.subr.mxu1 %v7900_v0 }
 0xb3d   : > { %6603 = vmatpush3.msra.mxu0 %v3968_v9  ;;  %6630 = vmatpush3.msra.mxu1 %v8805_v24 }
 0xb3e   : > { %6604 = vmatprep.subr.mxu0 %v3967_v12  ;;  %6631 = vmatprep.subr.mxu1 %v7900_v0 }
 0xb3f   : > { %6605 = vmatpush3.msra.mxu0 %v3967_v12  ;;  %6632 = vmatpush3.msra.mxu1 %v8810_v25 }
 0xb40   : > { %6607 = vmatmul.mubr.f32.vlgmr.msra.gmra.mxu0 %v3965_v13  ;;  %6644 = vmatprep.subr.mxu0 %v7900_v0 }
 0xb41   : > { %6646 = vmatprep.mubr.msk.f32.mxu0 %vm7901_vm1, %v7900_v0  ;;  %6633 = vmatprep.subr.mxu1 %v7900_v0 }
 0xb42   : > { %6634 = vmatpush3.msra.mxu1 %v8815_v26  ;;  %6645 = vmatpush3.msk.msra.mxu0 %vm2785_vm7, %v4087_v29 }
 0xb43   : > { %6635 = vmatprep.subr.mxu1 %v7900_v0  ;;  %6649 = vmatprep.subr.mxu0 %v7900_v0 }
 0xb44   : > { %6636 = vmatpush3.msra.mxu1 %v8820_v27 }
 0xb45   : > { %6637 = vmatprep.subr.mxu1 %v7900_v0 }
 0xb46   : > { %6638 = vmatpush3.msra.mxu1 %v8823_v28 }
 0xb47   : > { %6639 = vmatprep.subr.mxu1 %v7900_v0 }
 0xb48   : > { %6640 = vmatpush3.msra.mxu1 %v8828_v11 }
 0xb49   : > { %6684 = vmatprep.subr.mxu1 %v7900_v0 }
 0xbdf   : > { %v6538_v30 = vpop.f32.mrf.mxu0 }
 0xbe1   : > { %v3880_v43 = vpop.f32.mrf.mxu0 }
 0xbe7   : > { %v6573_v31 = vpop.f32.mrf.mxu1 }
 0xbe8   : > { %v3961_v32 = vadd.f32 %v6573_v31, %v6538_v30  ;;  %v4475_v30 = vld [vmem:[#allocation37 + $0xf0] sm:$0xff]  ;;  %v4474_v31 = vld [vmem:[#allocation37 + $0xe8] sm:$0xff] }
 0xbe9   : > { %v3955_v58 = vpop.f32.mrf.mxu1 }
 0xbea   : > { %v3956_v44 = vadd.f32 %v3955_v58, %v3880_v43  ;;  %v4473_v43 = vld [vmem:[#allocation37 + $0xe0] sm:$0xff]  ;;  %v4472_v58 = vld [vmem:[#allocation37 + $0xd8] sm:$0xff] }
 0xc00   : > { %v6608_v33 = vpop.f32.mrf.mxu0 }
 0xc01   : > { %v4059_v5 = vadd.f32 %v6608_v33, %v3961_v32  ;;  %v4457_v32 = vld [vmem:[#allocation37 + $0x78] sm:$0xff]  ;;  %v4471_v33 = vld [vmem:[#allocation37 + $0xd0] sm:$0xff] }
 0xc02   : > { %v4049_v6 = vpop.f32.mrf.mxu0 }
 0xc03   : > { %v4058_v46 = vadd.f32 %v4049_v6, %v3956_v44  ;;  %v4068_v47 = vadd.f32 %v5496_v45, %v4059_v5  ;;  %v4456_v44 = vld [vmem:[#allocation37 + $0x70] sm:$0xff]  ;;  %v4470_v5 = vld [vmem:[#allocation37 + $0xc8] sm:$0xff]  ;;  %v4469_v6 = vld [vmem:[#allocation37 + $0xc0] sm:$0xff] }
 0xc05   : > { %v4067_v50 = vadd.f32 %v5496_v45, %v4058_v46  ;;  %v4455_v45 = vld [vmem:[#allocation37 + $0x68] sm:$0xff]  ;;  %v4454_v46 = vld [vmem:[#allocation37 + $0x60] sm:$0xff] }
 0xc07   : > { %v4088_v51 = vadd.f32 %v4068_v47, %v4067_v50 }
 0xc09   : > { %v4089_v52 = vrot.slane %v4088_v51, 4 }
 0xc0b   : > { %v4090_v53 = vadd.f32 %v4089_v52, %v4088_v51  ;;  %v4467_v51 = vld [vmem:[#allocation37 + $0xb0] sm:$0xff] }
 0xc0c   : > { %v4452_v52 = vld [vmem:[#allocation37 + $0x50] sm:$0xff] }
 0xc0d   : > { %v4091_v54 = vrot.slane %v4090_v53, 2 }
 0xc0f   : > { %v4092_v55 = vadd.f32 %v4091_v54, %v4090_v53  ;;  %v4466_v53 = vld [vmem:[#allocation37 + $0xa8] sm:$0xff] }
 0xc10   : > { %v4451_v54 = vld [vmem:[#allocation37 + $0x48] sm:$0xff] }
 0xc11   : > { %v4093_v56 = vrot.slane %v4092_v55, 1 }
 0xc13   : > { %v4094_v57 = vadd.f32 %v4093_v56, %v4092_v55  ;;  %v4465_v55 = vld [vmem:[#allocation37 + $0xa0] sm:$0xff] }
 0xc14   : > { %v4450_v56 = vld [vmem:[#allocation37 + $0x40] sm:$0xff] }
 0xc15   : > { %6642 = vmatmul.mubr.f32.vlgmr.msra.gmra.mxu1 %v4094_v57  ;;  %v4464_v57 = vld [vmem:[#allocation37 + $0x98] sm:$0xff] }
 0xc16   : > { %6685 = vmatpush3.msk.msra.mxu1 %vm2785_vm7, %v4087_v29  ;;  %6686 = vmatprep.mubr.msk.f32.mxu1 %vm7901_vm1, %v7900_v0  ;;  %v4476_v29 = vld [vmem:[#allocation37 + $0xf8] sm:$0xff] }
 0xc17   : > { %6689 = vmatprep.subr.mxu1 %v4476_v29 }
 0xcd5   : > { %v4161_v36 = vpop.f32.mrf.mxu1 }
 0xcd6   : > { %v4165_v37 = vmul.f32 0.0009765625, %v4161_v36  ;;  %v4449_v36 = vld [vmem:[#allocation37 + $0x38] sm:$0xff] }
 0xcd7   : > { %v6643_v59 = vpop.f32.mrf.mxu1 }
 0xcd8   : > { %6647 = vmatmul.mubr.msk.f32.vlgmr.msra.gmra.mxu0 %vm2781_vm8, %v4165_v37  ;;  %v4463_v37 = vld [vmem:[#allocation37 + $0x90] sm:$0xff] }
 0xcd9   : > { %6650 = vmatpush3.msra.mxu0 %v8755_v15  ;;  %6681 = vmatprep.mubr.msk.f32.mxu0 %vm7901_vm1, %v7900_v0  ;;  %v4448_v59 = vld [vmem:[#allocation37 + $0x30] sm:$0xff] }
 0xcda   : > { %6651 = vmatprep.subr.mxu0 %v7900_v0 }
 0xcdb   : > { %6652 = vmatpush3.msra.mxu0 %v8758_v16 }
 0xcdc   : > { %6653 = vmatprep.subr.mxu0 %v7900_v0 }
 0xcdd   : > { %6654 = vmatpush3.msra.mxu0 %v8763_v17 }
 0xcde   : > { %6655 = vmatprep.subr.mxu0 %v7900_v0 }
 0xcdf   : > { %6656 = vmatpush3.msra.mxu0 %v8768_v18 }
 0xce0   : > { %6657 = vmatprep.subr.mxu0 %v7900_v0 }
 0xce1   : > { %6658 = vmatpush3.msra.mxu0 %v8773_v35 }
 0xce2   : > { %6659 = vmatprep.subr.mxu0 %v7900_v0 }
 0xce3   : > { %6660 = vmatpush3.msra.mxu0 %v8780_v19 }
 0xce4   : > { %6661 = vmatprep.subr.mxu0 %v7900_v0 }
 0xce5   : > { %6662 = vmatpush3.msra.mxu0 %v8785_v20 }
 0xce6   : > { %6663 = vmatprep.subr.mxu0 %v7900_v0 }
 0xce7   : > { %6664 = vmatpush3.msra.mxu0 %v8790_v21 }
 0xce8   : > { %6665 = vmatprep.subr.mxu0 %v7900_v0 }
 0xce9   : > { %6666 = vmatpush3.msra.mxu0 %v8795_v22 }
 0xcea   : > { %6667 = vmatprep.subr.mxu0 %v7900_v0 }
 0xceb   : > { %6668 = vmatpush3.msra.mxu0 %v8800_v23 }
 0xcec   : > { %6669 = vmatprep.subr.mxu0 %v7900_v0 }
 0xced   : > { %6670 = vmatpush3.msra.mxu0 %v8805_v24 }
 0xcee   : > { %6671 = vmatprep.subr.mxu0 %v7900_v0 }
 0xcef   : > { %6672 = vmatpush3.msra.mxu0 %v8810_v25 }
 0xcf0   : > { %6673 = vmatprep.subr.mxu0 %v7900_v0 }
 0xcf1   : > { %6674 = vmatpush3.msra.mxu0 %v8815_v26 }
 0xcf2   : > { %6675 = vmatprep.subr.mxu0 %v7900_v0 }
 0xcf3   : > { %6676 = vmatpush3.msra.mxu0 %v8820_v27 }
 0xcf4   : > { %6677 = vmatprep.subr.mxu0 %v7900_v0 }
 0xcf5   : > { %6678 = vmatpush3.msra.mxu0 %v8823_v28 }
 0xcf6   : > { %6679 = vmatprep.subr.mxu0 %v7900_v0 }
 0xcf7   : > { %6680 = vmatpush3.msra.mxu0 %v8828_v11 }
 0xcf8   : > { %6724 = vmatprep.subr.mxu0 %v4457_v32 }
 0xd98   : > { %v4238_v10 = vpop.f32.mrf.mxu0 }
 0xd99   : > { %v4245_v60 = vrot.slane %v4238_v10, %v8455_v34  ;;  %v4462_v10 = vld [vmem:[#allocation37 + $0x88] sm:$0xff] }
 0xd9a   : > { %v6648_v48 = vpop.f32.mrf.mxu0 }
 0xd9b   : > { %v8876_v49 = vsub.f32 %v4067_v50, %v4245_v60  ;;  %v8878_v14 = vsub.f32 %v4068_v47, %v4245_v60  ;;  %v4468_v47 = vld [vmem:[#allocation37 + $0xb8] sm:$0xff]  ;;  %v4447_v60 = vld [vmem:[#allocation37 + $0x28] sm:$0xff]  ;;  %v4461_v48 = vld [vmem:[#allocation37 + $0x80] sm:$0xff] }
 0xd9c   : > { %v4453_v50 = vld [vmem:[#allocation37 + $0x58] sm:$0xff] }
 0xd9d   : > { %v4248_v40 = vmul.f32 %v8876_v49, %v8876_v49  ;;  %v4249_v41 = vmul.f32 %v8878_v14, %v8878_v14 }
 0xd9f   : > { %v4250_v42 = vadd.f32 %v4249_v41, %v4248_v40  ;;  %v4446_v40 = vld [vmem:[#allocation37 + $0x20] sm:$0xff]  ;;  %v4645_v41 = vld [vmem:[#allocation37 + $0x178] sm:$0xff] }
 0xda1   : > { %v4251_v61 = vrot.slane %v4250_v42, 4 }
 0xda3   : > { %v4252_v62 = vadd.f32 %v4251_v61, %v4250_v42  ;;  %v4445_v42 = vld [vmem:[#allocation37 + $0x18] sm:$0xff]  ;;  %v4444_v61 = vld [vmem:[#allocation37 + $0x10] sm:$0xff] }
 0xda5   : > { %v4253_v63 = vrot.slane %v4252_v62, 2 }
 0xda7   : > { %v4254_v1 = vadd.f32 %v4253_v63, %v4252_v62  ;;  %v4443_v62 = vld [vmem:[#allocation37 + $0x8] sm:$0xff]  ;;  %v4442_v63 = vld [vmem:[#allocation37] sm:$0xff] }
 0xda9   : > { %v4255_v2 = vrot.slane %v4254_v1, 1 }
 0xdab   : > { %v4256_v4 = vadd.f32 %v4255_v2, %v4254_v1  ;;  %v4069_v1 = vld [vmem:[%s9116_s28] sm:$0x1]  ;;  %s5099_s28 = sshll.u32 %s1327_s4, 4  ;;  %s8982_s28 = int_to_ptr.vmem [resolvable:$true] %s5099_s28 }
 0xdac   : > { %p7745_p10 = scmp.lt.s32.totalorder %s8982_s28, %s7743_s23 }
 0xdad   : > { %6682 = vmatmul.mubr.f32.vlgmr.msra.gmra.mxu0 %v4256_v4 }
 0xdae   : > { %6725 = vmatpush3.msra.mxu0 %v4457_v32 }
 0xdaf   : > { %6726 = vmatprep.subr.mxu0 %v4456_v44 }
 0xdb0   : > { %6727 = vmatpush3.msra.mxu0 %v4456_v44 }
 0xdb1   : > { %6728 = vmatprep.subr.mxu0 %v4455_v45 }
 0xdb2   : > { %6729 = vmatpush3.msra.mxu0 %v4455_v45 }
 0xdb3   : > { %6730 = vmatprep.subr.mxu0 %v4454_v46 }
 0xdb4   : > { %6731 = vmatpush3.msra.mxu0 %v4454_v46 }
 0xdb5   : > { %6732 = vmatprep.subr.mxu0 %v4453_v50 }
 0xdb6   : > { %6733 = vmatpush3.msra.mxu0 %v4453_v50 }
 0xdb7   : > { %6734 = vmatprep.subr.mxu0 %v4452_v52 }
 0xdb8   : > { %6735 = vmatpush3.msra.mxu0 %v4452_v52  ;;  %v4644_v52 = vld [vmem:[#allocation37 + $0x170] sm:$0xff] }
 0xdb9   : > { %6736 = vmatprep.subr.mxu0 %v4451_v54 }
 0xdba   : > { %6737 = vmatpush3.msra.mxu0 %v4451_v54  ;;  %v4642_v54 = vld [vmem:[#allocation37 + $0x160] sm:$0xff] }
 0xdbb   : > { %6738 = vmatprep.subr.mxu0 %v4450_v56 }
 0xdbc   : > { %6739 = vmatpush3.msra.mxu0 %v4450_v56 }
 0xdbd   : > { %6740 = vmatprep.subr.mxu0 %v4449_v36 }
 0xdbe   : > { %6741 = vmatpush3.msra.mxu0 %v4449_v36  ;;  %v4640_v36 = vld [vmem:[#allocation37 + $0x150] sm:$0xff] }
 0xdbf   : > { %6742 = vmatprep.subr.mxu0 %v4448_v59 }
 0xdc0   : > { %6743 = vmatpush3.msra.mxu0 %v4448_v59  ;;  %v4638_v59 = vld [vmem:[#allocation37 + $0x140] sm:$0xff] }
 0xdc1   : > { %6744 = vmatprep.subr.mxu0 %v4447_v60 }
 0xdc2   : > { %6745 = vmatpush3.msra.mxu0 %v4447_v60  ;;  %v4636_v60 = vld [vmem:[#allocation37 + $0x130] sm:$0xff] }
 0xdc3   : > { %6746 = vmatprep.subr.mxu0 %v4446_v40 }
 0xdc4   : > { %6747 = vmatpush3.msra.mxu0 %v4446_v40  ;;  %v4634_v40 = vld [vmem:[#allocation37 + $0x120] sm:$0xff] }
 0xdc5   : > { %6748 = vmatprep.subr.mxu0 %v4445_v42 }
 0xdc6   : > { %6749 = vmatpush3.msra.mxu0 %v4445_v42  ;;  %v4632_v42 = vld [vmem:[#allocation37 + $0x110] sm:$0xff] }
 0xdc7   : > { %6750 = vmatprep.subr.mxu0 %v4444_v61 }
 0xdc8   : > { %6751 = vmatpush3.msra.mxu0 %v4444_v61  ;;  %v4631_v61 = vld [vmem:[#allocation37 + $0x108] sm:$0xff] }
 0xdc9   : > { %6752 = vmatprep.subr.mxu0 %v4443_v62 }
 0xdca   : > { %6753 = vmatpush3.msra.mxu0 %v4443_v62  ;;  %v4630_v62 = vld [vmem:[#allocation37 + $0x100] sm:$0xff] }
 0xdcb   : > { %6754 = vmatprep.subr.mxu0 %v4442_v63 }
 0xdcc   : > { %6755 = vmatpush3.msra.mxu0 %v4442_v63 }
 0xdcd   : > { %6794 = vmatprep.subr.mxu0 %v7900_v0 }
 0xe6d   : > { %v4323_v7 = vpop.f32.mrf.mxu0 }
 0xe6e   : > { %v4327_v8 = vmul.f32 0.0009765625, %v4323_v7 }
 0xe6f   : > { %v6683_v9 = vpop.f32.mrf.mxu0 }
 0xe70   : > { %v4328_v12 = vadd.f32 1e-05, %v4327_v8  ;;  %v5501_v9 = vld [vmem:[%s9117_s5] ss:$0 sm:$0xff]  ;;  %s8980_s5 = scalar_lea.hbm %s9120_s16, %s5516_s26  ;;  %s7744_s26 = scalar_lea.vmem %s7743_s23, 512 }
 0xe72   : > { %7178 = vrsqrt.f32 %v4328_v12 }
 0xe7f   : > { %v7179_v13 = vpop.eup %7178 }
 0xe80   : > { %6687 = vmatmul.mubr.msk.f32.vlgmr.msra.gmra.mxu1 %vm2781_vm8, %v7179_v13 }
 0xe81   : > { %6690 = vmatpush3.msra.mxu1 %v4476_v29 }
 0xe82   : > { %6691 = vmatprep.subr.mxu1 %v4475_v30 }
 0xe83   : > { %6692 = vmatpush3.msra.mxu1 %v4475_v30 }
 0xe84   : > { %6693 = vmatprep.subr.mxu1 %v4474_v31 }
 0xe85   : > { %6694 = vmatpush3.msra.mxu1 %v4474_v31 }
 0xe86   : > { %6695 = vmatprep.subr.mxu1 %v4473_v43 }
 0xe87   : > { %6696 = vmatpush3.msra.mxu1 %v4473_v43 }
 0xe88   : > { %6697 = vmatprep.subr.mxu1 %v4472_v58 }
 0xe89   : > { %6698 = vmatpush3.msra.mxu1 %v4472_v58 }
 0xe8a   : > { %6699 = vmatprep.subr.mxu1 %v4471_v33 }
 0xe8b   : > { %6700 = vmatpush3.msra.mxu1 %v4471_v33 }
 0xe8c   : > { %6701 = vmatprep.subr.mxu1 %v4470_v5 }
 0xe8d   : > { %6702 = vmatpush3.msra.mxu1 %v4470_v5  ;;  %v3704_v5 = vld [vmem:[%s9118_s6] sm:$0x1] }
 0xe8e   : > { %6703 = vmatprep.subr.mxu1 %v4469_v6  ;;  %v3772_v45 = vadd.f32 %v8739_v38, %v3704_v5 }
 0xe8f   : > { %6704 = vmatpush3.msra.mxu1 %v4469_v6 }
 0xe90   : > { %6705 = vmatprep.subr.mxu1 %v4468_v47 }
 0xe91   : > { %6706 = vmatpush3.msra.mxu1 %v4468_v47 }
 0xe92   : > { %6707 = vmatprep.subr.mxu1 %v4467_v51 }
 0xe93   : > { %6708 = vmatpush3.msra.mxu1 %v4467_v51 }
 0xe94   : > { %6709 = vmatprep.subr.mxu1 %v4466_v53 }
 0xe95   : > { %6710 = vmatpush3.msra.mxu1 %v4466_v53  ;;  %v4643_v53 = vld [vmem:[#allocation37 + $0x168] sm:$0xff] }
 0xe96   : > { %6711 = vmatprep.subr.mxu1 %v4465_v55 }
 0xe97   : > { %6712 = vmatpush3.msra.mxu1 %v4465_v55  ;;  %v4641_v55 = vld [vmem:[#allocation37 + $0x158] sm:$0xff] }
 0xe98   : > { %6713 = vmatprep.subr.mxu1 %v4464_v57 }
 0xe99   : > { %6714 = vmatpush3.msra.mxu1 %v4464_v57 }
 0xe9a   : > { %6715 = vmatprep.subr.mxu1 %v4463_v37 }
 0xe9b   : > { %6716 = vmatpush3.msra.mxu1 %v4463_v37  ;;  %v4639_v37 = vld [vmem:[#allocation37 + $0x148] sm:$0xff] }
 0xe9c   : > { %6717 = vmatprep.subr.mxu1 %v4462_v10 }
 0xe9d   : > { %6718 = vmatpush3.msra.mxu1 %v4462_v10  ;;  %v4637_v10 = vld [vmem:[#allocation37 + $0x138] sm:$0xff] }
 0xe9e   : > { %6719 = vmatprep.subr.mxu1 %v4461_v48 }
 0xe9f   : > { %6720 = vmatpush3.msra.mxu1 %v4461_v48  ;;  %v4635_v48 = vld [vmem:[#allocation37 + $0x128] sm:$0xff] }
 0xea0   : > { %6759 = vmatprep.subr.mxu1 %v4645_v41 }
 0xf40   : > { %v4399_v2 = vpop.f32.mrf.mxu1 }
 0xf41   : > { %v4403_v4 = vmul.f32 %v4399_v2, %v4069_v1  ;;  %v4750_v1 = vld [vmem:[%s9114_s25] sm:$0x3] }
 0xf42   : > { %v6688_v7 = vpop.f32.mrf.mxu1 }
 0xf43   : > { %v4407_v8 = vrot.slane %v4403_v4, %v8455_v34 }
 0xf45   : > { %v4408_v12 = vmul.f32 %v4407_v8, %v8876_v49  ;;  %v4409_v13 = vmul.f32 %v4407_v8, %v8878_v14  ;;  %v4435_v49 = vrot.slane %v3772_v45, %v8455_v34 }
 0xf47   : > { %v4416_v29 = vadd.f32 %v5501_v9, %v4408_v12  ;;  %v4417_v30 = vadd.f32 %v5501_v9, %v4409_v13 }
 0xf49   : > { %v5502_v31 = vmul.f32 -1.442695, %v4416_v29  ;;  %v5503_v43 = vmul.f32 -1.442695, %v4417_v30 }
 0xf4b   : > { %7180 = vpow2.f32 %v5502_v31 }
 0xf4c   : > { %7182 = vpow2.f32 %v5503_v43 }
 0xf58   : > { %v7181_v58 = vpop.eup %7180 }
 0xf59   : > { %v7183_v32 = vpop.eup %7182  ;;  %v4424_v33 = vadd.f32 1.0, %v7181_v58 }
 0xf5a   : > { %v4425_v44 = vadd.f32 1.0, %v7183_v32 }
 0xf5b   : > { %7184 = vrcp.f32 %v4424_v33 }
 0xf5c   : > { %7186 = vrcp.f32 %v4425_v44 }
 0xf68   : > { %v7185_v6 = vpop.eup %7184 }
 0xf69   : > { %v7187_v46 = vpop.eup %7186  ;;  %v4430_v14 = vmul.f32 %v7185_v6, %v4416_v29 }
 0xf6a   : > { %v4431_v47 = vmul.f32 %v7187_v46, %v4417_v30  ;;  %v5504_v30 = vld [vmem:[%s8065_s9] ss:$0 sm:$0xff] }
 0xf6b   : > { %v4436_v50 = vadd.f32 %v4435_v49, %v4430_v14 }
 0xf6c   : > { %v4437_v51 = vadd.f32 %v4435_v49, %v4431_v47 }
 0xf6d   : > { %4438 = vst [vmem:[#allocation3 + $0x1] sm:$0xff] %v4436_v50  ;;  %6721 = vmatprep.mubr.f32.mxu1 %v4436_v50 }
 0xf6e   : > { %4439 = vst [vmem:[#allocation3 + $0x9] sm:$0xff] %v4437_v51  ;;  %6722 = vmatmul.mubr.f32.vlgmr.msra.gmra.mxu1 %v4437_v51 }
 0xf6f   : > { %6760 = vmatpush3.msra.mxu1 %v4645_v41  ;;  %v4633_v41 = vld [vmem:[#allocation37 + $0x118] sm:$0xff] }
 0xf70   : > { %6761 = vmatprep.subr.mxu1 %v4644_v52 }
 0xf71   : > { %6762 = vmatpush3.msra.mxu1 %v4644_v52 }
 0xf72   : > { %6763 = vmatprep.subr.mxu1 %v4643_v53 }
 0xf73   : > { %6764 = vmatpush3.msra.mxu1 %v4643_v53  ;;  %v4732_v53 = vld [vmem:[%s8070_s30] sm:$0x1] }
 0xf74   : > { %v4440_v38 = vld [vmem:[#allocation3] sm:$0xff]  ;;  %6765 = vmatprep.subr.mxu1 %v4642_v54 }
 0xf75   : > { %6756 = vmatprep.mubr.f32.mxu0 %v4440_v38  ;;  %v4441_v56 = vld [vmem:[#allocation3 + $0x8] sm:$0xff]  ;;  %6766 = vmatpush3.msra.mxu1 %v4642_v54 }
 0xf76   : > { %v4627_v57 = vld [vmem:[#allocation3 + $0x2] sm:$0xff]  ;;  %6757 = vmatmul.mubr.f32.vlgmr.msra.gmra.mxu0 %v4441_v56  ;;  %6767 = vmatprep.subr.mxu1 %v4641_v55  ;;  %v4628_v63 = vld [vmem:[#allocation3 + $0xa] sm:$0xff] }
 0xf77   : > { %6791 = vmatprep.mubr.f32.mxu1 %v4627_v57  ;;  %6795 = vmatpush3.msra.mxu0 %v8755_v15  ;;  %v5509_v57 = vld [vmem:[%s9119_s22] ss:$0 sm:$0xff]  ;;  %s7738_s22 = scalar_lea.vmem %s8982_s28, 256 }
 0xf78   : > { %6768 = vmatpush3.msra.mxu1 %v4641_v55  ;;  %6796 = vmatprep.subr.mxu0 %v7900_v0  ;;  %p7739_p5 = scmp.ne.s32.totalorder %s8982_s28, %s7738_s22  ;;  %p7746_p11 = scmp.lt.s32.totalorder %s7744_s26, %s7738_s22 }
 0xf79   : > { %6769 = vmatprep.subr.mxu1 %v4640_v36  ;;  %6797 = vmatpush3.msra.mxu0 %v8758_v16 }
 0xf7a   : > { %6770 = vmatpush3.msra.mxu1 %v4640_v36  ;;  %6798 = vmatprep.subr.mxu0 %v7900_v0  ;;  %p7740_p8 = pnand %p7739_p5, %p9121_p13  ;;  %p7747_p6 = por %p7746_p11, %p7745_p10 }
 0xf7b   : > { %6771 = vmatprep.subr.mxu1 %v4639_v37  ;;  %6799 = vmatpush3.msra.mxu0 %v8763_v17 }
 0xf7c   : > { %6772 = vmatpush3.msra.mxu1 %v4639_v37  ;;  %6800 = vmatprep.subr.mxu0 %v7900_v0  ;;  %p7741_p9 = pneg %p7740_p8 }
 0xf7d   : > { %6773 = vmatprep.subr.mxu1 %v4638_v59  ;;  %6801 = vmatpush3.msra.mxu0 %v8768_v18 }
 0xf7e   : > { %6774 = vmatpush3.msra.mxu1 %v4638_v59  ;;  %6802 = vmatprep.subr.mxu0 %v7900_v0  ;;  %p7748_p1 = pnand %p7747_p6, %p7741_p9 }
 0xf7f   : > { %6775 = vmatprep.subr.mxu1 %v4637_v10  ;;  %6803 = vmatpush3.msra.mxu0 %v8773_v35 }
 0xf80   : > { %6776 = vmatpush3.msra.mxu1 %v4637_v10  ;;  %6804 = vmatprep.subr.mxu0 %v7900_v0 }
 0xf81   : > { %6777 = vmatprep.subr.mxu1 %v4636_v60  ;;  %6805 = vmatpush3.msra.mxu0 %v8780_v19 }
 0xf82   : > { %6778 = vmatpush3.msra.mxu1 %v4636_v60  ;;  %6806 = vmatprep.subr.mxu0 %v7900_v0 }
 0xf83   : > { %6779 = vmatprep.subr.mxu1 %v4635_v48  ;;  %6807 = vmatpush3.msra.mxu0 %v8785_v20 }
 0xf84   : > { %6780 = vmatpush3.msra.mxu1 %v4635_v48  ;;  %6808 = vmatprep.subr.mxu0 %v7900_v0 }
 0xf85   : > { %6781 = vmatprep.subr.mxu1 %v4634_v40  ;;  %6809 = vmatpush3.msra.mxu0 %v8790_v21 }
 0xf86   : > { %6782 = vmatpush3.msra.mxu1 %v4634_v40  ;;  %6810 = vmatprep.subr.mxu0 %v7900_v0 }
 0xf87   : > { %6783 = vmatprep.subr.mxu1 %v4633_v41  ;;  %6811 = vmatpush3.msra.mxu0 %v8795_v22 }
 0xf88   : > { %6784 = vmatpush3.msra.mxu1 %v4633_v41  ;;  %6812 = vmatprep.subr.mxu0 %v7900_v0 }
 0xf89   : > { %6785 = vmatprep.subr.mxu1 %v4632_v42  ;;  %6813 = vmatpush3.msra.mxu0 %v8800_v23 }
 0xf8a   : > { %6786 = vmatpush3.msra.mxu1 %v4632_v42  ;;  %6814 = vmatprep.subr.mxu0 %v7900_v0 }
 0xf8b   : > { %6787 = vmatprep.subr.mxu1 %v4631_v61  ;;  %6815 = vmatpush3.msra.mxu0 %v8805_v24 }
 0xf8c   : > { %6788 = vmatpush3.msra.mxu1 %v4631_v61  ;;  %6816 = vmatprep.subr.mxu0 %v7900_v0 }
 0xf8d   : > { %6789 = vmatprep.subr.mxu1 %v4630_v62  ;;  %6817 = vmatpush3.msra.mxu0 %v8810_v25 }
 0xf8e   : > { %6790 = vmatpush3.msra.mxu1 %v4630_v62  ;;  %6818 = vmatprep.subr.mxu0 %v7900_v0 }
 0xf8f   : > { %6792 = vmatmul.mubr.f32.vlgmr.msra.gmra.mxu1 %v4628_v63  ;;  %6819 = vmatpush3.msra.mxu0 %v8815_v26 }
 0xf90   : > { %6820 = vmatprep.subr.mxu0 %v7900_v0  ;;  %6826 = vmatprep.mubr.msk.f32.mxu0 %vm7901_vm1, %v7900_v0 }
 0xf91   : > { %6821 = vmatpush3.msra.mxu0 %v8820_v27  ;;  %6829 = vmatprep.subr.mxu1 %v7900_v0 }
 0xf92   : > { %6822 = vmatprep.subr.mxu0 %v7900_v0  ;;  %6831 = vmatprep.mubr.msk.f32.mxu1 %vm7901_vm1, %v7900_v0 }
 0xf93   : > { %6823 = vmatpush3.msra.mxu0 %v8823_v28  ;;  %6830 = vmatpush3.msk.msra.mxu1 %vm2785_vm7, %v4750_v1 }
 0xf94   : > { %6824 = vmatprep.subr.mxu0 %v7900_v0  ;;  %6834 = vmatprep.subr.mxu1 %v7900_v0 }
 0xf95   : > { %6825 = vmatpush3.msra.mxu0 %v8828_v11 }
 0xf96   : > { %6869 = vmatprep.subr.mxu0 %v7900_v0 }
0x102e   : > { %v6723_v2 = vpop.f32.mrf.mxu1 }
0x1030   : > { %v4543_v7 = vpop.f32.mrf.mxu1 }
0x1036   : > { %v6758_v4 = vpop.f32.mrf.mxu0 }
0x1037   : > { %v4624_v9 = vadd.f32 %v6758_v4, %v6723_v2 }
0x1038   : > { %v4618_v8 = vpop.f32.mrf.mxu0 }
0x1039   : > { %v4619_v13 = vadd.f32 %v4618_v8, %v4543_v7 }
0x104f   : > { %v6793_v12 = vpop.f32.mrf.mxu1 }
0x1050   : > { %v4722_v29 = vadd.f32 %v6793_v12, %v4624_v9 }
0x1051   : > { %v4712_v31 = vpop.f32.mrf.mxu1 }
0x1052   : > { %v4721_v43 = vadd.f32 %v4712_v31, %v4619_v13  ;;  %v4731_v58 = vadd.f32 %v5504_v30, %v4722_v29 }
0x1054   : > { %v4730_v32 = vadd.f32 %v5504_v30, %v4721_v43 }
0x1056   : > { %v4751_v33 = vadd.f32 %v4731_v58, %v4730_v32 }
0x1058   : > { %v4752_v44 = vrot.slane %v4751_v33, 4 }
0x105a   : > { %v4753_v5 = vadd.f32 %v4752_v44, %v4751_v33 }
0x105c   : > { %v4754_v45 = vrot.slane %v4753_v5, 2 }
0x105e   : > { %v4755_v6 = vadd.f32 %v4754_v45, %v4753_v5 }
0x1060   : > { %v4756_v46 = vrot.slane %v4755_v6, 1 }
0x1062   : > { %v4757_v49 = vadd.f32 %v4756_v46, %v4755_v6 }
0x1064   : > { %6827 = vmatmul.mubr.f32.vlgmr.msra.gmra.mxu0 %v4757_v49 }
0x1065   : > { %6870 = vmatpush3.msk.msra.mxu0 %vm2785_vm7, %v4750_v1  ;;  %6871 = vmatprep.mubr.msk.f32.mxu0 %vm7901_vm1, %v7900_v0 }
0x1124   : > { %v4824_v14 = vpop.f32.mrf.mxu0 }
0x1125   : > { %v4828_v47 = vmul.f32 0.0009765625, %v4824_v14 }
0x1126   : > { %v6828_v50 = vpop.f32.mrf.mxu0 }
0x1127   : > { %6832 = vmatmul.mubr.msk.f32.vlgmr.msra.gmra.mxu1 %vm2781_vm8, %v4828_v47 }
0x1128   : > { %6835 = vmatpush3.msra.mxu1 %v8755_v15  ;;  %6866 = vmatprep.mubr.msk.f32.mxu1 %vm7901_vm1, %v7900_v0 }
0x1129   : > { %6836 = vmatprep.subr.mxu1 %v7900_v0 }
0x112a   : > { %6837 = vmatpush3.msra.mxu1 %v8758_v16 }
0x112b   : > { %6838 = vmatprep.subr.mxu1 %v7900_v0 }
0x112c   : > { %6839 = vmatpush3.msra.mxu1 %v8763_v17 }
0x112d   : > { %6840 = vmatprep.subr.mxu1 %v7900_v0 }
0x112e   : > { %6841 = vmatpush3.msra.mxu1 %v8768_v18 }
0x112f   : > { %6842 = vmatprep.subr.mxu1 %v7900_v0 }
0x1130   : > { %6843 = vmatpush3.msra.mxu1 %v8773_v35 }
0x1131   : > { %6844 = vmatprep.subr.mxu1 %v7900_v0 }
0x1132   : > { %6845 = vmatpush3.msra.mxu1 %v8780_v19 }
0x1133   : > { %6846 = vmatprep.subr.mxu1 %v7900_v0 }
0x1134   : > { %6847 = vmatpush3.msra.mxu1 %v8785_v20 }
0x1135   : > { %6848 = vmatprep.subr.mxu1 %v7900_v0 }
0x1136   : > { %6849 = vmatpush3.msra.mxu1 %v8790_v21 }
0x1137   : > { %6850 = vmatprep.subr.mxu1 %v7900_v0 }
0x1138   : > { %6851 = vmatpush3.msra.mxu1 %v8795_v22 }
0x1139   : > { %6852 = vmatprep.subr.mxu1 %v7900_v0 }
0x113a   : > { %6853 = vmatpush3.msra.mxu1 %v8800_v23 }
0x113b   : > { %6854 = vmatprep.subr.mxu1 %v7900_v0 }
0x113c   : > { %6855 = vmatpush3.msra.mxu1 %v8805_v24 }
0x113d   : > { %6856 = vmatprep.subr.mxu1 %v7900_v0 }
0x113e   : > { %6857 = vmatpush3.msra.mxu1 %v8810_v25 }
0x113f   : > { %6858 = vmatprep.subr.mxu1 %v7900_v0 }
0x1140   : > { %6859 = vmatpush3.msra.mxu1 %v8815_v26 }
0x1141   : > { %6860 = vmatprep.subr.mxu1 %v7900_v0 }
0x1142   : > { %6861 = vmatpush3.msra.mxu1 %v8820_v27 }
0x1143   : > { %6862 = vmatprep.subr.mxu1 %v7900_v0 }
0x1144   : > { %6863 = vmatpush3.msra.mxu1 %v8823_v28 }
0x1145   : > { %6864 = vmatprep.subr.mxu1 %v7900_v0 }
0x1146   : > { %6865 = vmatpush3.msra.mxu1 %v8828_v11 }
0x11e7   : > { %v4901_v15 = vpop.f32.mrf.mxu1 }
0x11e8   : > { %v4908_v16 = vrot.slane %v4901_v15, %v8455_v34 }
0x11e9   : > { %v6833_v17 = vpop.f32.mrf.mxu1 }
0x11ea   : > { %v4909_v18 = vsub.f32 %v4730_v32, %v4908_v16  ;;  %v4910_v35 = vsub.f32 %v4731_v58, %v4908_v16 }
0x11ec   : > { %v4911_v19 = vmul.f32 %v4909_v18, %v4909_v18  ;;  %v4912_v20 = vmul.f32 %v4910_v35, %v4910_v35 }
0x11ee   : > { %v4913_v21 = vadd.f32 %v4912_v20, %v4911_v19 }
0x11f0   : > { %v4914_v22 = vrot.slane %v4913_v21, 4 }
0x11f2   : > { %v4915_v23 = vadd.f32 %v4914_v22, %v4913_v21 }
0x11f4   : > { %v4916_v24 = vrot.slane %v4915_v23, 2 }
0x11f6   : > { %v4917_v25 = vadd.f32 %v4916_v24, %v4915_v23 }
0x11f8   : > { %v4918_v26 = vrot.slane %v4917_v25, 1 }
0x11fa   : > { %v4919_v0 = vadd.f32 %v4918_v26, %v4917_v25 }
0x11fc   : > { %6867 = vmatmul.mubr.f32.vlgmr.msra.gmra.mxu1 %v4919_v0 }
0x12bc   : > { %v4986_v27 = vpop.f32.mrf.mxu1 }
0x12bd   : > { %v4990_v28 = vmul.f32 0.0009765625, %v4986_v27 }
0x12be   : > { %v6868_v11 = vpop.f32.mrf.mxu1 }
0x12bf   : > { %v4991_v51 = vadd.f32 1e-05, %v4990_v28 }
0x12c1   : > { %7188 = vrsqrt.f32 %v4991_v51 }
0x12ce   : > { %v7189_v52 = vpop.eup %7188 }
0x12cf   : > { %6872 = vmatmul.mubr.msk.f32.vlgmr.msra.gmra.mxu0 %vm2781_vm8, %v7189_v52 }
0x138f   : > { %v5062_v54 = vpop.f32.mrf.mxu0 }
0x1390   : > { %v5066_v38 = vmul.f32 %v5062_v54, %v4732_v53 }
0x1391   : > { %v6873_v55 = vpop.f32.mrf.mxu0 }
0x1392   : > { %v5070_v56 = vrot.slane %v5066_v38, %v8455_v34 }
0x1394   : > { %v5071_v36 = vmul.f32 %v5070_v56, %v4909_v18  ;;  %v5072_v37 = vmul.f32 %v5070_v56, %v4910_v35 }
0x1396   : > { %v5079_v59 = vadd.f32 %v5509_v57, %v5071_v36  ;;  %v5080_v10 = vadd.f32 %v5509_v57, %v5072_v37 }
0x1398   : > { %v5081_v60 = vadd.f32 %v5079_v59, %v8741_v39  ;;  %v5082_v34 = vadd.f32 %v5080_v10, %v8743_v3 }
0x139a   : > { %5083 = vst [vmem:[%s1327_s4] sm:$0xff] %v5081_v60  ;;  %5084 = vst [vmem:[%s1327_s4 + $0x8] sm:$0xff] %v5082_v34 }
0x139b   : > { %7751 = shalt.err (!%p7748_p1)
}
0x139c   : > { %s7752_s4 = scalar_lea.hbm %s8980_s5, 256  ;;  %s7756_s6 = scalar_lea.hbm %s9120_s16, 512 }
0x139d   : > { %p7753_p3 = scmp.ne.s32.totalorder %s8980_s5, %s7752_s4  ;;  %p7757_p12 = scmp.lt.s32.totalorder %s8980_s5, %s9120_s16 }
0x139e   : > { %p7758_p0 = scmp.lt.s32.totalorder %s7756_s6, %s7752_s4 }
0x139f   : > { %p7754_p4 = pnand %p7753_p3, %p9121_p13 }
0x13a0   : > { %p7759_p2 = por %p7758_p0, %p7757_p12 }
0x13a1   : > { %p7755_p7 = pneg %p7754_p4 }
0x13a3   : > { %p7760_p5 = pnand %p7759_p2, %p7755_p7 }
0x13a5   : > { %7763 = shalt.err (!%p7760_p5)
}
0x13a6   : > { %s7905_s22 = smov 128   ;;  %s7906_s18 = smov 8  }
0x13a7   : > { %s9122_s23 = scalar_lea.sflag [#allocation7], %s8333_s8 }
0x13a8   : > { %6956 = dma.vmem_to_hbm [thread:$0]  (%p9121_p13), %s8982_s28, 256, %s8980_s5, %s9122_s23, %s7905_s22, %s7905_s22, %s7906_s18  }
0x13a9 PF: > { %s5114_s26 = sand.u32 1, %s7830_s7   ;;  %p9123_p8 = scmp.ne.s32.totalorder %s9086_s3, 0 }
0x13aa   : > { %p9124_p9 = scmp.ge.s32.totalorder %s7842_s11, 2  ;;  %s5115_s6 = scalar_lea.sflag [#allocation7], %s5114_s26 }
0x13ac   : > { %p7024_p10 = pnand %p9124_p9, %p9123_p8 }
0x13ae   : > { %p7025_p11 = pneg %p7024_p10 }
0x13b0   : > { %7825 = dma.done.wait (%p7025_p11), %s5115_s6, 256  }
0x13b1   : > { %7827 = vsyncadd (%p7025_p11), %s5115_s6, 4294967040  ;;  %p90_p6 = scmp.ge.s32.totalorder %s8276_s15, 4   ;;  %s9125_s7 = smov %s7834_s10 }
0x13b2   : > { %s9126_s10 = smov %s7838_s0  ;;  %s9127_s0 = smov %s8287_s1 }
0x13b3   : > { %s9128_s11 = smov %s8276_s15  ;;  %92 = sbr.rel (!%p90_p6) target bundleno = 80 (0x50), region = 326 }
0x13b8   :  { %5120 = vsyncpa [#allocation6], 1 }
0x13b9   :  { %5122 = vsyncpa [#allocation6 + $0x1], 1 }
0x13ba   :  { %5123 = vsyncpa [#allocation9], 1 }
0x13bb   :  { %5124 = vsyncpa [#allocation12], 1 }
0x13bc   :  { %5125 = vsyncpa [#allocation15], 1 }
0x13bd   :  { %5126 = vsyncpa [#allocation18], 1 }
0x13be   :  { %5127 = vsyncpa [#allocation21], 1 }
0x13bf   :  { %5128 = vsyncpa [#allocation24], 1 }
0x13c0   :  { %5129 = vsyncpa [#allocation27], 1 }
0x13c1   :  { %5130 = vsyncpa [#allocation30], 1 }
0x13c2   :  { %5131 = vsyncpa [#allocation33], 1 }
0x13c3   :  { %5132 = vsyncpa [#allocation36], 1 }
0x13c4   :  { %5133 = vsyncpa [#allocation7], 1 }
0x13c5   :  { %5135 = vsyncpa [#allocation7 + $0x1], 1 }

</bundles_post_ra>
